<compile_context>
chip_gen: v6e
topology: v6e:2x2x1
jax: 0.10.0
libtpu: 0.0.40
codegen_flags: <defaults>
</compile_context>

<pallas_src>
import functools

import jax
import jax.numpy as jnp
from jax.experimental import pallas as pl
from jax.experimental.pallas import tpu as pltpu


# ----------------------------------------------------------------------------
# small helpers
# ----------------------------------------------------------------------------
def _round_up(n, m):
    return (n + m - 1) // m * m


def _largest_tile(n, cap, mult):
    """Largest d <= cap with d % mult == 0 and n % d == 0 (fallback n)."""
    cap = min(cap, n)
    start = cap - (cap % mult) if cap >= mult else 0
    for d in range(start, 0, -mult):
        if n % d == 0:
            return d
    return n


def _vmem_limit(working_set_bytes):
    # working set (already includes double buffers) + headroom, floored at the
    # v6e/v7x default scoped limit, capped below physical VMEM.
    return int(min(100 * 1024 * 1024,
                   max(32 * 1024 * 1024, working_set_bytes + (4 << 20))))


# ----------------------------------------------------------------------------
# Kernel 1: fused 3-layer LSTM stack, grid over time chunks.
# ----------------------------------------------------------------------------
def _lstm_stack_kernel(
    emb_ref,                                   # (Tc*Bp, Ep) chunk of inputs
    wih0_ref, whh0_ref, b0_ref,                # (Ep,4Hp), (Hp,4Hp), (1,4Hp)
    wih1_ref, whh1_ref, b1_ref,                # (Hp,4Hp), (Hp,4Hp), (1,4Hp)
    wih2_ref, whh2_ref, b2_ref,                # (Hp,4Ep), (Ep,4Ep), (1,4Ep)
    out_ref,                                   # (Tc*Bp, Ep) layer-2 output
    act0_sc, act1_sc,                          # (Tc*Bp, Hp) layer activations
    gates_sc,                                  # (Tc*Bp, 4*Dmax) gate pre-acts
    hc_sc,                                     # (6, Bp, Dmax) carried h/c
    *, chunk_len, batch_p, hid_p, emb_p,
):
    # Zero the carried hidden/cell state on the first time chunk only.
    @pl.when(pl.program_id(0) == 0)
    def _():
        hc_sc[...] = jnp.zeros_like(hc_sc)

    if chunk_len <= 8:
        unroll = chunk_len
    else:
        unroll = 1
        for u in (8, 7, 6, 5, 4, 3, 2):
            if chunk_len % u == 0:
                unroll = u
                break

    def run_layer(x, wih_ref, whh_ref, b_ref, hid, layer_idx, out_view):
        four_h = 4 * hid
        gates_view = (gates_sc if four_h == gates_sc.shape[-1]
                      else gates_sc.at[:, 0:four_h])

        # Hoisted input projection for the whole chunk (bias folded in):
        # one big MXU matmul instead of Tc tiny ones.
        gates_view[...] = (
            jnp.dot(x.astype(wih_ref.dtype), wih_ref[...],
                    preferred_element_type=jnp.float32)
            + b_ref[...])

        whh = whh_ref[...]                              # loop-invariant
        h0 = hc_sc[2 * layer_idx, :, 0:hid]
        c0 = hc_sc[2 * layer_idx + 1, :, 0:hid]

        def step(t, carry):
            h, c = carry
            row = pl.multiple_of(t * batch_p, batch_p)  # sublane-aligned
            pre = (gates_view[pl.ds(row, batch_p), :]
                   + jnp.dot(h.astype(whh.dtype), whh,
                             preferred_element_type=jnp.float32))
            # Gate layout is [i | f | o | g]; every block is a 128-multiple of
            # lanes, so these slices are full-vreg (no cross-lane work), and
            # sigmoid touches only the 3 gates that need it.
            ifo = jax.nn.sigmoid(pre[:, 0:3 * hid])
            g_g = jnp.tanh(pre[:, 3 * hid:4 * hid])
            i_g = ifo[:, 0:hid]
            f_g = ifo[:, hid:2 * hid]
            o_g = ifo[:, 2 * hid:3 * hid]
            c_new = f_g * c + i_g * g_g
            h_new = o_g * jnp.tanh(c_new)
            out_view[pl.ds(row, batch_p), :] = h_new
            return h_new, c_new

        h_f, c_f = jax.lax.fori_loop(0, chunk_len, step, (h0, c0),
                                     unroll=unroll)
        hc_sc[2 * layer_idx, :, 0:hid] = h_f
        hc_sc[2 * layer_idx + 1, :, 0:hid] = c_f
        return out_view[...]

    # TODO(synk): wavefront-pipeline the three layer recurrences (diagonal
    # schedule over (layer, t)) to hide per-step MXU/EUP latency; they run
    # back-to-back here.
    # TODO(synk): v7x megacore batch split (leading "parallel" grid axis of
    # size 2 with per-core h/c scratch) not implemented.
    x0 = emb_ref[...]
    x1 = run_layer(x0, wih0_ref, whh0_ref, b0_ref, hid_p, 0, act0_sc)
    x2 = run_layer(x1, wih1_ref, whh1_ref, b1_ref, hid_p, 1, act1_sc)
    run_layer(x2, wih2_ref, whh2_ref, b2_ref, emb_p, 2, out_ref)


# ----------------------------------------------------------------------------
# Kernel 2: tied FC projection as a standard tiled matmul.
# ----------------------------------------------------------------------------
def _fc_kernel(x_ref, w_ref, b_ref, o_ref):
    o_ref[...] = (
        jnp.dot(x_ref[...].astype(w_ref.dtype), w_ref[...],
                preferred_element_type=jnp.float32)
        + b_ref[...]).astype(o_ref.dtype)


# ----------------------------------------------------------------------------
# AWD_LSTM forward (eval mode)
# ----------------------------------------------------------------------------
def awd_lstm_forward(params, x_ids, weight_drop=0.5, *, time_chunk=None,
                     use_bf16=False):
    """x_ids: (T, B) int32 token ids -> logits (T, B, vocab_size) f32."""
    emb_w = params["embedding"]                        # (V, E)
    V, E = emb_w.shape
    T, B = x_ids.shape
    H = params["lstms"][0]["w_hh_raw"].shape[1]

    compute_dtype = jnp.bfloat16 if use_bf16 else jnp.float32

    Ep = _round_up(E, 128)
    Hp = _round_up(H, 128)
    Vp = _round_up(V, 128)
    Bp = _round_up(B, 8)
    Dmax = max(Ep, Hp)

    if time_chunk is None:
        time_chunk = _largest_tile(T, 16, 1)
    Tc = int(time_chunk)
    assert T % Tc == 0, "time_chunk must divide seq_len"
    num_chunks = T // Tc
    chunk_rows = Tc * Bp

    # ---- eval-mode glue in plain JAX: embedding gather + padding ----------
    emb = jnp.take(emb_w, x_ids, axis=0)                       # (T, B, E)
    emb = jnp.pad(emb, ((0, 0), (0, Bp - B), (0, Ep - E)))
    emb = emb.reshape(T * Bp, Ep).astype(compute_dtype)

    def prep(layer, in_dim, in_p, hid, hid_p):
        # WeightDrop (as written in the spec) in eval: mask = ones*(1-p).
        w_ih = layer["w_ih"]                                   # (4h, in)
        w_hh = layer["w_hh_raw"] * (1.0 - weight_drop)         # (4h, h)
        bias = layer["b_ih"] + layer["b_hh"]                   # (4h,)

        def reorder_pad(w):
            # PyTorch gate order [i, f, g, o] -> lane-aligned [i, f, o, g],
            # each gate block zero-padded to hid_p rows.
            i, f, g, o = jnp.split(w, 4, axis=0)
            return jnp.concatenate(
                [jnp.pad(blk, ((0, hid_p - hid), (0, 0)))
                 for blk in (i, f, o, g)], axis=0)

        w_ih_r = jnp.pad(reorder_pad(w_ih), ((0, 0), (0, in_p - in_dim)))
        w_hh_r = jnp.pad(reorder_pad(w_hh), ((0, 0), (0, hid_p - hid)))
        b_r = reorder_pad(bias[:, None])[:, 0]
        return (w_ih_r.T.astype(compute_dtype),                # (in_p, 4hid_p)
                w_hh_r.T.astype(compute_dtype),                # (hid_p, 4hid_p)
                b_r.reshape(1, 4 * hid_p).astype(jnp.float32))

    l0 = prep(params["lstms"][0], E, Ep, H, Hp)
    l1 = prep(params["lstms"][1], H, Hp, H, Hp)
    l2 = prep(params["lstms"][2], H, Hp, E, Ep)

    # ---- pallas_call 1: fused LSTM stack, grid over time chunks ------------
    full_w = lambda c: (0, 0)
    chunk_map = lambda c: (c, 0)

    weight_bytes = sum(int(a.size) * a.dtype.itemsize
                       for t in (l0, l1, l2) for a in t)
    io_bytes = 2 * 2 * chunk_rows * Ep * 4                    # dbl-buf in/out
    scratch_bytes = (2 * chunk_rows * Hp + chunk_rows * 4 * Dmax
                     + 6 * Bp * Dmax) * 4
    lstm_vmem = _vmem_limit(2 * weight_bytes + io_bytes + scratch_bytes)

    x3 = pl.pallas_call(
        functools.partial(_lstm_stack_kernel, chunk_len=Tc, batch_p=Bp,
                          hid_p=Hp, emb_p=Ep),
        out_shape=jax.ShapeDtypeStruct((T * Bp, Ep), jnp.float32),
        grid_spec=pltpu.PrefetchScalarGridSpec(
            num_scalar_prefetch=0,
            grid=(num_chunks,),
            in_specs=[
                pl.BlockSpec((chunk_rows, Ep), chunk_map),     # emb chunk
                # layer 0
                pl.BlockSpec((Ep, 4 * Hp), full_w),
                pl.BlockSpec((Hp, 4 * Hp), full_w),
                pl.BlockSpec((1, 4 * Hp), full_w),
                # layer 1
                pl.BlockSpec((Hp, 4 * Hp), full_w),
                pl.BlockSpec((Hp, 4 * Hp), full_w),
                pl.BlockSpec((1, 4 * Hp), full_w),
                # layer 2 (hidden -> embedding_dim)
                pl.BlockSpec((Hp, 4 * Ep), full_w),
                pl.BlockSpec((Ep, 4 * Ep), full_w),
                pl.BlockSpec((1, 4 * Ep), full_w),
            ],
            out_specs=pl.BlockSpec((chunk_rows, Ep), chunk_map),
            scratch_shapes=[
                pltpu.VMEM((chunk_rows, Hp), jnp.float32),       # layer-0 act
                pltpu.VMEM((chunk_rows, Hp), jnp.float32),       # layer-1 act
                pltpu.VMEM((chunk_rows, 4 * Dmax), jnp.float32), # gate pre-acts
                pltpu.VMEM((6, Bp, Dmax), jnp.float32),          # carried h/c
            ],
        ),
        compiler_params=pltpu.CompilerParams(
            dimension_semantics=("arbitrary",),
            vmem_limit_bytes=lstm_vmem),
    )(emb, *l0, *l1, *l2)

    # ---- pallas_call 2: tied FC projection, tiled over (rows, vocab) -------
    fcw = jnp.pad(emb_w.T, ((0, Ep - E), (0, Vp - V))).astype(compute_dtype)
    fcb = jnp.pad(params["fc_b"], (0, Vp - V)).reshape(1, Vp).astype(jnp.float32)

    M = T * Bp
    tm = _largest_tile(M, 512, 8)
    tn = _largest_tile(Vp, 512, 128)

    fc_vmem = _vmem_limit(
        2 * (tm * Ep + Ep * tn + tn + tm * tn) * 4 * 2)

    logits = pl.pallas_call(
        _fc_kernel,
        out_shape=jax.ShapeDtypeStruct((M, Vp), jnp.float32),
        grid_spec=pltpu.PrefetchScalarGridSpec(
            num_scalar_prefetch=0,
            grid=(M // tm, Vp // tn),
            in_specs=[
                pl.BlockSpec((tm, Ep), lambda i, j: (i, 0)),
                pl.BlockSpec((Ep, tn), lambda i, j: (0, j)),
                pl.BlockSpec((1, tn), lambda i, j: (0, j)),
            ],
            out_specs=pl.BlockSpec((tm, tn), lambda i, j: (i, j)),
        ),
        compiler_params=pltpu.CompilerParams(
            dimension_semantics=("parallel", "parallel"),
            vmem_limit_bytes=fc_vmem),
    )(x3, fcw, fcb)

    return logits.reshape(T, Bp, Vp)[:, :B, :V]


# ----------------------------------------------------------------------------
# Pure-JAX reference (eval-mode semantics of the PyTorch module)
# ----------------------------------------------------------------------------
def _reference_forward(params, x_ids, weight_drop=0.5):
    hi = jax.lax.Precision.HIGHEST
    emb_w = params["embedding"]
    x = jnp.take(emb_w, x_ids, axis=0)                        # (T, B, E)
    for layer in params["lstms"]:
        w_ih = layer["w_ih"]
        w_hh = layer["w_hh_raw"] * (1.0 - weight_drop)
        b = layer["b_ih"] + layer["b_hh"]
        hd = w_hh.shape[1]
        batch = x.shape[1]

        def step(carry, x_t, w_ih=w_ih, w_hh=w_hh, b=b, hd=hd):
            h, c = carry
            g = (jnp.dot(x_t, w_ih.T, precision=hi)
                 + jnp.dot(h, w_hh.T, precision=hi) + b)
            i = jax.nn.sigmoid(g[:, 0:hd])
            f = jax.nn.sigmoid(g[:, hd:2 * hd])
            gg = jnp.tanh(g[:, 2 * hd:3 * hd])
            o = jax.nn.sigmoid(g[:, 3 * hd:4 * hd])
            c = f * c + i * gg
            h = o * jnp.tanh(c)
            return (h, c), h

        init = (jnp.zeros((batch, hd), jnp.float32),
                jnp.zeros((batch, hd), jnp.float32))
        _, x = jax.lax.scan(step, init, x)
    T, B = x.shape[0], x.shape[1]
    logits = jnp.dot(x.reshape(T * B, -1), emb_w.T, precision=hi) + params["fc_b"]
    return logits.reshape(T, B, -1)


# ----------------------------------------------------------------------------
# Deterministic parameter init (mirrors the PyTorch __init__ shapes)
# ----------------------------------------------------------------------------
def init_params(key, vocab_size, embedding_dim, hidden_dim):
    ks = jax.random.split(key, 16)
    k_iter = iter(ks)

    params = {}
    params["embedding"] = jax.random.uniform(
        next(k_iter), (vocab_size, embedding_dim), jnp.float32, -0.1, 0.1)

    layer_dims = [
        (embedding_dim, hidden_dim),
        (hidden_dim, hidden_dim),
        (hidden_dim, embedding_dim),
    ]
    lstms = []
    for in_dim, h_dim in layer_dims:
        stdv = 1.0 / jnp.sqrt(h_dim)
        lstms.append({
            "w_ih": jax.random.uniform(next(k_iter), (4 * h_dim, in_dim),
                                       jnp.float32, -stdv, stdv),
            "w_hh_raw": jax.random.uniform(next(k_iter), (4 * h_dim, h_dim),
                                           jnp.float32, -stdv, stdv),
            "b_ih": jax.random.uniform(next(k_iter), (4 * h_dim,),
                                       jnp.float32, -stdv, stdv),
            "b_hh": jax.random.uniform(next(k_iter), (4 * h_dim,),
                                       jnp.float32, -stdv, stdv),
        })
    params["lstms"] = lstms

    # fc.weight is tied to embedding weight; only the bias is free.
    fc_stdv = 1.0 / jnp.sqrt(embedding_dim)
    params["fc_b"] = jax.random.uniform(next(k_iter), (vocab_size,),
                                        jnp.float32, -fc_stdv, fc_stdv)
    return params


if __name__ == "__main__":
    vocab_size = 256
    embedding_dim = 32
    hidden_dim = 32
    seq_len = 8
    batch = 8

    key = jax.random.PRNGKey(0)
    k_param, k_data = jax.random.split(key)

    params = init_params(k_param, vocab_size, embedding_dim, hidden_dim)
    x_ids = jax.random.randint(k_data, (seq_len, batch), 0, vocab_size,
                               dtype=jnp.int32)

    fwd = jax.jit(functools.partial(awd_lstm_forward, weight_drop=0.5,
                                    time_chunk=4))
    logits = fwd(params, x_ids)
    jax.block_until_ready(logits)

    assert logits.shape == (seq_len, batch, vocab_size)
    assert logits.dtype == jnp.float32

    ref = _reference_forward(params, x_ids, weight_drop=0.5)
    err = float(jnp.max(jnp.abs(logits - ref)))
    assert err < 2e-3, f"max abs error vs pure-JAX reference: {err}"

    print("KERNEL_OK")
</pallas_src>

<mosaic_0001>
module attributes {stable_mosaic.version = 11 : i64} {
  func.func @_fc_kernel(%arg0: i32, %arg1: i32, %arg2: memref<64x128xf32, #tpu.memory_space<vmem>>, %arg3: memref<128x256xf32, #tpu.memory_space<vmem>>, %arg4: memref<1x256xf32, #tpu.memory_space<vmem>>, %arg5: memref<64x256xf32, #tpu.memory_space<vmem>>) attributes {dimension_semantics = [#tpu.dimension_semantics<parallel>, #tpu.dimension_semantics<parallel>], iteration_bounds = array<i64: 1, 1>, scalar_prefetch = 0 : i64, scratch_operands = 0 : i64, tpu.core_type = #tpu.core_type<tc>, window_params = [{transform_indices = @transform_0, window_bounds = array<i64: 64, 128>}, {transform_indices = @transform_1, window_bounds = array<i64: 128, 256>}, {transform_indices = @transform_2, window_bounds = array<i64: 1, 256>}, {transform_indices = @transform_3, window_bounds = array<i64: 64, 256>}]} {
    %c0 = arith.constant 0 : index
    %c0_0 = arith.constant 0 : index
    %0 = vector.load %arg2[%c0, %c0_0] : memref<64x128xf32, #tpu.memory_space<vmem>>, vector<64x128xf32>
    %c0_1 = arith.constant 0 : index
    %c0_2 = arith.constant 0 : index
    %1 = vector.load %arg3[%c0_1, %c0_2] : memref<128x256xf32, #tpu.memory_space<vmem>>, vector<128x256xf32>
    %cst = arith.constant dense<0.000000e+00> : vector<64x256xf32>
    %2 = tpu.matmul %0, %1, %cst {dimension_numbers = #tpu.dot_dimension_numbers<[1], [0], [0], [1], [0, 0, 1, 1], [], []>} : vector<64x128xf32>, vector<128x256xf32>, vector<64x256xf32> -> vector<64x256xf32>
    %c0_3 = arith.constant 0 : index
    %c0_4 = arith.constant 0 : index
    %3 = vector.load %arg4[%c0_3, %c0_4] : memref<1x256xf32, #tpu.memory_space<vmem>>, vector<1x256xf32>
    %4 = vector.broadcast %3 : vector<1x256xf32> to vector<64x256xf32>
    %5 = arith.addf %2, %4 : vector<64x256xf32>
    %c0_5 = arith.constant 0 : index
    %c0_6 = arith.constant 0 : index
    %6 = vector.load %arg5[%c0_5, %c0_6] : memref<64x256xf32, #tpu.memory_space<vmem>>, vector<64x256xf32>
    tpu.vector_store %arg5[%c0_5, %c0_6], %5 {strides = array<i32>} : memref<64x256xf32, #tpu.memory_space<vmem>>, vector<64x256xf32>,
    return
  }
  func.func @transform_0(%arg0: i32, %arg1: i32) -> (i32, i32) {
    %c0_i32 = arith.constant 0 : i32
    %c0_i32_0 = arith.constant 0 : i32
    return %arg0, %c0_i32 : i32, i32
  }
  func.func @transform_1(%arg0: i32, %arg1: i32) -> (i32, i32) {
    %c0_i32 = arith.constant 0 : i32
    %c0_i32_0 = arith.constant 0 : i32
    return %c0_i32, %arg1 : i32, i32
  }
  func.func @transform_2(%arg0: i32, %arg1: i32) -> (i32, i32) {
    %c0_i32 = arith.constant 0 : i32
    %c0_i32_0 = arith.constant 0 : i32
    return %c0_i32, %arg1 : i32, i32
  }
  func.func @transform_3(%arg0: i32, %arg1: i32) -> (i32, i32) {
    %c0_i32 = arith.constant 0 : i32
    return %arg0, %arg1 : i32, i32
  }
}

module attributes {stable_mosaic.version = 11 : i64} {
  func.func @_lstm_stack_kernel(%arg0: i32, %arg1: memref<32x128xf32, #tpu.memory_space<vmem>>, %arg2: memref<128x512xf32, #tpu.memory_space<vmem>>, %arg3: memref<128x512xf32, #tpu.memory_space<vmem>>, %arg4: memref<1x512xf32, #tpu.memory_space<vmem>>, %arg5: memref<128x512xf32, #tpu.memory_space<vmem>>, %arg6: memref<128x512xf32, #tpu.memory_space<vmem>>, %arg7: memref<1x512xf32, #tpu.memory_space<vmem>>, %arg8: memref<128x512xf32, #tpu.memory_space<vmem>>, %arg9: memref<128x512xf32, #tpu.memory_space<vmem>>, %arg10: memref<1x512xf32, #tpu.memory_space<vmem>>, %arg11: memref<32x128xf32, #tpu.memory_space<vmem>>, %arg12: memref<32x128xf32, #tpu.memory_space<vmem>>, %arg13: memref<32x128xf32, #tpu.memory_space<vmem>>, %arg14: memref<32x512xf32, #tpu.memory_space<vmem>>, %arg15: memref<6x8x128xf32, #tpu.memory_space<vmem>>) attributes {dimension_semantics = [#tpu.dimension_semantics<arbitrary>], iteration_bounds = array<i64: 2>, scalar_prefetch = 0 : i64, scratch_operands = 4 : i64, tpu.core_type = #tpu.core_type<tc>, window_params = [{transform_indices = @transform_0, window_bounds = array<i64: 32, 128>}, {pipeline_mode = #tpu.pipeline_mode<synchronous>, transform_indices = @transform_1, window_bounds = array<i64: 128, 512>}, {pipeline_mode = #tpu.pipeline_mode<synchronous>, transform_indices = @transform_2, window_bounds = array<i64: 128, 512>}, {pipeline_mode = #tpu.pipeline_mode<synchronous>, transform_indices = @transform_3, window_bounds = array<i64: 1, 512>}, {pipeline_mode = #tpu.pipeline_mode<synchronous>, transform_indices = @transform_4, window_bounds = array<i64: 128, 512>}, {pipeline_mode = #tpu.pipeline_mode<synchronous>, transform_indices = @transform_5, window_bounds = array<i64: 128, 512>}, {pipeline_mode = #tpu.pipeline_mode<synchronous>, transform_indices = @transform_6, window_bounds = array<i64: 1, 512>}, {pipeline_mode = #tpu.pipeline_mode<synchronous>, transform_indices = @transform_7, window_bounds = array<i64: 128, 512>}, {pipeline_mode = #tpu.pipeline_mode<synchronous>, transform_indices = @transform_8, window_bounds = array<i64: 128, 512>}, {pipeline_mode = #tpu.pipeline_mode<synchronous>, transform_indices = @transform_9, window_bounds = array<i64: 1, 512>}, {transform_indices = @transform_10, window_bounds = array<i64: 32, 128>}]} {
    %c0_i32 = arith.constant 0 : i32
    %0 = arith.cmpi eq, %arg0, %c0_i32 : i32
    %1 = arith.extui %0 : i1 to i32
    %c0_i32_0 = arith.constant 0 : i32
    %2 = arith.cmpi ne, %1, %c0_i32_0 : i32
    scf.if %2 {
      %cst_133 = arith.constant 0.000000e+00 : f32
      %345 = vector.broadcast %cst_133 : f32 to vector<6x8x128xf32>
      %c0_134 = arith.constant 0 : index
      %c0_135 = arith.constant 0 : index
      %c0_136 = arith.constant 0 : index
      %346 = vector.load %arg15[%c0_134, %c0_135, %c0_136] : memref<6x8x128xf32, #tpu.memory_space<vmem>>, vector<6x8x128xf32>
      tpu.vector_store %arg15[%c0_134, %c0_135, %c0_136], %345 {strides = array<i32>} : memref<6x8x128xf32, #tpu.memory_space<vmem>>, vector<6x8x128xf32>,
    } else {
    }
    %c0 = arith.constant 0 : index
    %c0_1 = arith.constant 0 : index
    %3 = vector.load %arg1[%c0, %c0_1] : memref<32x128xf32, #tpu.memory_space<vmem>>, vector<32x128xf32>
    %c0_2 = arith.constant 0 : index
    %c0_3 = arith.constant 0 : index
    %4 = vector.load %arg2[%c0_2, %c0_3] : memref<128x512xf32, #tpu.memory_space<vmem>>, vector<128x512xf32>
    %cst = arith.constant dense<0.000000e+00> : vector<32x512xf32>
    %5 = tpu.matmul %3, %4, %cst {dimension_numbers = #tpu.dot_dimension_numbers<[1], [0], [0], [1], [0, 0, 1, 1], [], []>} : vector<32x128xf32>, vector<128x512xf32>, vector<32x512xf32> -> vector<32x512xf32>
    %c0_4 = arith.constant 0 : index
    %c0_5 = arith.constant 0 : index
    %6 = vector.load %arg4[%c0_4, %c0_5] : memref<1x512xf32, #tpu.memory_space<vmem>>, vector<1x512xf32>
    %7 = vector.broadcast %6 : vector<1x512xf32> to vector<32x512xf32>
    %8 = arith.addf %5, %7 : vector<32x512xf32>
    %c0_6 = arith.constant 0 : index
    %c0_7 = arith.constant 0 : index
    %9 = vector.load %arg14[%c0_6, %c0_7] : memref<32x512xf32, #tpu.memory_space<vmem>>, vector<32x512xf32>
    tpu.vector_store %arg14[%c0_6, %c0_7], %8 {strides = array<i32>} : memref<32x512xf32, #tpu.memory_space<vmem>>, vector<32x512xf32>,
    %c0_8 = arith.constant 0 : index
    %c0_9 = arith.constant 0 : index
    %10 = vector.load %arg3[%c0_8, %c0_9] : memref<128x512xf32, #tpu.memory_space<vmem>>, vector<128x512xf32>
    %c0_10 = arith.constant 0 : index
    %c0_11 = arith.constant 0 : index
    %c0_12 = arith.constant 0 : index
    %11 = vector.load %arg15[%c0_10, %c0_11, %c0_12] : memref<6x8x128xf32, #tpu.memory_space<vmem>>, vector<1x8x128xf32>
    %12 = vector.shape_cast %11 : vector<1x8x128xf32> to vector<8x128xf32>
    %c1 = arith.constant 1 : index
    %c0_13 = arith.constant 0 : index
    %c0_14 = arith.constant 0 : index
    %13 = vector.load %arg15[%c1, %c0_13, %c0_14] : memref<6x8x128xf32, #tpu.memory_space<vmem>>, vector<1x8x128xf32>
    %14 = vector.shape_cast %13 : vector<1x8x128xf32> to vector<8x128xf32>
    %c0_i32_15 = arith.constant 0 : i32
    %c8_i32 = arith.constant 8 : i32
    %15 = arith.muli %c0_i32_15, %c8_i32 : i32
    %16 = tpu.assume_multiple %15, 8 : i32
    %17 = arith.index_cast %16 : i32 to index
    %c0_16 = arith.constant 0 : index
    %18 = vector.load %arg14[%17, %c0_16] : memref<32x512xf32, #tpu.memory_space<vmem>>, vector<8x512xf32>
    %cst_17 = arith.constant dense<0.000000e+00> : vector<8x512xf32>
    %19 = tpu.matmul %12, %10, %cst_17 {dimension_numbers = #tpu.dot_dimension_numbers<[1], [0], [0], [1], [0, 0, 1, 1], [], []>} : vector<8x128xf32>, vector<128x512xf32>, vector<8x512xf32> -> vector<8x512xf32>
    %20 = arith.addf %18, %19 : vector<8x512xf32>
    %21 = vector.extract_strided_slice %20 {offsets = [0, 0], sizes = [8, 384], strides = [1, 1]} : vector<8x512xf32> to vector<8x384xf32>
    %22 = arith.negf %21 : vector<8x384xf32>
    %23 = math.exp %22 : vector<8x384xf32>
    %cst_18 = arith.constant 1.000000e+00 : f32
    %24 = vector.broadcast %cst_18 : f32 to vector<8x384xf32>
    %25 = arith.addf %24, %23 : vector<8x384xf32>
    %26 = arith.divf %24, %25 : vector<8x384xf32>
    %27 = vector.extract_strided_slice %20 {offsets = [0, 384], sizes = [8, 128], strides = [1, 1]} : vector<8x512xf32> to vector<8x128xf32>
    %28 = math.tanh %27 : vector<8x128xf32>
    %29 = vector.extract_strided_slice %26 {offsets = [0, 0], sizes = [8, 128], strides = [1, 1]} : vector<8x384xf32> to vector<8x128xf32>
    %30 = vector.extract_strided_slice %26 {offsets = [0, 128], sizes = [8, 128], strides = [1, 1]} : vector<8x384xf32> to vector<8x128xf32>
    %31 = vector.extract_strided_slice %26 {offsets = [0, 256], sizes = [8, 128], strides = [1, 1]} : vector<8x384xf32> to vector<8x128xf32>
    %32 = arith.mulf %30, %14 : vector<8x128xf32>
    %33 = arith.mulf %29, %28 : vector<8x128xf32>
    %34 = arith.addf %32, %33 : vector<8x128xf32>
    %35 = math.tanh %34 : vector<8x128xf32>
    %36 = arith.mulf %31, %35 : vector<8x128xf32>
    %37 = arith.index_cast %16 : i32 to index
    %c0_19 = arith.constant 0 : index
    %38 = vector.load %arg12[%37, %c0_19] : memref<32x128xf32, #tpu.memory_space<vmem>>, vector<8x128xf32>
    tpu.vector_store %arg12[%37, %c0_19], %36 {strides = array<i32>} : memref<32x128xf32, #tpu.memory_space<vmem>>, vector<8x128xf32>,
    %c1_i32 = arith.constant 1 : i32
    %c8_i32_20 = arith.constant 8 : i32
    %39 = arith.muli %c1_i32, %c8_i32_20 : i32
    %40 = tpu.assume_multiple %39, 8 : i32
    %41 = arith.index_cast %40 : i32 to index
    %c0_21 = arith.constant 0 : index
    %42 = vector.load %arg14[%41, %c0_21] : memref<32x512xf32, #tpu.memory_space<vmem>>, vector<8x512xf32>
    %cst_22 = arith.constant dense<0.000000e+00> : vector<8x512xf32>
    %43 = tpu.matmul %36, %10, %cst_22 {dimension_numbers = #tpu.dot_dimension_numbers<[1], [0], [0], [1], [0, 0, 1, 1], [], []>} : vector<8x128xf32>, vector<128x512xf32>, vector<8x512xf32> -> vector<8x512xf32>
    %44 = arith.addf %42, %43 : vector<8x512xf32>
    %45 = vector.extract_strided_slice %44 {offsets = [0, 0], sizes = [8, 384], strides = [1, 1]} : vector<8x512xf32> to vector<8x384xf32>
    %46 = arith.negf %45 : vector<8x384xf32>
    %47 = math.exp %46 : vector<8x384xf32>
    %cst_23 = arith.constant 1.000000e+00 : f32
    %48 = vector.broadcast %cst_23 : f32 to vector<8x384xf32>
    %49 = arith.addf %48, %47 : vector<8x384xf32>
    %50 = arith.divf %48, %49 : vector<8x384xf32>
    %51 = vector.extract_strided_slice %44 {offsets = [0, 384], sizes = [8, 128], strides = [1, 1]} : vector<8x512xf32> to vector<8x128xf32>
    %52 = math.tanh %51 : vector<8x128xf32>
    %53 = vector.extract_strided_slice %50 {offsets = [0, 0], sizes = [8, 128], strides = [1, 1]} : vector<8x384xf32> to vector<8x128xf32>
    %54 = vector.extract_strided_slice %50 {offsets = [0, 128], sizes = [8, 128], strides = [1, 1]} : vector<8x384xf32> to vector<8x128xf32>
    %55 = vector.extract_strided_slice %50 {offsets = [0, 256], sizes = [8, 128], strides = [1, 1]} : vector<8x384xf32> to vector<8x128xf32>
    %56 = arith.mulf %54, %34 : vector<8x128xf32>
    %57 = arith.mulf %53, %52 : vector<8x128xf32>
    %58 = arith.addf %56, %57 : vector<8x128xf32>
    %59 = math.tanh %58 : vector<8x128xf32>
    %60 = arith.mulf %55, %59 : vector<8x128xf32>
    %61 = arith.index_cast %40 : i32 to index
    %c0_24 = arith.constant 0 : index
    %62 = vector.load %arg12[%61, %c0_24] : memref<32x128xf32, #tpu.memory_space<vmem>>, vector<8x128xf32>
    tpu.vector_store %arg12[%61, %c0_24], %60 {strides = array<i32>} : memref<32x128xf32, #tpu.memory_space<vmem>>, vector<8x128xf32>,
    %c2_i32 = arith.constant 2 : i32
    %c8_i32_25 = arith.constant 8 : i32
    %63 = arith.muli %c2_i32, %c8_i32_25 : i32
    %64 = tpu.assume_multiple %63, 8 : i32
    %65 = arith.index_cast %64 : i32 to index
    %c0_26 = arith.constant 0 : index
    %66 = vector.load %arg14[%65, %c0_26] : memref<32x512xf32, #tpu.memory_space<vmem>>, vector<8x512xf32>
    %cst_27 = arith.constant dense<0.000000e+00> : vector<8x512xf32>
    %67 = tpu.matmul %60, %10, %cst_27 {dimension_numbers = #tpu.dot_dimension_numbers<[1], [0], [0], [1], [0, 0, 1, 1], [], []>} : vector<8x128xf32>, vector<128x512xf32>, vector<8x512xf32> -> vector<8x512xf32>
    %68 = arith.addf %66, %67 : vector<8x512xf32>
    %69 = vector.extract_strided_slice %68 {offsets = [0, 0], sizes = [8, 384], strides = [1, 1]} : vector<8x512xf32> to vector<8x384xf32>
    %70 = arith.negf %69 : vector<8x384xf32>
    %71 = math.exp %70 : vector<8x384xf32>
    %cst_28 = arith.constant 1.000000e+00 : f32
    %72 = vector.broadcast %cst_28 : f32 to vector<8x384xf32>
    %73 = arith.addf %72, %71 : vector<8x384xf32>
    %74 = arith.divf %72, %73 : vector<8x384xf32>
    %75 = vector.extract_strided_slice %68 {offsets = [0, 384], sizes = [8, 128], strides = [1, 1]} : vector<8x512xf32> to vector<8x128xf32>
    %76 = math.tanh %75 : vector<8x128xf32>
    %77 = vector.extract_strided_slice %74 {offsets = [0, 0], sizes = [8, 128], strides = [1, 1]} : vector<8x384xf32> to vector<8x128xf32>
    %78 = vector.extract_strided_slice %74 {offsets = [0, 128], sizes = [8, 128], strides = [1, 1]} : vector<8x384xf32> to vector<8x128xf32>
    %79 = vector.extract_strided_slice %74 {offsets = [0, 256], sizes = [8, 128], strides = [1, 1]} : vector<8x384xf32> to vector<8x128xf32>
    %80 = arith.mulf %78, %58 : vector<8x128xf32>
    %81 = arith.mulf %77, %76 : vector<8x128xf32>
    %82 = arith.addf %80, %81 : vector<8x128xf32>
    %83 = math.tanh %82 : vector<8x128xf32>
    %84 = arith.mulf %79, %83 : vector<8x128xf32>
    %85 = arith.index_cast %64 : i32 to index
    %c0_29 = arith.constant 0 : index
    %86 = vector.load %arg12[%85, %c0_29] : memref<32x128xf32, #tpu.memory_space<vmem>>, vector<8x128xf32>
    tpu.vector_store %arg12[%85, %c0_29], %84 {strides = array<i32>} : memref<32x128xf32, #tpu.memory_space<vmem>>, vector<8x128xf32>,
    %c3_i32 = arith.constant 3 : i32
    %c8_i32_30 = arith.constant 8 : i32
    %87 = arith.muli %c3_i32, %c8_i32_30 : i32
    %88 = tpu.assume_multiple %87, 8 : i32
    %89 = arith.index_cast %88 : i32 to index
    %c0_31 = arith.constant 0 : index
    %90 = vector.load %arg14[%89, %c0_31] : memref<32x512xf32, #tpu.memory_space<vmem>>, vector<8x512xf32>
    %cst_32 = arith.constant dense<0.000000e+00> : vector<8x512xf32>
    %91 = tpu.matmul %84, %10, %cst_32 {dimension_numbers = #tpu.dot_dimension_numbers<[1], [0], [0], [1], [0, 0, 1, 1], [], []>} : vector<8x128xf32>, vector<128x512xf32>, vector<8x512xf32> -> vector<8x512xf32>
    %92 = arith.addf %90, %91 : vector<8x512xf32>
    %93 = vector.extract_strided_slice %92 {offsets = [0, 0], sizes = [8, 384], strides = [1, 1]} : vector<8x512xf32> to vector<8x384xf32>
    %94 = arith.negf %93 : vector<8x384xf32>
    %95 = math.exp %94 : vector<8x384xf32>
    %cst_33 = arith.constant 1.000000e+00 : f32
    %96 = vector.broadcast %cst_33 : f32 to vector<8x384xf32>
    %97 = arith.addf %96, %95 : vector<8x384xf32>
    %98 = arith.divf %96, %97 : vector<8x384xf32>
    %99 = vector.extract_strided_slice %92 {offsets = [0, 384], sizes = [8, 128], strides = [1, 1]} : vector<8x512xf32> to vector<8x128xf32>
    %100 = math.tanh %99 : vector<8x128xf32>
    %101 = vector.extract_strided_slice %98 {offsets = [0, 0], sizes = [8, 128], strides = [1, 1]} : vector<8x384xf32> to vector<8x128xf32>
    %102 = vector.extract_strided_slice %98 {offsets = [0, 128], sizes = [8, 128], strides = [1, 1]} : vector<8x384xf32> to vector<8x128xf32>
    %103 = vector.extract_strided_slice %98 {offsets = [0, 256], sizes = [8, 128], strides = [1, 1]} : vector<8x384xf32> to vector<8x128xf32>
    %104 = arith.mulf %102, %82 : vector<8x128xf32>
    %105 = arith.mulf %101, %100 : vector<8x128xf32>
    %106 = arith.addf %104, %105 : vector<8x128xf32>
    %107 = math.tanh %106 : vector<8x128xf32>
    %108 = arith.mulf %103, %107 : vector<8x128xf32>
    %109 = arith.index_cast %88 : i32 to index
    %c0_34 = arith.constant 0 : index
    %110 = vector.load %arg12[%109, %c0_34] : memref<32x128xf32, #tpu.memory_space<vmem>>, vector<8x128xf32>
    tpu.vector_store %arg12[%109, %c0_34], %108 {strides = array<i32>} : memref<32x128xf32, #tpu.memory_space<vmem>>, vector<8x128xf32>,
    %c4_i32 = arith.constant 4 : i32
    %c0_35 = arith.constant 0 : index
    %c0_36 = arith.constant 0 : index
    %c0_37 = arith.constant 0 : index
    %111 = vector.load %arg15[%c0_35, %c0_36, %c0_37] : memref<6x8x128xf32, #tpu.memory_space<vmem>>, vector<1x8x128xf32>
    %112 = vector.shape_cast %111 : vector<1x8x128xf32> to vector<8x128xf32>
    %113 = vector.shape_cast %108 : vector<8x128xf32> to vector<1x8x128xf32>
    tpu.vector_store %arg15[%c0_35, %c0_36, %c0_37], %113 {strides = array<i32>} : memref<6x8x128xf32, #tpu.memory_space<vmem>>, vector<1x8x128xf32>,
    %c1_38 = arith.constant 1 : index
    %c0_39 = arith.constant 0 : index
    %c0_40 = arith.constant 0 : index
    %114 = vector.load %arg15[%c1_38, %c0_39, %c0_40] : memref<6x8x128xf32, #tpu.memory_space<vmem>>, vector<1x8x128xf32>
    %115 = vector.shape_cast %114 : vector<1x8x128xf32> to vector<8x128xf32>
    %116 = vector.shape_cast %106 : vector<8x128xf32> to vector<1x8x128xf32>
    tpu.vector_store %arg15[%c1_38, %c0_39, %c0_40], %116 {strides = array<i32>} : memref<6x8x128xf32, #tpu.memory_space<vmem>>, vector<1x8x128xf32>,
    %c0_41 = arith.constant 0 : index
    %c0_42 = arith.constant 0 : index
    %117 = vector.load %arg12[%c0_41, %c0_42] : memref<32x128xf32, #tpu.memory_space<vmem>>, vector<32x128xf32>
    %c0_43 = arith.constant 0 : index
    %c0_44 = arith.constant 0 : index
    %118 = vector.load %arg5[%c0_43, %c0_44] : memref<128x512xf32, #tpu.memory_space<vmem>>, vector<128x512xf32>
    %cst_45 = arith.constant dense<0.000000e+00> : vector<32x512xf32>
    %119 = tpu.matmul %117, %118, %cst_45 {dimension_numbers = #tpu.dot_dimension_numbers<[1], [0], [0], [1], [0, 0, 1, 1], [], []>} : vector<32x128xf32>, vector<128x512xf32>, vector<32x512xf32> -> vector<32x512xf32>
    %c0_46 = arith.constant 0 : index
    %c0_47 = arith.constant 0 : index
    %120 = vector.load %arg7[%c0_46, %c0_47] : memref<1x512xf32, #tpu.memory_space<vmem>>, vector<1x512xf32>
    %121 = vector.broadcast %120 : vector<1x512xf32> to vector<32x512xf32>
    %122 = arith.addf %119, %121 : vector<32x512xf32>
    %c0_48 = arith.constant 0 : index
    %c0_49 = arith.constant 0 : index
    %123 = vector.load %arg14[%c0_48, %c0_49] : memref<32x512xf32, #tpu.memory_space<vmem>>, vector<32x512xf32>
    tpu.vector_store %arg14[%c0_48, %c0_49], %122 {strides = array<i32>} : memref<32x512xf32, #tpu.memory_space<vmem>>, vector<32x512xf32>,
    %c0_50 = arith.constant 0 : index
    %c0_51 = arith.constant 0 : index
    %124 = vector.load %arg6[%c0_50, %c0_51] : memref<128x512xf32, #tpu.memory_space<vmem>>, vector<128x512xf32>
    %c2 = arith.constant 2 : index
    %c0_52 = arith.constant 0 : index
    %c0_53 = arith.constant 0 : index
    %125 = vector.load %arg15[%c2, %c0_52, %c0_53] : memref<6x8x128xf32, #tpu.memory_space<vmem>>, vector<1x8x128xf32>
    %126 = vector.shape_cast %125 : vector<1x8x128xf32> to vector<8x128xf32>
    %c3 = arith.constant 3 : index
    %c0_54 = arith.constant 0 : index
    %c0_55 = arith.constant 0 : index
    %127 = vector.load %arg15[%c3, %c0_54, %c0_55] : memref<6x8x128xf32, #tpu.memory_space<vmem>>, vector<1x8x128xf32>
    %128 = vector.shape_cast %127 : vector<1x8x128xf32> to vector<8x128xf32>
    %c0_i32_56 = arith.constant 0 : i32
    %c8_i32_57 = arith.constant 8 : i32
    %129 = arith.muli %c0_i32_56, %c8_i32_57 : i32
    %130 = tpu.assume_multiple %129, 8 : i32
    %131 = arith.index_cast %130 : i32 to index
    %c0_58 = arith.constant 0 : index
    %132 = vector.load %arg14[%131, %c0_58] : memref<32x512xf32, #tpu.memory_space<vmem>>, vector<8x512xf32>
    %cst_59 = arith.constant dense<0.000000e+00> : vector<8x512xf32>
    %133 = tpu.matmul %126, %124, %cst_59 {dimension_numbers = #tpu.dot_dimension_numbers<[1], [0], [0], [1], [0, 0, 1, 1], [], []>} : vector<8x128xf32>, vector<128x512xf32>, vector<8x512xf32> -> vector<8x512xf32>
    %134 = arith.addf %132, %133 : vector<8x512xf32>
    %135 = vector.extract_strided_slice %134 {offsets = [0, 0], sizes = [8, 384], strides = [1, 1]} : vector<8x512xf32> to vector<8x384xf32>
    %136 = arith.negf %135 : vector<8x384xf32>
    %137 = math.exp %136 : vector<8x384xf32>
    %cst_60 = arith.constant 1.000000e+00 : f32
    %138 = vector.broadcast %cst_60 : f32 to vector<8x384xf32>
    %139 = arith.addf %138, %137 : vector<8x384xf32>
    %140 = arith.divf %138, %139 : vector<8x384xf32>
    %141 = vector.extract_strided_slice %134 {offsets = [0, 384], sizes = [8, 128], strides = [1, 1]} : vector<8x512xf32> to vector<8x128xf32>
    %142 = math.tanh %141 : vector<8x128xf32>
    %143 = vector.extract_strided_slice %140 {offsets = [0, 0], sizes = [8, 128], strides = [1, 1]} : vector<8x384xf32> to vector<8x128xf32>
    %144 = vector.extract_strided_slice %140 {offsets = [0, 128], sizes = [8, 128], strides = [1, 1]} : vector<8x384xf32> to vector<8x128xf32>
    %145 = vector.extract_strided_slice %140 {offsets = [0, 256], sizes = [8, 128], strides = [1, 1]} : vector<8x384xf32> to vector<8x128xf32>
    %146 = arith.mulf %144, %128 : vector<8x128xf32>
    %147 = arith.mulf %143, %142 : vector<8x128xf32>
    %148 = arith.addf %146, %147 : vector<8x128xf32>
    %149 = math.tanh %148 : vector<8x128xf32>
    %150 = arith.mulf %145, %149 : vector<8x128xf32>
    %151 = arith.index_cast %130 : i32 to index
    %c0_61 = arith.constant 0 : index
    %152 = vector.load %arg13[%151, %c0_61] : memref<32x128xf32, #tpu.memory_space<vmem>>, vector<8x128xf32>
    tpu.vector_store %arg13[%151, %c0_61], %150 {strides = array<i32>} : memref<32x128xf32, #tpu.memory_space<vmem>>, vector<8x128xf32>,
    %c1_i32_62 = arith.constant 1 : i32
    %c8_i32_63 = arith.constant 8 : i32
    %153 = arith.muli %c1_i32_62, %c8_i32_63 : i32
    %154 = tpu.assume_multiple %153, 8 : i32
    %155 = arith.index_cast %154 : i32 to index
    %c0_64 = arith.constant 0 : index
    %156 = vector.load %arg14[%155, %c0_64] : memref<32x512xf32, #tpu.memory_space<vmem>>, vector<8x512xf32>
    %cst_65 = arith.constant dense<0.000000e+00> : vector<8x512xf32>
    %157 = tpu.matmul %150, %124, %cst_65 {dimension_numbers = #tpu.dot_dimension_numbers<[1], [0], [0], [1], [0, 0, 1, 1], [], []>} : vector<8x128xf32>, vector<128x512xf32>, vector<8x512xf32> -> vector<8x512xf32>
    %158 = arith.addf %156, %157 : vector<8x512xf32>
    %159 = vector.extract_strided_slice %158 {offsets = [0, 0], sizes = [8, 384], strides = [1, 1]} : vector<8x512xf32> to vector<8x384xf32>
    %160 = arith.negf %159 : vector<8x384xf32>
    %161 = math.exp %160 : vector<8x384xf32>
    %cst_66 = arith.constant 1.000000e+00 : f32
    %162 = vector.broadcast %cst_66 : f32 to vector<8x384xf32>
    %163 = arith.addf %162, %161 : vector<8x384xf32>
    %164 = arith.divf %162, %163 : vector<8x384xf32>
    %165 = vector.extract_strided_slice %158 {offsets = [0, 384], sizes = [8, 128], strides = [1, 1]} : vector<8x512xf32> to vector<8x128xf32>
    %166 = math.tanh %165 : vector<8x128xf32>
    %167 = vector.extract_strided_slice %164 {offsets = [0, 0], sizes = [8, 128], strides = [1, 1]} : vector<8x384xf32> to vector<8x128xf32>
    %168 = vector.extract_strided_slice %164 {offsets = [0, 128], sizes = [8, 128], strides = [1, 1]} : vector<8x384xf32> to vector<8x128xf32>
    %169 = vector.extract_strided_slice %164 {offsets = [0, 256], sizes = [8, 128], strides = [1, 1]} : vector<8x384xf32> to vector<8x128xf32>
    %170 = arith.mulf %168, %148 : vector<8x128xf32>
    %171 = arith.mulf %167, %166 : vector<8x128xf32>
    %172 = arith.addf %170, %171 : vector<8x128xf32>
    %173 = math.tanh %172 : vector<8x128xf32>
    %174 = arith.mulf %169, %173 : vector<8x128xf32>
    %175 = arith.index_cast %154 : i32 to index
    %c0_67 = arith.constant 0 : index
    %176 = vector.load %arg13[%175, %c0_67] : memref<32x128xf32, #tpu.memory_space<vmem>>, vector<8x128xf32>
    tpu.vector_store %arg13[%175, %c0_67], %174 {strides = array<i32>} : memref<32x128xf32, #tpu.memory_space<vmem>>, vector<8x128xf32>,
    %c2_i32_68 = arith.constant 2 : i32
    %c8_i32_69 = arith.constant 8 : i32
    %177 = arith.muli %c2_i32_68, %c8_i32_69 : i32
    %178 = tpu.assume_multiple %177, 8 : i32
    %179 = arith.index_cast %178 : i32 to index
    %c0_70 = arith.constant 0 : index
    %180 = vector.load %arg14[%179, %c0_70] : memref<32x512xf32, #tpu.memory_space<vmem>>, vector<8x512xf32>
    %cst_71 = arith.constant dense<0.000000e+00> : vector<8x512xf32>
    %181 = tpu.matmul %174, %124, %cst_71 {dimension_numbers = #tpu.dot_dimension_numbers<[1], [0], [0], [1], [0, 0, 1, 1], [], []>} : vector<8x128xf32>, vector<128x512xf32>, vector<8x512xf32> -> vector<8x512xf32>
    %182 = arith.addf %180, %181 : vector<8x512xf32>
    %183 = vector.extract_strided_slice %182 {offsets = [0, 0], sizes = [8, 384], strides = [1, 1]} : vector<8x512xf32> to vector<8x384xf32>
    %184 = arith.negf %183 : vector<8x384xf32>
    %185 = math.exp %184 : vector<8x384xf32>
    %cst_72 = arith.constant 1.000000e+00 : f32
    %186 = vector.broadcast %cst_72 : f32 to vector<8x384xf32>
    %187 = arith.addf %186, %185 : vector<8x384xf32>
    %188 = arith.divf %186, %187 : vector<8x384xf32>
    %189 = vector.extract_strided_slice %182 {offsets = [0, 384], sizes = [8, 128], strides = [1, 1]} : vector<8x512xf32> to vector<8x128xf32>
    %190 = math.tanh %189 : vector<8x128xf32>
    %191 = vector.extract_strided_slice %188 {offsets = [0, 0], sizes = [8, 128], strides = [1, 1]} : vector<8x384xf32> to vector<8x128xf32>
    %192 = vector.extract_strided_slice %188 {offsets = [0, 128], sizes = [8, 128], strides = [1, 1]} : vector<8x384xf32> to vector<8x128xf32>
    %193 = vector.extract_strided_slice %188 {offsets = [0, 256], sizes = [8, 128], strides = [1, 1]} : vector<8x384xf32> to vector<8x128xf32>
    %194 = arith.mulf %192, %172 : vector<8x128xf32>
    %195 = arith.mulf %191, %190 : vector<8x128xf32>
    %196 = arith.addf %194, %195 : vector<8x128xf32>
    %197 = math.tanh %196 : vector<8x128xf32>
    %198 = arith.mulf %193, %197 : vector<8x128xf32>
    %199 = arith.index_cast %178 : i32 to index
    %c0_73 = arith.constant 0 : index
    %200 = vector.load %arg13[%199, %c0_73] : memref<32x128xf32, #tpu.memory_space<vmem>>, vector<8x128xf32>
    tpu.vector_store %arg13[%199, %c0_73], %198 {strides = array<i32>} : memref<32x128xf32, #tpu.memory_space<vmem>>, vector<8x128xf32>,
    %c3_i32_74 = arith.constant 3 : i32
    %c8_i32_75 = arith.constant 8 : i32
    %201 = arith.muli %c3_i32_74, %c8_i32_75 : i32
    %202 = tpu.assume_multiple %201, 8 : i32
    %203 = arith.index_cast %202 : i32 to index
    %c0_76 = arith.constant 0 : index
    %204 = vector.load %arg14[%203, %c0_76] : memref<32x512xf32, #tpu.memory_space<vmem>>, vector<8x512xf32>
    %cst_77 = arith.constant dense<0.000000e+00> : vector<8x512xf32>
    %205 = tpu.matmul %198, %124, %cst_77 {dimension_numbers = #tpu.dot_dimension_numbers<[1], [0], [0], [1], [0, 0, 1, 1], [], []>} : vector<8x128xf32>, vector<128x512xf32>, vector<8x512xf32> -> vector<8x512xf32>
    %206 = arith.addf %204, %205 : vector<8x512xf32>
    %207 = vector.extract_strided_slice %206 {offsets = [0, 0], sizes = [8, 384], strides = [1, 1]} : vector<8x512xf32> to vector<8x384xf32>
    %208 = arith.negf %207 : vector<8x384xf32>
    %209 = math.exp %208 : vector<8x384xf32>
    %cst_78 = arith.constant 1.000000e+00 : f32
    %210 = vector.broadcast %cst_78 : f32 to vector<8x384xf32>
    %211 = arith.addf %210, %209 : vector<8x384xf32>
    %212 = arith.divf %210, %211 : vector<8x384xf32>
    %213 = vector.extract_strided_slice %206 {offsets = [0, 384], sizes = [8, 128], strides = [1, 1]} : vector<8x512xf32> to vector<8x128xf32>
    %214 = math.tanh %213 : vector<8x128xf32>
    %215 = vector.extract_strided_slice %212 {offsets = [0, 0], sizes = [8, 128], strides = [1, 1]} : vector<8x384xf32> to vector<8x128xf32>
    %216 = vector.extract_strided_slice %212 {offsets = [0, 128], sizes = [8, 128], strides = [1, 1]} : vector<8x384xf32> to vector<8x128xf32>
    %217 = vector.extract_strided_slice %212 {offsets = [0, 256], sizes = [8, 128], strides = [1, 1]} : vector<8x384xf32> to vector<8x128xf32>
    %218 = arith.mulf %216, %196 : vector<8x128xf32>
    %219 = arith.mulf %215, %214 : vector<8x128xf32>
    %220 = arith.addf %218, %219 : vector<8x128xf32>
    %221 = math.tanh %220 : vector<8x128xf32>
    %222 = arith.mulf %217, %221 : vector<8x128xf32>
    %223 = arith.index_cast %202 : i32 to index
    %c0_79 = arith.constant 0 : index
    %224 = vector.load %arg13[%223, %c0_79] : memref<32x128xf32, #tpu.memory_space<vmem>>, vector<8x128xf32>
    tpu.vector_store %arg13[%223, %c0_79], %222 {strides = array<i32>} : memref<32x128xf32, #tpu.memory_space<vmem>>, vector<8x128xf32>,
    %c4_i32_80 = arith.constant 4 : i32
    %c2_81 = arith.constant 2 : index
    %c0_82 = arith.constant 0 : index
    %c0_83 = arith.constant 0 : index
    %225 = vector.load %arg15[%c2_81, %c0_82, %c0_83] : memref<6x8x128xf32, #tpu.memory_space<vmem>>, vector<1x8x128xf32>
    %226 = vector.shape_cast %225 : vector<1x8x128xf32> to vector<8x128xf32>
    %227 = vector.shape_cast %222 : vector<8x128xf32> to vector<1x8x128xf32>
    tpu.vector_store %arg15[%c2_81, %c0_82, %c0_83], %227 {strides = array<i32>} : memref<6x8x128xf32, #tpu.memory_space<vmem>>, vector<1x8x128xf32>,
    %c3_84 = arith.constant 3 : index
    %c0_85 = arith.constant 0 : index
    %c0_86 = arith.constant 0 : index
    %228 = vector.load %arg15[%c3_84, %c0_85, %c0_86] : memref<6x8x128xf32, #tpu.memory_space<vmem>>, vector<1x8x128xf32>
    %229 = vector.shape_cast %228 : vector<1x8x128xf32> to vector<8x128xf32>
    %230 = vector.shape_cast %220 : vector<8x128xf32> to vector<1x8x128xf32>
    tpu.vector_store %arg15[%c3_84, %c0_85, %c0_86], %230 {strides = array<i32>} : memref<6x8x128xf32, #tpu.memory_space<vmem>>, vector<1x8x128xf32>,
    %c0_87 = arith.constant 0 : index
    %c0_88 = arith.constant 0 : index
    %231 = vector.load %arg13[%c0_87, %c0_88] : memref<32x128xf32, #tpu.memory_space<vmem>>, vector<32x128xf32>
    %c0_89 = arith.constant 0 : index
    %c0_90 = arith.constant 0 : index
    %232 = vector.load %arg8[%c0_89, %c0_90] : memref<128x512xf32, #tpu.memory_space<vmem>>, vector<128x512xf32>
    %cst_91 = arith.constant dense<0.000000e+00> : vector<32x512xf32>
    %233 = tpu.matmul %231, %232, %cst_91 {dimension_numbers = #tpu.dot_dimension_numbers<[1], [0], [0], [1], [0, 0, 1, 1], [], []>} : vector<32x128xf32>, vector<128x512xf32>, vector<32x512xf32> -> vector<32x512xf32>
    %c0_92 = arith.constant 0 : index
    %c0_93 = arith.constant 0 : index
    %234 = vector.load %arg10[%c0_92, %c0_93] : memref<1x512xf32, #tpu.memory_space<vmem>>, vector<1x512xf32>
    %235 = vector.broadcast %234 : vector<1x512xf32> to vector<32x512xf32>
    %236 = arith.addf %233, %235 : vector<32x512xf32>
    %c0_94 = arith.constant 0 : index
    %c0_95 = arith.constant 0 : index
    %237 = vector.load %arg14[%c0_94, %c0_95] : memref<32x512xf32, #tpu.memory_space<vmem>>, vector<32x512xf32>
    tpu.vector_store %arg14[%c0_94, %c0_95], %236 {strides = array<i32>} : memref<32x512xf32, #tpu.memory_space<vmem>>, vector<32x512xf32>,
    %c0_96 = arith.constant 0 : index
    %c0_97 = arith.constant 0 : index
    %238 = vector.load %arg9[%c0_96, %c0_97] : memref<128x512xf32, #tpu.memory_space<vmem>>, vector<128x512xf32>
    %c4 = arith.constant 4 : index
    %c0_98 = arith.constant 0 : index
    %c0_99 = arith.constant 0 : index
    %239 = vector.load %arg15[%c4, %c0_98, %c0_99] : memref<6x8x128xf32, #tpu.memory_space<vmem>>, vector<1x8x128xf32>
    %240 = vector.shape_cast %239 : vector<1x8x128xf32> to vector<8x128xf32>
    %c5 = arith.constant 5 : index
    %c0_100 = arith.constant 0 : index
    %c0_101 = arith.constant 0 : index
    %241 = vector.load %arg15[%c5, %c0_100, %c0_101] : memref<6x8x128xf32, #tpu.memory_space<vmem>>, vector<1x8x128xf32>
    %242 = vector.shape_cast %241 : vector<1x8x128xf32> to vector<8x128xf32>
    %c0_i32_102 = arith.constant 0 : i32
    %c8_i32_103 = arith.constant 8 : i32
    %243 = arith.muli %c0_i32_102, %c8_i32_103 : i32
    %244 = tpu.assume_multiple %243, 8 : i32
    %245 = arith.index_cast %244 : i32 to index
    %c0_104 = arith.constant 0 : index
    %246 = vector.load %arg14[%245, %c0_104] : memref<32x512xf32, #tpu.memory_space<vmem>>, vector<8x512xf32>
    %cst_105 = arith.constant dense<0.000000e+00> : vector<8x512xf32>
    %247 = tpu.matmul %240, %238, %cst_105 {dimension_numbers = #tpu.dot_dimension_numbers<[1], [0], [0], [1], [0, 0, 1, 1], [], []>} : vector<8x128xf32>, vector<128x512xf32>, vector<8x512xf32> -> vector<8x512xf32>
    %248 = arith.addf %246, %247 : vector<8x512xf32>
    %249 = vector.extract_strided_slice %248 {offsets = [0, 0], sizes = [8, 384], strides = [1, 1]} : vector<8x512xf32> to vector<8x384xf32>
    %250 = arith.negf %249 : vector<8x384xf32>
    %251 = math.exp %250 : vector<8x384xf32>
    %cst_106 = arith.constant 1.000000e+00 : f32
    %252 = vector.broadcast %cst_106 : f32 to vector<8x384xf32>
    %253 = arith.addf %252, %251 : vector<8x384xf32>
    %254 = arith.divf %252, %253 : vector<8x384xf32>
    %255 = vector.extract_strided_slice %248 {offsets = [0, 384], sizes = [8, 128], strides = [1, 1]} : vector<8x512xf32> to vector<8x128xf32>
    %256 = math.tanh %255 : vector<8x128xf32>
    %257 = vector.extract_strided_slice %254 {offsets = [0, 0], sizes = [8, 128], strides = [1, 1]} : vector<8x384xf32> to vector<8x128xf32>
    %258 = vector.extract_strided_slice %254 {offsets = [0, 128], sizes = [8, 128], strides = [1, 1]} : vector<8x384xf32> to vector<8x128xf32>
    %259 = vector.extract_strided_slice %254 {offsets = [0, 256], sizes = [8, 128], strides = [1, 1]} : vector<8x384xf32> to vector<8x128xf32>
    %260 = arith.mulf %258, %242 : vector<8x128xf32>
    %261 = arith.mulf %257, %256 : vector<8x128xf32>
    %262 = arith.addf %260, %261 : vector<8x128xf32>
    %263 = math.tanh %262 : vector<8x128xf32>
    %264 = arith.mulf %259, %263 : vector<8x128xf32>
    %265 = arith.index_cast %244 : i32 to index
    %c0_107 = arith.constant 0 : index
    %266 = vector.load %arg11[%265, %c0_107] : memref<32x128xf32, #tpu.memory_space<vmem>>, vector<8x128xf32>
    tpu.vector_store %arg11[%265, %c0_107], %264 {strides = array<i32>} : memref<32x128xf32, #tpu.memory_space<vmem>>, vector<8x128xf32>,
    %c1_i32_108 = arith.constant 1 : i32
    %c8_i32_109 = arith.constant 8 : i32
    %267 = arith.muli %c1_i32_108, %c8_i32_109 : i32
    %268 = tpu.assume_multiple %267, 8 : i32
    %269 = arith.index_cast %268 : i32 to index
    %c0_110 = arith.constant 0 : index
    %270 = vector.load %arg14[%269, %c0_110] : memref<32x512xf32, #tpu.memory_space<vmem>>, vector<8x512xf32>
    %cst_111 = arith.constant dense<0.000000e+00> : vector<8x512xf32>
    %271 = tpu.matmul %264, %238, %cst_111 {dimension_numbers = #tpu.dot_dimension_numbers<[1], [0], [0], [1], [0, 0, 1, 1], [], []>} : vector<8x128xf32>, vector<128x512xf32>, vector<8x512xf32> -> vector<8x512xf32>
    %272 = arith.addf %270, %271 : vector<8x512xf32>
    %273 = vector.extract_strided_slice %272 {offsets = [0, 0], sizes = [8, 384], strides = [1, 1]} : vector<8x512xf32> to vector<8x384xf32>
    %274 = arith.negf %273 : vector<8x384xf32>
    %275 = math.exp %274 : vector<8x384xf32>
    %cst_112 = arith.constant 1.000000e+00 : f32
    %276 = vector.broadcast %cst_112 : f32 to vector<8x384xf32>
    %277 = arith.addf %276, %275 : vector<8x384xf32>
    %278 = arith.divf %276, %277 : vector<8x384xf32>
    %279 = vector.extract_strided_slice %272 {offsets = [0, 384], sizes = [8, 128], strides = [1, 1]} : vector<8x512xf32> to vector<8x128xf32>
    %280 = math.tanh %279 : vector<8x128xf32>
    %281 = vector.extract_strided_slice %278 {offsets = [0, 0], sizes = [8, 128], strides = [1, 1]} : vector<8x384xf32> to vector<8x128xf32>
    %282 = vector.extract_strided_slice %278 {offsets = [0, 128], sizes = [8, 128], strides = [1, 1]} : vector<8x384xf32> to vector<8x128xf32>
    %283 = vector.extract_strided_slice %278 {offsets = [0, 256], sizes = [8, 128], strides = [1, 1]} : vector<8x384xf32> to vector<8x128xf32>
    %284 = arith.mulf %282, %262 : vector<8x128xf32>
    %285 = arith.mulf %281, %280 : vector<8x128xf32>
    %286 = arith.addf %284, %285 : vector<8x128xf32>
    %287 = math.tanh %286 : vector<8x128xf32>
    %288 = arith.mulf %283, %287 : vector<8x128xf32>
    %289 = arith.index_cast %268 : i32 to index
    %c0_113 = arith.constant 0 : index
    %290 = vector.load %arg11[%289, %c0_113] : memref<32x128xf32, #tpu.memory_space<vmem>>, vector<8x128xf32>
    tpu.vector_store %arg11[%289, %c0_113], %288 {strides = array<i32>} : memref<32x128xf32, #tpu.memory_space<vmem>>, vector<8x128xf32>,
    %c2_i32_114 = arith.constant 2 : i32
    %c8_i32_115 = arith.constant 8 : i32
    %291 = arith.muli %c2_i32_114, %c8_i32_115 : i32
    %292 = tpu.assume_multiple %291, 8 : i32
    %293 = arith.index_cast %292 : i32 to index
    %c0_116 = arith.constant 0 : index
    %294 = vector.load %arg14[%293, %c0_116] : memref<32x512xf32, #tpu.memory_space<vmem>>, vector<8x512xf32>
    %cst_117 = arith.constant dense<0.000000e+00> : vector<8x512xf32>
    %295 = tpu.matmul %288, %238, %cst_117 {dimension_numbers = #tpu.dot_dimension_numbers<[1], [0], [0], [1], [0, 0, 1, 1], [], []>} : vector<8x128xf32>, vector<128x512xf32>, vector<8x512xf32> -> vector<8x512xf32>
    %296 = arith.addf %294, %295 : vector<8x512xf32>
    %297 = vector.extract_strided_slice %296 {offsets = [0, 0], sizes = [8, 384], strides = [1, 1]} : vector<8x512xf32> to vector<8x384xf32>
    %298 = arith.negf %297 : vector<8x384xf32>
    %299 = math.exp %298 : vector<8x384xf32>
    %cst_118 = arith.constant 1.000000e+00 : f32
    %300 = vector.broadcast %cst_118 : f32 to vector<8x384xf32>
    %301 = arith.addf %300, %299 : vector<8x384xf32>
    %302 = arith.divf %300, %301 : vector<8x384xf32>
    %303 = vector.extract_strided_slice %296 {offsets = [0, 384], sizes = [8, 128], strides = [1, 1]} : vector<8x512xf32> to vector<8x128xf32>
    %304 = math.tanh %303 : vector<8x128xf32>
    %305 = vector.extract_strided_slice %302 {offsets = [0, 0], sizes = [8, 128], strides = [1, 1]} : vector<8x384xf32> to vector<8x128xf32>
    %306 = vector.extract_strided_slice %302 {offsets = [0, 128], sizes = [8, 128], strides = [1, 1]} : vector<8x384xf32> to vector<8x128xf32>
    %307 = vector.extract_strided_slice %302 {offsets = [0, 256], sizes = [8, 128], strides = [1, 1]} : vector<8x384xf32> to vector<8x128xf32>
    %308 = arith.mulf %306, %286 : vector<8x128xf32>
    %309 = arith.mulf %305, %304 : vector<8x128xf32>
    %310 = arith.addf %308, %309 : vector<8x128xf32>
    %311 = math.tanh %310 : vector<8x128xf32>
    %312 = arith.mulf %307, %311 : vector<8x128xf32>
    %313 = arith.index_cast %292 : i32 to index
    %c0_119 = arith.constant 0 : index
    %314 = vector.load %arg11[%313, %c0_119] : memref<32x128xf32, #tpu.memory_space<vmem>>, vector<8x128xf32>
    tpu.vector_store %arg11[%313, %c0_119], %312 {strides = array<i32>} : memref<32x128xf32, #tpu.memory_space<vmem>>, vector<8x128xf32>,
    %c3_i32_120 = arith.constant 3 : i32
    %c8_i32_121 = arith.constant 8 : i32
    %315 = arith.muli %c3_i32_120, %c8_i32_121 : i32
    %316 = tpu.assume_multiple %315, 8 : i32
    %317 = arith.index_cast %316 : i32 to index
    %c0_122 = arith.constant 0 : index
    %318 = vector.load %arg14[%317, %c0_122] : memref<32x512xf32, #tpu.memory_space<vmem>>, vector<8x512xf32>
    %cst_123 = arith.constant dense<0.000000e+00> : vector<8x512xf32>
    %319 = tpu.matmul %312, %238, %cst_123 {dimension_numbers = #tpu.dot_dimension_numbers<[1], [0], [0], [1], [0, 0, 1, 1], [], []>} : vector<8x128xf32>, vector<128x512xf32>, vector<8x512xf32> -> vector<8x512xf32>
    %320 = arith.addf %318, %319 : vector<8x512xf32>
    %321 = vector.extract_strided_slice %320 {offsets = [0, 0], sizes = [8, 384], strides = [1, 1]} : vector<8x512xf32> to vector<8x384xf32>
    %322 = arith.negf %321 : vector<8x384xf32>
    %323 = math.exp %322 : vector<8x384xf32>
    %cst_124 = arith.constant 1.000000e+00 : f32
    %324 = vector.broadcast %cst_124 : f32 to vector<8x384xf32>
    %325 = arith.addf %324, %323 : vector<8x384xf32>
    %326 = arith.divf %324, %325 : vector<8x384xf32>
    %327 = vector.extract_strided_slice %320 {offsets = [0, 384], sizes = [8, 128], strides = [1, 1]} : vector<8x512xf32> to vector<8x128xf32>
    %328 = math.tanh %327 : vector<8x128xf32>
    %329 = vector.extract_strided_slice %326 {offsets = [0, 0], sizes = [8, 128], strides = [1, 1]} : vector<8x384xf32> to vector<8x128xf32>
    %330 = vector.extract_strided_slice %326 {offsets = [0, 128], sizes = [8, 128], strides = [1, 1]} : vector<8x384xf32> to vector<8x128xf32>
    %331 = vector.extract_strided_slice %326 {offsets = [0, 256], sizes = [8, 128], strides = [1, 1]} : vector<8x384xf32> to vector<8x128xf32>
    %332 = arith.mulf %330, %310 : vector<8x128xf32>
    %333 = arith.mulf %329, %328 : vector<8x128xf32>
    %334 = arith.addf %332, %333 : vector<8x128xf32>
    %335 = math.tanh %334 : vector<8x128xf32>
    %336 = arith.mulf %331, %335 : vector<8x128xf32>
    %337 = arith.index_cast %316 : i32 to index
    %c0_125 = arith.constant 0 : index
    %338 = vector.load %arg11[%337, %c0_125] : memref<32x128xf32, #tpu.memory_space<vmem>>, vector<8x128xf32>
    tpu.vector_store %arg11[%337, %c0_125], %336 {strides = array<i32>} : memref<32x128xf32, #tpu.memory_space<vmem>>, vector<8x128xf32>,
    %c4_i32_126 = arith.constant 4 : i32
    %c4_127 = arith.constant 4 : index
    %c0_128 = arith.constant 0 : index
    %c0_129 = arith.constant 0 : index
    %339 = vector.load %arg15[%c4_127, %c0_128, %c0_129] : memref<6x8x128xf32, #tpu.memory_space<vmem>>, vector<1x8x128xf32>
    %340 = vector.shape_cast %339 : vector<1x8x128xf32> to vector<8x128xf32>
    %341 = vector.shape_cast %336 : vector<8x128xf32> to vector<1x8x128xf32>
    tpu.vector_store %arg15[%c4_127, %c0_128, %c0_129], %341 {strides = array<i32>} : memref<6x8x128xf32, #tpu.memory_space<vmem>>, vector<1x8x128xf32>,
    %c5_130 = arith.constant 5 : index
    %c0_131 = arith.constant 0 : index
    %c0_132 = arith.constant 0 : index
    %342 = vector.load %arg15[%c5_130, %c0_131, %c0_132] : memref<6x8x128xf32, #tpu.memory_space<vmem>>, vector<1x8x128xf32>
    %343 = vector.shape_cast %342 : vector<1x8x128xf32> to vector<8x128xf32>
    %344 = vector.shape_cast %334 : vector<8x128xf32> to vector<1x8x128xf32>
    tpu.vector_store %arg15[%c5_130, %c0_131, %c0_132], %344 {strides = array<i32>} : memref<6x8x128xf32, #tpu.memory_space<vmem>>, vector<1x8x128xf32>,
    return
  }
  func.func @transform_0(%arg0: i32) -> (i32, i32) {
    %c0_i32 = arith.constant 0 : i32
    %c0_i32_0 = arith.constant 0 : i32
    return %arg0, %c0_i32 : i32, i32
  }
  func.func @transform_1(%arg0: i32) -> (i32, i32) {
    %c0_i32 = arith.constant 0 : i32
    %c0_i32_0 = arith.constant 0 : i32
    %c0_i32_1 = arith.constant 0 : i32
    return %c0_i32, %c0_i32_0 : i32, i32
  }
  func.func @transform_2(%arg0: i32) -> (i32, i32) {
    %c0_i32 = arith.constant 0 : i32
    %c0_i32_0 = arith.constant 0 : i32
    %c0_i32_1 = arith.constant 0 : i32
    return %c0_i32, %c0_i32_0 : i32, i32
  }
  func.func @transform_3(%arg0: i32) -> (i32, i32) {
    %c0_i32 = arith.constant 0 : i32
    %c0_i32_0 = arith.constant 0 : i32
    %c0_i32_1 = arith.constant 0 : i32
    return %c0_i32, %c0_i32_0 : i32, i32
  }
  func.func @transform_4(%arg0: i32) -> (i32, i32) {
    %c0_i32 = arith.constant 0 : i32
    %c0_i32_0 = arith.constant 0 : i32
    %c0_i32_1 = arith.constant 0 : i32
    return %c0_i32, %c0_i32_0 : i32, i32
  }
  func.func @transform_5(%arg0: i32) -> (i32, i32) {
    %c0_i32 = arith.constant 0 : i32
    %c0_i32_0 = arith.constant 0 : i32
    %c0_i32_1 = arith.constant 0 : i32
    return %c0_i32, %c0_i32_0 : i32, i32
  }
  func.func @transform_6(%arg0: i32) -> (i32, i32) {
    %c0_i32 = arith.constant 0 : i32
    %c0_i32_0 = arith.constant 0 : i32
    %c0_i32_1 = arith.constant 0 : i32
    return %c0_i32, %c0_i32_0 : i32, i32
  }
  func.func @transform_7(%arg0: i32) -> (i32, i32) {
    %c0_i32 = arith.constant 0 : i32
    %c0_i32_0 = arith.constant 0 : i32
    %c0_i32_1 = arith.constant 0 : i32
    return %c0_i32, %c0_i32_0 : i32, i32
  }
  func.func @transform_8(%arg0: i32) -> (i32, i32) {
    %c0_i32 = arith.constant 0 : i32
    %c0_i32_0 = arith.constant 0 : i32
    %c0_i32_1 = arith.constant 0 : i32
    return %c0_i32, %c0_i32_0 : i32, i32
  }
  func.func @transform_9(%arg0: i32) -> (i32, i32) {
    %c0_i32 = arith.constant 0 : i32
    %c0_i32_0 = arith.constant 0 : i32
    %c0_i32_1 = arith.constant 0 : i32
    return %c0_i32, %c0_i32_0 : i32, i32
  }
  func.func @transform_10(%arg0: i32) -> (i32, i32) {
    %c0_i32 = arith.constant 0 : i32
    %c0_i32_0 = arith.constant 0 : i32
    return %arg0, %c0_i32 : i32, i32
  }
}

</mosaic_0001>

<bundles_post_ra>
// kernel: awd_lstm_forward.3
= control target key start
LH: loop header
LB: loop body
LE: loop exit
PB: predicated region body
PF: predicated region fallthrough
CT: control target
= control target key end

     0   :  { %s420_s0 = inlined_call_operand.vmem [shape: f32[64,128], index: 0, kind: input, shape index: {}]   ;;  %s421_s1 = inlined_call_operand.vmem [shape: f32[128,256], index: 1, kind: input, shape index: {}]   ;;  %s422_s2 = inlined_call_operand.vmem [shape: f32[1,256], index: 2, kind: input, shape index: {}]   ;;  %s423_s3 = inlined_call_operand.hbm [shape: f32[64,256], index: 3, kind: output, shape index: {}]  }
   0x1   :  { %v54_v0 = vld [vmem:[%s421_s1 + $0xf8] sm:$0xff]  ;;  %v53_v1 = vld [vmem:[%s421_s1 + $0xf0] sm:$0xff]  ;;  %v52_v2 = vld [vmem:[%s421_s1 + $0xe8] sm:$0xff] }
   0x2   :  { %67 = vmatprep.subr.mxu0 %v54_v0  ;;  %212 = vmatprep.subr.mxu1 %v54_v0  ;;  %v51_v3 = vld [vmem:[%s421_s1 + $0xe0] sm:$0xff]  ;;  %v50_v4 = vld [vmem:[%s421_s1 + $0xd8] sm:$0xff]  ;;  %v49_v5 = vld [vmem:[%s421_s1 + $0xd0] sm:$0xff] }
   0x3   :  { %68 = vmatpush1.msra.mxu0 %v53_v1  ;;  %228 = vmatpush1.msra.mxu1 %v53_v1  ;;  %v48_v6 = vld [vmem:[%s421_s1 + $0xc8] sm:$0xff]  ;;  %v47_v7 = vld [vmem:[%s421_s1 + $0xc0] sm:$0xff]  ;;  %v46_v8 = vld [vmem:[%s421_s1 + $0xb8] sm:$0xff] }
   0x4   :  { %69 = vmatprep.subr.mxu0 %v52_v2  ;;  %213 = vmatprep.subr.mxu1 %v52_v2  ;;  %v45_v9 = vld [vmem:[%s421_s1 + $0xb0] sm:$0xff]  ;;  %v44_v10 = vld [vmem:[%s421_s1 + $0xa8] sm:$0xff]  ;;  %v43_v11 = vld [vmem:[%s421_s1 + $0xa0] sm:$0xff] }
   0x5   :  { %70 = vmatpush1.msra.mxu0 %v51_v3  ;;  %229 = vmatpush1.msra.mxu1 %v51_v3  ;;  %v42_v12 = vld [vmem:[%s421_s1 + $0x98] sm:$0xff]  ;;  %v41_v13 = vld [vmem:[%s421_s1 + $0x90] sm:$0xff]  ;;  %v40_v14 = vld [vmem:[%s421_s1 + $0x88] sm:$0xff] }
   0x6   :  { %71 = vmatprep.subr.mxu0 %v50_v4  ;;  %214 = vmatprep.subr.mxu1 %v50_v4  ;;  %v39_v15 = vld [vmem:[%s421_s1 + $0x80] sm:$0xff] }
   0x7   :  { %72 = vmatpush1.msra.mxu0 %v49_v5  ;;  %230 = vmatpush1.msra.mxu1 %v49_v5 }
   0x8   :  { %73 = vmatprep.subr.mxu0 %v48_v6  ;;  %215 = vmatprep.subr.mxu1 %v48_v6 }
   0x9   :  { %74 = vmatpush1.msra.mxu0 %v47_v7  ;;  %231 = vmatpush1.msra.mxu1 %v47_v7 }
   0xa   :  { %75 = vmatprep.subr.mxu0 %v46_v8  ;;  %216 = vmatprep.subr.mxu1 %v46_v8 }
   0xb   :  { %76 = vmatpush1.msra.mxu0 %v45_v9  ;;  %232 = vmatpush1.msra.mxu1 %v45_v9 }
   0xc   :  { %77 = vmatprep.subr.mxu0 %v44_v10  ;;  %217 = vmatprep.subr.mxu1 %v44_v10 }
   0xd   :  { %78 = vmatpush1.msra.mxu0 %v43_v11  ;;  %233 = vmatpush1.msra.mxu1 %v43_v11 }
   0xe   :  { %79 = vmatprep.subr.mxu0 %v42_v12  ;;  %218 = vmatprep.subr.mxu1 %v42_v12 }
   0xf   :  { %8 = vsyncpa [#allocation3], 0  ;;  %80 = vmatpush1.msra.mxu0 %v41_v13  ;;  %234 = vmatpush1.msra.mxu1 %v41_v13  ;;  %v38_v16 = vld [vmem:[%s421_s1 + $0x78] sm:$0xff]  ;;  %v37_v17 = vld [vmem:[%s421_s1 + $0x70] sm:$0xff]  ;;  %v270_v34 = vmov 0.0   ;;  %v57_v41 = vlaneseq }
  0x10   :  { %81 = vmatprep.subr.mxu0 %v40_v14  ;;  %219 = vmatprep.subr.mxu1 %v40_v14  ;;  %v36_v18 = vld [vmem:[%s421_s1 + $0x68] sm:$0xff]  ;;  %v35_v19 = vld [vmem:[%s421_s1 + $0x60] sm:$0xff]  ;;  %v34_v20 = vld [vmem:[%s421_s1 + $0x58] sm:$0xff] }
  0x11   :  { %82 = vmatpush1.msra.mxu0 %v39_v15  ;;  %235 = vmatpush1.msra.mxu1 %v39_v15  ;;  %v33_v21 = vld [vmem:[%s421_s1 + $0x50] sm:$0xff]  ;;  %v32_v22 = vld [vmem:[%s421_s1 + $0x48] sm:$0xff]  ;;  %v31_v23 = vld [vmem:[%s421_s1 + $0x40] sm:$0xff]  ;;  %v58_v42 = vshrl.u32 %v57_v41, 7 }
  0x12   :  { %83 = vmatprep.subr.mxu0 %v38_v16  ;;  %220 = vmatprep.subr.mxu1 %v38_v16  ;;  %v30_v24 = vld [vmem:[%s421_s1 + $0x38] sm:$0xff]  ;;  %v29_v25 = vld [vmem:[%s421_s1 + $0x30] sm:$0xff]  ;;  %v28_v26 = vld [vmem:[%s421_s1 + $0x28] sm:$0xff] }
  0x13   :  { %84 = vmatpush1.msra.mxu0 %v37_v17  ;;  %236 = vmatpush1.msra.mxu1 %v37_v17  ;;  %v27_v27 = vld [vmem:[%s421_s1 + $0x20] sm:$0xff]  ;;  %v26_v28 = vld [vmem:[%s421_s1 + $0x18] sm:$0xff]  ;;  %v25_v29 = vld [vmem:[%s421_s1 + $0x10] sm:$0xff]  ;;  %v59_v43 = vsub.s32 0, %v58_v42  ;;  %v63_v45 = vsub.s32 1, %v58_v42 }
  0x14   :  { %85 = vmatprep.subr.mxu0 %v36_v18  ;;  %221 = vmatprep.subr.mxu1 %v36_v18  ;;  %v24_v30 = vld [vmem:[%s421_s1 + $0x8] sm:$0xff]  ;;  %v23_v31 = vld [vmem:[%s421_s1] sm:$0xff]  ;;  %v17_v37 = vld [vmem:[%s420_s0 + $0x10] sm:$0xff] }
  0x15   :  { %86 = vmatpush1.msra.mxu0 %v35_v19  ;;  %237 = vmatpush1.msra.mxu1 %v35_v19  ;;  %v15_v32 = vld [vmem:[%s420_s0] sm:$0xff]  ;;  %v16_v35 = vld [vmem:[%s420_s0 + $0x8] sm:$0xff]  ;;  %v21_v38 = vld [vmem:[%s420_s0 + $0x30] sm:$0xff] }
  0x16   :  { %87 = vmatprep.subr.mxu0 %v34_v20  ;;  %222 = vmatprep.subr.mxu1 %v34_v20  ;;  %v19_v33 = vld [vmem:[%s420_s0 + $0x20] sm:$0xff]  ;;  %v20_v36 = vld [vmem:[%s420_s0 + $0x28] sm:$0xff]  ;;  %v18_v39 = vld [vmem:[%s420_s0 + $0x18] sm:$0xff] }
  0x17   :  { %88 = vmatpush1.msra.mxu0 %v33_v21  ;;  %238 = vmatpush1.msra.mxu1 %v33_v21  ;;  %v22_v40 = vld [vmem:[%s420_s0 + $0x38] sm:$0xff]  ;;  %v55_v44 = vld [vmem:[%s422_s2] sm:$0x3]  ;;  %s271_s0 = smov [#allocation2]  }
  0x18   :  { %89 = vmatprep.subr.mxu0 %v32_v22  ;;  %223 = vmatprep.subr.mxu1 %v32_v22  ;;  %v60_v46 = vrot.slane %v55_v44, %v59_v43  ;;  %v64_v47 = vrot.slane %v55_v44, %v63_v45  ;;  %s201_s2 = sshll.u32 %s271_s0, 4  ;;  %s202_s2 = int_to_ptr.vmem [resolvable:$true] %s201_s2 }
  0x19   :  { %90 = vmatpush1.msra.mxu0 %v31_v23  ;;  %239 = vmatpush1.msra.mxu1 %v31_v23  ;;  %s248_s12 = scalar_lea.vmem %s202_s2, 2048  ;;  %p253_p1 = scmp.lt.s32.totalorder %s202_s2, %s202_s2 }
  0x1a   :  { %91 = vmatprep.subr.mxu0 %v30_v24  ;;  %224 = vmatprep.subr.mxu1 %v30_v24  ;;  %p249_p0 = scmp.ne.s32.totalorder %s202_s2, %s248_s12  ;;  %p254_p2 = scmp.lt.s32.totalorder %s248_s12, %s248_s12 }
  0x1b   :  { %92 = vmatpush1.msra.mxu0 %v29_v25  ;;  %240 = vmatpush1.msra.mxu1 %v29_v25 }
  0x1c   :  { %93 = vmatprep.subr.mxu0 %v28_v26  ;;  %225 = vmatprep.subr.mxu1 %v28_v26  ;;  %p255_p3 = por %p254_p2, %p253_p1 }
  0x1d   :  { %94 = vmatpush1.msra.mxu0 %v27_v27  ;;  %241 = vmatpush1.msra.mxu1 %v27_v27 }
  0x1e   :  { %95 = vmatprep.subr.mxu0 %v26_v28  ;;  %226 = vmatprep.subr.mxu1 %v26_v28  ;;  %p256_p4 = pnand %p255_p3, %p249_p0 }
  0x1f   :  { %96 = vmatpush1.msra.mxu0 %v25_v29  ;;  %242 = vmatpush1.msra.mxu1 %v25_v29 }
  0x20   :  { %97 = vmatprep.subr.mxu0 %v24_v30  ;;  %227 = vmatprep.subr.mxu1 %v24_v30 }
  0x21   :  { %98 = vmatpush1.msra.mxu0 %v23_v31  ;;  %243 = vmatpush1.msra.mxu1 %v23_v31 }
  0x22   :  { %131 = vmatprep.mubr.f32.mxu0 %v270_v34  ;;  %155 = vmatprep.mubr.f32.mxu1 %v270_v34 }
  0x23   :  { %132 = vmatmul.mubr.f32.vlgmr.msra.gmra.mxu0 %v15_v32  ;;  %156 = vmatmul.mubr.f32.vlgmr.msra.gmra.mxu1 %v19_v33 }
  0x24   :  { %137 = vmatprep.mubr.f32.mxu0 %v270_v34  ;;  %161 = vmatprep.mubr.f32.mxu1 %v270_v34 }
  0x27   :  { %138 = vmatmul.mubr.f32.gmra.mxu0 %v16_v35  ;;  %162 = vmatmul.mubr.f32.gmra.mxu1 %v20_v36 }
  0x28   :  { %143 = vmatprep.mubr.f32.mxu0 %v270_v34  ;;  %167 = vmatprep.mubr.f32.mxu1 %v270_v34 }
  0x2b   :  { %144 = vmatmul.mubr.f32.gmra.mxu0 %v17_v37  ;;  %168 = vmatmul.mubr.f32.gmra.mxu1 %v21_v38 }
  0x2c   :  { %149 = vmatprep.mubr.f32.mxu0 %v270_v34  ;;  %173 = vmatprep.mubr.f32.mxu1 %v270_v34 }
  0x2f   :  { %150 = vmatmul.mubr.f32.gmra.mxu0 %v18_v39  ;;  %174 = vmatmul.mubr.f32.gmra.mxu1 %v22_v40 }
  0xe3   :  { %v133_v48 = vpop.f32.mrf.mxu0  ;;  %v157_v49 = vpop.f32.mrf.mxu1 }
  0xe4   :  { %v134_v50 = vadd.f32 %v133_v48, %v60_v46  ;;  %v158_v51 = vadd.f32 %v157_v49, %v60_v46 }
  0xe5   :  { %v135_v52 = vpop.f32.mrf.mxu0  ;;  %v159_v53 = vpop.f32.mrf.mxu1 }
  0xe6   :  { %180 = vst [vmem:[#allocation2] sm:$0xff] %v134_v50  ;;  %188 = vst [vmem:[#allocation2 + $0x40] sm:$0xff] %v158_v51  ;;  %v136_v54 = vadd.f32 %v135_v52, %v64_v47  ;;  %v160_v55 = vadd.f32 %v159_v53, %v64_v47 }
  0xe7   :  { %v139_v56 = vpop.f32.mrf.mxu0  ;;  %v163_v57 = vpop.f32.mrf.mxu1 }
  0xe8   :  { %181 = vst [vmem:[#allocation2 + $0x8] sm:$0xff] %v136_v54  ;;  %189 = vst [vmem:[#allocation2 + $0x48] sm:$0xff] %v160_v55  ;;  %v140_v58 = vadd.f32 %v139_v56, %v60_v46  ;;  %v164_v59 = vadd.f32 %v163_v57, %v60_v46 }
  0xe9   :  { %v141_v60 = vpop.f32.mrf.mxu0  ;;  %v165_v61 = vpop.f32.mrf.mxu1 }
  0xea   :  { %182 = vst [vmem:[#allocation2 + $0x10] sm:$0xff] %v140_v58  ;;  %190 = vst [vmem:[#allocation2 + $0x50] sm:$0xff] %v164_v59  ;;  %v142_v62 = vadd.f32 %v141_v60, %v64_v47  ;;  %v166_v63 = vadd.f32 %v165_v61, %v64_v47 }
  0xeb   :  { %v145_v0 = vpop.f32.mrf.mxu0  ;;  %v169_v1 = vpop.f32.mrf.mxu1 }
  0xec   :  { %183 = vst [vmem:[#allocation2 + $0x18] sm:$0xff] %v142_v62  ;;  %191 = vst [vmem:[#allocation2 + $0x58] sm:$0xff] %v166_v63  ;;  %v146_v2 = vadd.f32 %v145_v0, %v60_v46  ;;  %v170_v3 = vadd.f32 %v169_v1, %v60_v46 }
  0xed   :  { %v147_v4 = vpop.f32.mrf.mxu0  ;;  %v171_v5 = vpop.f32.mrf.mxu1 }
  0xee   :  { %184 = vst [vmem:[#allocation2 + $0x20] sm:$0xff] %v146_v2  ;;  %192 = vst [vmem:[#allocation2 + $0x60] sm:$0xff] %v170_v3  ;;  %v148_v6 = vadd.f32 %v147_v4, %v64_v47  ;;  %v172_v7 = vadd.f32 %v171_v5, %v64_v47 }
  0xef   :  { %v151_v8 = vpop.f32.mrf.mxu0  ;;  %v175_v9 = vpop.f32.mrf.mxu1 }
  0xf0   :  { %185 = vst [vmem:[#allocation2 + $0x28] sm:$0xff] %v148_v6  ;;  %193 = vst [vmem:[#allocation2 + $0x68] sm:$0xff] %v172_v7  ;;  %v152_v10 = vadd.f32 %v151_v8, %v60_v46  ;;  %v176_v11 = vadd.f32 %v175_v9, %v60_v46 }
  0xf1   :  { %v153_v12 = vpop.f32.mrf.mxu0  ;;  %v177_v13 = vpop.f32.mrf.mxu1 }
  0xf2   :  { %186 = vst [vmem:[#allocation2 + $0x30] sm:$0xff] %v152_v10  ;;  %194 = vst [vmem:[#allocation2 + $0x70] sm:$0xff] %v176_v11  ;;  %v154_v14 = vadd.f32 %v153_v12, %v64_v47  ;;  %v178_v15 = vadd.f32 %v177_v13, %v64_v47 }
  0xf4   :  { %187 = vst [vmem:[#allocation2 + $0x38] sm:$0xff] %v154_v14  ;;  %195 = vst [vmem:[#allocation2 + $0x78] sm:$0xff] %v178_v15 }
  0xf5   :  { %259 = shalt.err (!%p256_p4)
}
  0xf6   :  { %s272_s13 = smov 256   ;;  %s273_s14 = smov 16  }
  0xf7   :  { %207 = dma.vmem_to_hbm [thread:$0]  %s202_s2, 2048, %s423_s3, [#allocation3], %s272_s13, %s272_s13, %s273_s14  }
  0xf8   :  { %268 = dma.done.wait [#allocation3], 2048  }
  0xf9   :  { %269 = vsyncadd [#allocation3], 4294965248 }
  0xfa   :  { %211 = vsyncpa [#allocation3], 1 }

// kernel: awd_lstm_forward.2
= control target key start
LH: loop header
LB: loop body
LE: loop exit
PB: predicated region body
PF: predicated region fallthrough
CT: control target
= control target key end

     0   :  { %s3932_s13 = smov 0   ;;  %s6566_s0 = inlined_call_operand.vmem [shape: f32[64,128], index: 0, kind: input, shape index: {}]   ;;  %s6567_s1 = inlined_call_operand.vmem [shape: f32[128,512], index: 1, kind: input, shape index: {}]   ;;  %s6568_s2 = inlined_call_operand.vmem [shape: f32[128,512], index: 2, kind: input, shape index: {}]   ;;  %s6569_s3 = inlined_call_operand.vmem [shape: f32[1,512], index: 3, kind: input, shape index: {}]   ;;  %s6570_s4 = inlined_call_operand.vmem [shape: f32[128,512], index: 4, kind: input, shape index: {}]   ;;  %s6571_s5 = inlined_call_operand.vmem [shape: f32[128,512], index: 5, kind: input, shape index: {}]   ;;  %s6572_s6 = inlined_call_operand.vmem [shape: f32[1,512], index: 6, kind: input, shape index: {}]   ;;  %s6573_s7 = inlined_call_operand.vmem [shape: f32[128,512], index: 7, kind: input, shape index: {}]   ;;  %s6574_s8 = inlined_call_operand.vmem [shape: f32[128,512], index: 8, kind: input, shape index: {}]   ;;  %s6575_s9 = inlined_call_operand.vmem [shape: f32[1,512], index: 9, kind: input, shape index: {}]   ;;  %s6576_s10 = inlined_call_operand.vmem [shape: f32[64,128], index: 10, kind: output, shape index: {}]  }
   0x1 LB: > { %s3614_s14 = sadd.s32 4294967295, %s3873_s13   ;;  %p3618_p0 = scmp.ge.s32.totalorder %s3873_s13, 1  ;;  %s3873_s13 = sphi %s3932_s13, %s20_s13  }
   0x2   : > { %p313_p1 = scmp.lt.s32.totalorder %s3873_s13, 3 }
   0x4   : > { %p314_p2 = pnand %p3618_p0, %p313_p1 }
   0x6   : > { %317 = sbr.rel (%p314_p2) target bundleno = 3093 (0xc15), region = 60 }
   0xb   : > { %s3619_s15 = sshll.u32 %s3614_s14, 2  ;;  %p3623_p4 = scmp.ne.s32.totalorder %s3614_s14, 0 }
   0xc   : > { %p352_p3 = scmp.lt.s32.totalorder %s3619_s15, 7 }
   0xd   : > { %366 = sbr.rel (%p3623_p4) target bundleno = 22 (0x16), region = 64 }
   0xe   : > { %s7097_s15 = smov (!%p352_p3, %s3619_s15), 7 }
   0xf   : > { %s3620_s16 = sshll.u32 %s7097_s15, 3 }
  0x10   : > { %s3943_s19 = scalar_lea.vmem %s6566_s0, %s3620_s16  ;;  %s3948_s22 = scalar_lea.vmem %s6576_s10, %s3620_s16 }
  0x12   : > { %v3875_v0 = vmov 0.0  }
  0x13   : > { %367 = vst [vmem:[#allocation5 + $0x28] sm:$0xff] %v3875_v0  ;;  %368 = vst [vmem:[#allocation5 + $0x10] sm:$0xff] %v3875_v0 }
  0x14   : > { %369 = vst [vmem:[#allocation5 + $0x8] sm:$0xff] %v3875_v0  ;;  %370 = vst [vmem:[#allocation5] sm:$0xff] %v3875_v0 }
  0x15   : > { %371 = vst [vmem:[#allocation5 + $0x18] sm:$0xff] %v3875_v0  ;;  %372 = vst [vmem:[#allocation5 + $0x20] sm:$0xff] %v3875_v0 }
  0x16 PF: > { %v438_v1 = vld [vmem:[%s6567_s1 + $0x1e8] sm:$0xff]  ;;  %v440_v2 = vld [vmem:[%s6567_s1 + $0x1f8] sm:$0xff]  ;;  %v437_v3 = vld [vmem:[%s6567_s1 + $0x1e0] sm:$0xff] }
  0x17   : > { %463 = vmatprep.subr.mxu0 %v438_v1  ;;  %552 = vmatprep.subr.mxu1 %v440_v2  ;;  %v439_v4 = vld [vmem:[%s6567_s1 + $0x1f0] sm:$0xff]  ;;  %v434_v5 = vld [vmem:[%s6567_s1 + $0x1c8] sm:$0xff]  ;;  %v436_v6 = vld [vmem:[%s6567_s1 + $0x1d8] sm:$0xff] }
  0x18   : > { %464 = vmatpush1.msra.mxu0 %v437_v3  ;;  %553 = vmatpush1.msra.mxu1 %v439_v4  ;;  %v433_v7 = vld [vmem:[%s6567_s1 + $0x1c0] sm:$0xff]  ;;  %v435_v8 = vld [vmem:[%s6567_s1 + $0x1d0] sm:$0xff]  ;;  %v430_v9 = vld [vmem:[%s6567_s1 + $0x1a8] sm:$0xff]  ;;  %v6577_v3 = vmov 0.0  }
  0x19   : > { %465 = vmatprep.subr.mxu0 %v434_v5  ;;  %554 = vmatprep.subr.mxu1 %v436_v6  ;;  %v432_v10 = vld [vmem:[%s6567_s1 + $0x1b8] sm:$0xff]  ;;  %v429_v11 = vld [vmem:[%s6567_s1 + $0x1a0] sm:$0xff]  ;;  %v431_v12 = vld [vmem:[%s6567_s1 + $0x1b0] sm:$0xff] }
  0x1a   : > { %466 = vmatpush1.msra.mxu0 %v433_v7  ;;  %555 = vmatpush1.msra.mxu1 %v435_v8  ;;  %v426_v13 = vld [vmem:[%s6567_s1 + $0x188] sm:$0xff]  ;;  %v428_v14 = vld [vmem:[%s6567_s1 + $0x198] sm:$0xff]  ;;  %v425_v15 = vld [vmem:[%s6567_s1 + $0x180] sm:$0xff] }
  0x1b   : > { %467 = vmatprep.subr.mxu0 %v430_v9  ;;  %556 = vmatprep.subr.mxu1 %v432_v10  ;;  %v427_v16 = vld [vmem:[%s6567_s1 + $0x190] sm:$0xff]  ;;  %v422_v17 = vld [vmem:[%s6567_s1 + $0x168] sm:$0xff]  ;;  %v424_v18 = vld [vmem:[%s6567_s1 + $0x178] sm:$0xff] }
  0x1c   : > { %468 = vmatpush1.msra.mxu0 %v429_v11  ;;  %557 = vmatpush1.msra.mxu1 %v431_v12  ;;  %v421_v19 = vld [vmem:[%s6567_s1 + $0x160] sm:$0xff]  ;;  %v423_v20 = vld [vmem:[%s6567_s1 + $0x170] sm:$0xff]  ;;  %v418_v21 = vld [vmem:[%s6567_s1 + $0x148] sm:$0xff] }
  0x1d   : > { %469 = vmatprep.subr.mxu0 %v426_v13  ;;  %558 = vmatprep.subr.mxu1 %v428_v14  ;;  %v420_v22 = vld [vmem:[%s6567_s1 + $0x158] sm:$0xff]  ;;  %v417_v23 = vld [vmem:[%s6567_s1 + $0x140] sm:$0xff]  ;;  %v419_v24 = vld [vmem:[%s6567_s1 + $0x150] sm:$0xff] }
  0x1e   : > { %470 = vmatpush1.msra.mxu0 %v425_v15  ;;  %559 = vmatpush1.msra.mxu1 %v427_v16  ;;  %v414_v25 = vld [vmem:[%s6567_s1 + $0x128] sm:$0xff]  ;;  %v416_v26 = vld [vmem:[%s6567_s1 + $0x138] sm:$0xff]  ;;  %v413_v27 = vld [vmem:[%s6567_s1 + $0x120] sm:$0xff] }
  0x1f   : > { %471 = vmatprep.subr.mxu0 %v422_v17  ;;  %560 = vmatprep.subr.mxu1 %v424_v18  ;;  %v415_v28 = vld [vmem:[%s6567_s1 + $0x130] sm:$0xff]  ;;  %v410_v29 = vld [vmem:[%s6567_s1 + $0x108] sm:$0xff]  ;;  %v412_v30 = vld [vmem:[%s6567_s1 + $0x118] sm:$0xff] }
  0x20   : > { %472 = vmatpush1.msra.mxu0 %v421_v19  ;;  %561 = vmatpush1.msra.mxu1 %v423_v20  ;;  %v409_v31 = vld [vmem:[%s6567_s1 + $0x100] sm:$0xff]  ;;  %v411_v32 = vld [vmem:[%s6567_s1 + $0x110] sm:$0xff]  ;;  %v406_v33 = vld [vmem:[%s6567_s1 + $0xe8] sm:$0xff] }
  0x21   : > { %473 = vmatprep.subr.mxu0 %v418_v21  ;;  %562 = vmatprep.subr.mxu1 %v420_v22  ;;  %v408_v34 = vld [vmem:[%s6567_s1 + $0xf8] sm:$0xff]  ;;  %v405_v35 = vld [vmem:[%s6567_s1 + $0xe0] sm:$0xff]  ;;  %v407_v36 = vld [vmem:[%s6567_s1 + $0xf0] sm:$0xff] }
  0x22   : > { %474 = vmatpush1.msra.mxu0 %v417_v23  ;;  %563 = vmatpush1.msra.mxu1 %v419_v24  ;;  %v402_v37 = vld [vmem:[%s6567_s1 + $0xc8] sm:$0xff]  ;;  %v404_v38 = vld [vmem:[%s6567_s1 + $0xd8] sm:$0xff]  ;;  %v401_v39 = vld [vmem:[%s6567_s1 + $0xc0] sm:$0xff] }
  0x23   : > { %475 = vmatprep.subr.mxu0 %v414_v25  ;;  %564 = vmatprep.subr.mxu1 %v416_v26  ;;  %v403_v40 = vld [vmem:[%s6567_s1 + $0xd0] sm:$0xff]  ;;  %v398_v41 = vld [vmem:[%s6567_s1 + $0xa8] sm:$0xff]  ;;  %v400_v42 = vld [vmem:[%s6567_s1 + $0xb8] sm:$0xff] }
  0x24   : > { %476 = vmatpush1.msra.mxu0 %v413_v27  ;;  %565 = vmatpush1.msra.mxu1 %v415_v28  ;;  %v397_v43 = vld [vmem:[%s6567_s1 + $0xa0] sm:$0xff]  ;;  %v399_v44 = vld [vmem:[%s6567_s1 + $0xb0] sm:$0xff]  ;;  %v394_v45 = vld [vmem:[%s6567_s1 + $0x88] sm:$0xff] }
  0x25   : > { %477 = vmatprep.subr.mxu0 %v410_v29  ;;  %566 = vmatprep.subr.mxu1 %v412_v30  ;;  %v396_v46 = vld [vmem:[%s6567_s1 + $0x98] sm:$0xff]  ;;  %v393_v47 = vld [vmem:[%s6567_s1 + $0x80] sm:$0xff]  ;;  %v395_v48 = vld [vmem:[%s6567_s1 + $0x90] sm:$0xff] }
  0x26   : > { %478 = vmatpush1.msra.mxu0 %v409_v31  ;;  %567 = vmatpush1.msra.mxu1 %v411_v32  ;;  %v390_v49 = vld [vmem:[%s6567_s1 + $0x68] sm:$0xff]  ;;  %v392_v50 = vld [vmem:[%s6567_s1 + $0x78] sm:$0xff]  ;;  %v389_v51 = vld [vmem:[%s6567_s1 + $0x60] sm:$0xff] }
  0x27   : > { %479 = vmatprep.subr.mxu0 %v406_v33  ;;  %568 = vmatprep.subr.mxu1 %v408_v34  ;;  %v391_v52 = vld [vmem:[%s6567_s1 + $0x70] sm:$0xff]  ;;  %v386_v53 = vld [vmem:[%s6567_s1 + $0x48] sm:$0xff]  ;;  %v388_v54 = vld [vmem:[%s6567_s1 + $0x58] sm:$0xff] }
  0x28   : > { %480 = vmatpush1.msra.mxu0 %v405_v35  ;;  %569 = vmatpush1.msra.mxu1 %v407_v36  ;;  %v385_v55 = vld [vmem:[%s6567_s1 + $0x40] sm:$0xff]  ;;  %v387_v56 = vld [vmem:[%s6567_s1 + $0x50] sm:$0xff]  ;;  %v382_v57 = vld [vmem:[%s6567_s1 + $0x28] sm:$0xff] }
  0x29   : > { %481 = vmatprep.subr.mxu0 %v402_v37  ;;  %570 = vmatprep.subr.mxu1 %v404_v38  ;;  %v384_v58 = vld [vmem:[%s6567_s1 + $0x38] sm:$0xff]  ;;  %v381_v59 = vld [vmem:[%s6567_s1 + $0x20] sm:$0xff]  ;;  %v383_v60 = vld [vmem:[%s6567_s1 + $0x30] sm:$0xff] }
  0x2a   : > { %482 = vmatpush1.msra.mxu0 %v401_v39  ;;  %571 = vmatpush1.msra.mxu1 %v403_v40  ;;  %v378_v61 = vld [vmem:[%s6567_s1 + $0x8] sm:$0xff]  ;;  %v380_v62 = vld [vmem:[%s6567_s1 + $0x18] sm:$0xff]  ;;  %v377_v63 = vld [vmem:[%s6567_s1] sm:$0xff] }
  0x2b   : > { %483 = vmatprep.subr.mxu0 %v398_v41  ;;  %572 = vmatprep.subr.mxu1 %v400_v42  ;;  %v379_v0 = vld [vmem:[%s6567_s1 + $0x10] sm:$0xff]  ;;  %v373_v1 = vld [vmem:[%s3943_s19] sm:$0xff]  ;;  %v4146_v2 = vld [vmem:[%s6568_s2 + $0x1e8] sm:$0xff] }
  0x2c   : > { %484 = vmatpush1.msra.mxu0 %v397_v43  ;;  %573 = vmatpush1.msra.mxu1 %v399_v44  ;;  %6747 = vst [vmem:[#allocation6_spill] sm:$0xff] %v4146_v2  ;;  %v4152_v4 = vld [vmem:[%s6568_s2 + $0x1f8] sm:$0xff]  ;;  %v4157_v5 = vld [vmem:[%s6568_s2 + $0x1e0] sm:$0xff]  ;;  %v4162_v6 = vld [vmem:[%s6568_s2 + $0x1f0] sm:$0xff] }
  0x2d   : > { %485 = vmatprep.subr.mxu0 %v394_v45  ;;  %574 = vmatprep.subr.mxu1 %v396_v46  ;;  %6748 = vst [vmem:[#allocation7_spill] sm:$0xff] %v4152_v4  ;;  %v4169_v7 = vld [vmem:[%s6568_s2 + $0x1c8] sm:$0xff]  ;;  %v4174_v8 = vld [vmem:[%s6568_s2 + $0x1d8] sm:$0xff]  ;;  %v4180_v9 = vld [vmem:[%s6568_s2 + $0x1c0] sm:$0xff] }
  0x2e   : > { %486 = vmatpush1.msra.mxu0 %v393_v47  ;;  %575 = vmatpush1.msra.mxu1 %v395_v48  ;;  %v4185_v10 = vld [vmem:[%s6568_s2 + $0x1d0] sm:$0xff]  ;;  %v4192_v11 = vld [vmem:[%s6568_s2 + $0x1a8] sm:$0xff]  ;;  %v4197_v12 = vld [vmem:[%s6568_s2 + $0x1b8] sm:$0xff] }
  0x2f   : > { %487 = vmatprep.subr.mxu0 %v390_v49  ;;  %576 = vmatprep.subr.mxu1 %v392_v50  ;;  %v4204_v13 = vld [vmem:[%s6568_s2 + $0x1a0] sm:$0xff]  ;;  %v4209_v14 = vld [vmem:[%s6568_s2 + $0x1b0] sm:$0xff]  ;;  %v4216_v15 = vld [vmem:[%s6568_s2 + $0x188] sm:$0xff] }
  0x30   : > { %488 = vmatpush1.msra.mxu0 %v389_v51  ;;  %577 = vmatpush1.msra.mxu1 %v391_v52  ;;  %v4221_v16 = vld [vmem:[%s6568_s2 + $0x198] sm:$0xff]  ;;  %v4228_v17 = vld [vmem:[%s6568_s2 + $0x180] sm:$0xff]  ;;  %v4233_v18 = vld [vmem:[%s6568_s2 + $0x190] sm:$0xff] }
  0x31   : > { %489 = vmatprep.subr.mxu0 %v386_v53  ;;  %578 = vmatprep.subr.mxu1 %v388_v54  ;;  %v4240_v19 = vld [vmem:[%s6568_s2 + $0x168] sm:$0xff]  ;;  %v4245_v20 = vld [vmem:[%s6568_s2 + $0x178] sm:$0xff]  ;;  %v4252_v21 = vld [vmem:[%s6568_s2 + $0x160] sm:$0xff] }
  0x32   : > { %490 = vmatpush1.msra.mxu0 %v385_v55  ;;  %579 = vmatpush1.msra.mxu1 %v387_v56  ;;  %v4257_v22 = vld [vmem:[%s6568_s2 + $0x170] sm:$0xff]  ;;  %v4264_v23 = vld [vmem:[%s6568_s2 + $0x148] sm:$0xff]  ;;  %v4269_v24 = vld [vmem:[%s6568_s2 + $0x158] sm:$0xff] }
  0x33   : > { %491 = vmatprep.subr.mxu0 %v382_v57  ;;  %580 = vmatprep.subr.mxu1 %v384_v58  ;;  %v4276_v25 = vld [vmem:[%s6568_s2 + $0x140] sm:$0xff]  ;;  %v4281_v26 = vld [vmem:[%s6568_s2 + $0x150] sm:$0xff]  ;;  %v4288_v27 = vld [vmem:[%s6568_s2 + $0x128] sm:$0xff] }
  0x34   : > { %492 = vmatpush1.msra.mxu0 %v381_v59  ;;  %581 = vmatpush1.msra.mxu1 %v383_v60  ;;  %v4293_v28 = vld [vmem:[%s6568_s2 + $0x138] sm:$0xff]  ;;  %v4300_v29 = vld [vmem:[%s6568_s2 + $0x120] sm:$0xff]  ;;  %v4305_v30 = vld [vmem:[%s6568_s2 + $0x130] sm:$0xff] }
  0x35   : > { %493 = vmatprep.subr.mxu0 %v378_v61  ;;  %582 = vmatprep.subr.mxu1 %v380_v62  ;;  %v4312_v31 = vld [vmem:[%s6568_s2 + $0x108] sm:$0xff]  ;;  %v4317_v32 = vld [vmem:[%s6568_s2 + $0x118] sm:$0xff]  ;;  %v4324_v33 = vld [vmem:[%s6568_s2 + $0x100] sm:$0xff] }
  0x36   : > { %494 = vmatpush1.msra.mxu0 %v377_v63  ;;  %527 = vmatprep.mubr.f32.mxu0 %v6577_v3  ;;  %v4329_v34 = vld [vmem:[%s6568_s2 + $0x110] sm:$0xff]  ;;  %v4336_v35 = vld [vmem:[%s6568_s2 + $0xe8] sm:$0xff]  ;;  %v4341_v36 = vld [vmem:[%s6568_s2 + $0xf8] sm:$0xff] }
  0x37   : > { %583 = vmatpush1.msra.mxu1 %v379_v0  ;;  %528 = vmatmul.mubr.f32.vlgmr.msra.gmra.mxu0 %v373_v1  ;;  %v4348_v37 = vld [vmem:[%s6568_s2 + $0xe0] sm:$0xff]  ;;  %v4355_v38 = vld [vmem:[%s6568_s2 + $0xf0] sm:$0xff]  ;;  %v374_v39 = vld [vmem:[%s3943_s19 + $0x8] sm:$0xff] }
  0x38   : > { %616 = vmatprep.mubr.f32.mxu1 %v6577_v3  ;;  %731 = vmatprep.subr.mxu0 %v4146_v2  ;;  %v4363_v40 = vld [vmem:[%s6568_s2 + $0xc8] sm:$0xff]  ;;  %v4368_v41 = vld [vmem:[%s6568_s2 + $0xd8] sm:$0xff]  ;;  %v4375_v42 = vld [vmem:[%s6568_s2 + $0xc0] sm:$0xff] }
  0x39   : > { %802 = vmatprep.subr.mxu1 %v4152_v4  ;;  %617 = vmatmul.mubr.f32.vlgmr.msra.gmra.mxu1 %v373_v1  ;;  %v4381_v43 = vld [vmem:[%s6568_s2 + $0xd0] sm:$0xff]  ;;  %v4386_v44 = vld [vmem:[%s6568_s2 + $0xa8] sm:$0xff]  ;;  %v4393_v45 = vld [vmem:[%s6568_s2 + $0xb8] sm:$0xff] }
  0x3a   : > { %732 = vmatpush1.msra.mxu0 %v4157_v5  ;;  %803 = vmatpush1.msra.mxu1 %v4162_v6  ;;  %6749 = vst [vmem:[#allocation8_spill] sm:$0xff] %v4386_v44  ;;  %6750 = vst [vmem:[#allocation9_spill] sm:$0xff] %v4393_v45  ;;  %v4400_v46 = vld [vmem:[%s6568_s2 + $0xa0] sm:$0xff]  ;;  %v4407_v47 = vld [vmem:[%s6568_s2 + $0xb0] sm:$0xff] }
  0x3b   : > { %733 = vmatprep.subr.mxu0 %v4169_v7  ;;  %804 = vmatprep.subr.mxu1 %v4174_v8  ;;  %6751 = vst [vmem:[#allocation10_spill] sm:$0xff] %v4400_v46  ;;  %6752 = vst [vmem:[#allocation11_spill] sm:$0xff] %v4407_v47  ;;  %v375_v48 = vld [vmem:[%s3943_s19 + $0x10] sm:$0xff]  ;;  %v4414_v49 = vld [vmem:[%s6568_s2 + $0x88] sm:$0xff] }
  0x3c   : > { %734 = vmatpush1.msra.mxu0 %v4180_v9  ;;  %805 = vmatpush1.msra.mxu1 %v4185_v10  ;;  %6753 = vst [vmem:[#allocation12_spill] sm:$0xff] %v4414_v49  ;;  %v4419_v50 = vld [vmem:[%s6568_s2 + $0x98] sm:$0xff]  ;;  %v4426_v51 = vld [vmem:[%s6568_s2 + $0x80] sm:$0xff]  ;;  %v4432_v52 = vld [vmem:[%s6568_s2 + $0x90] sm:$0xff] }
  0x3d   : > { %735 = vmatprep.subr.mxu0 %v4192_v11  ;;  %806 = vmatprep.subr.mxu1 %v4197_v12  ;;  %6754 = vst [vmem:[#allocation13_spill] sm:$0xff] %v4419_v50  ;;  %6755 = vst [vmem:[#allocation14_spill] sm:$0xff] %v4426_v51  ;;  %v4437_v53 = vld [vmem:[%s6568_s2 + $0x68] sm:$0xff]  ;;  %v4444_v54 = vld [vmem:[%s6568_s2 + $0x78] sm:$0xff] }
  0x3e   : > { %736 = vmatpush1.msra.mxu0 %v4204_v13  ;;  %807 = vmatpush1.msra.mxu1 %v4209_v14  ;;  %6756 = vst [vmem:[#allocation15_spill] sm:$0xff] %v4432_v52  ;;  %6757 = vst [vmem:[#allocation16_spill] sm:$0xff] %v4437_v53  ;;  %v4451_v55 = vld [vmem:[%s6568_s2 + $0x60] sm:$0xff]  ;;  %v4458_v56 = vld [vmem:[%s6568_s2 + $0x70] sm:$0xff] }
  0x3f   : > { %737 = vmatprep.subr.mxu0 %v4216_v15  ;;  %808 = vmatprep.subr.mxu1 %v4221_v16  ;;  %6758 = vst [vmem:[#allocation17_spill] sm:$0xff] %v4444_v54  ;;  %6759 = vst [vmem:[#allocation18_spill] sm:$0xff] %v4451_v55  ;;  %v376_v57 = vld [vmem:[%s3943_s19 + $0x18] sm:$0xff]  ;;  %v4465_v58 = vld [vmem:[%s6568_s2 + $0x48] sm:$0xff] }
  0x40   : > { %738 = vmatpush1.msra.mxu0 %v4228_v17  ;;  %809 = vmatpush1.msra.mxu1 %v4233_v18  ;;  %6760 = vst [vmem:[#allocation19_spill] sm:$0xff] %v4458_v56  ;;  %6761 = vst [vmem:[#allocation20_spill] sm:$0xff] %v4465_v58  ;;  %v4470_v59 = vld [vmem:[%s6568_s2 + $0x58] sm:$0xff]  ;;  %v4477_v60 = vld [vmem:[%s6568_s2 + $0x40] sm:$0xff] }
  0x41   : > { %739 = vmatprep.subr.mxu0 %v4240_v19  ;;  %810 = vmatprep.subr.mxu1 %v4245_v20  ;;  %6762 = vst [vmem:[#allocation21_spill] sm:$0xff] %v4470_v59  ;;  %6763 = vst [vmem:[#allocation22_spill] sm:$0xff] %v4477_v60  ;;  %v4483_v61 = vld [vmem:[%s6568_s2 + $0x50] sm:$0xff]  ;;  %v4488_v62 = vld [vmem:[%s6568_s2 + $0x28] sm:$0xff] }
  0x42   : > { %740 = vmatpush1.msra.mxu0 %v4252_v21  ;;  %811 = vmatpush1.msra.mxu1 %v4257_v22  ;;  %6764 = vst [vmem:[#allocation23_spill] sm:$0xff] %v4483_v61  ;;  %6765 = vst [vmem:[#allocation24_spill] sm:$0xff] %v4488_v62  ;;  %v4495_v63 = vld [vmem:[%s6568_s2 + $0x38] sm:$0xff]  ;;  %v4502_v0 = vld [vmem:[%s6568_s2 + $0x20] sm:$0xff] }
  0x43   : > { %741 = vmatprep.subr.mxu0 %v4264_v23  ;;  %812 = vmatprep.subr.mxu1 %v4269_v24  ;;  %6766 = vst [vmem:[#allocation25_spill] sm:$0xff] %v4495_v63  ;;  %6767 = vst [vmem:[#allocation26_spill] sm:$0xff] %v4502_v0  ;;  %v4507_v1 = vld [vmem:[%s6568_s2 + $0x30] sm:$0xff] }
  0x44   : > { %742 = vmatpush1.msra.mxu0 %v4276_v25  ;;  %813 = vmatpush1.msra.mxu1 %v4281_v26  ;;  %6768 = vst [vmem:[#allocation27_spill] sm:$0xff] %v4507_v1 }
  0x45   : > { %743 = vmatprep.subr.mxu0 %v4288_v27  ;;  %814 = vmatprep.subr.mxu1 %v4293_v28 }
  0x46   : > { %744 = vmatpush1.msra.mxu0 %v4300_v29  ;;  %815 = vmatpush1.msra.mxu1 %v4305_v30 }
  0x47   : > { %745 = vmatprep.subr.mxu0 %v4312_v31  ;;  %816 = vmatprep.subr.mxu1 %v4317_v32 }
  0x48   : > { %746 = vmatpush1.msra.mxu0 %v4324_v33  ;;  %817 = vmatpush1.msra.mxu1 %v4329_v34 }
  0x49   : > { %747 = vmatprep.subr.mxu0 %v4336_v35  ;;  %818 = vmatprep.subr.mxu1 %v4341_v36 }
  0x4a   : > { %533 = vmatprep.mubr.f32.mxu0 %v6577_v3  ;;  %748 = vmatpush1.msra.mxu0 %v4348_v37 }
  0x4b   : > { %819 = vmatpush1.msra.mxu1 %v4355_v38  ;;  %534 = vmatmul.mubr.f32.gmra.mxu0 %v374_v39 }
  0x4c   : > { %749 = vmatprep.subr.mxu0 %v4363_v40  ;;  %820 = vmatprep.subr.mxu1 %v4368_v41 }
  0x4d   : > { %622 = vmatprep.mubr.f32.mxu1 %v6577_v3  ;;  %750 = vmatpush1.msra.mxu0 %v4375_v42 }
  0x4e   : > { %821 = vmatpush1.msra.mxu1 %v4381_v43  ;;  %751 = vmatprep.subr.mxu0 %v4386_v44 }
  0x4f   : > { %623 = vmatmul.mubr.f32.gmra.mxu1 %v374_v39  ;;  %822 = vmatprep.subr.mxu1 %v4393_v45  ;;  %v4514_v39 = vld [vmem:[%s6568_s2 + $0x8] sm:$0xff] }
  0x50   : > { %539 = vmatprep.mubr.f32.mxu0 %v6577_v3  ;;  %752 = vmatpush1.msra.mxu0 %v4400_v46  ;;  %6769 = vst [vmem:[#allocation28_spill] sm:$0xff] %v4514_v39 }
  0x51   : > { %823 = vmatpush1.msra.mxu1 %v4407_v47  ;;  %540 = vmatmul.mubr.f32.gmra.mxu0 %v375_v48 }
  0x52   : > { %753 = vmatprep.subr.mxu0 %v4414_v49  ;;  %824 = vmatprep.subr.mxu1 %v4419_v50 }
  0x53   : > { %628 = vmatprep.mubr.f32.mxu1 %v6577_v3  ;;  %754 = vmatpush1.msra.mxu0 %v4426_v51 }
  0x54   : > { %825 = vmatpush1.msra.mxu1 %v4432_v52  ;;  %755 = vmatprep.subr.mxu0 %v4437_v53 }
  0x55   : > { %629 = vmatmul.mubr.f32.gmra.mxu1 %v375_v48  ;;  %826 = vmatprep.subr.mxu1 %v4444_v54  ;;  %v4519_v48 = vld [vmem:[%s6568_s2 + $0x18] sm:$0xff] }
  0x56   : > { %545 = vmatprep.mubr.f32.mxu0 %v6577_v3  ;;  %756 = vmatpush1.msra.mxu0 %v4451_v55  ;;  %6770 = vst [vmem:[#allocation29_spill] sm:$0xff] %v4519_v48 }
  0x57   : > { %827 = vmatpush1.msra.mxu1 %v4458_v56  ;;  %546 = vmatmul.mubr.f32.gmra.mxu0 %v376_v57 }
  0x58   : > { %757 = vmatprep.subr.mxu0 %v4465_v58  ;;  %828 = vmatprep.subr.mxu1 %v4470_v59 }
  0x59   : > { %634 = vmatprep.mubr.f32.mxu1 %v6577_v3  ;;  %758 = vmatpush1.msra.mxu0 %v4477_v60  ;;  %v4525_v3 = vld [vmem:[%s6568_s2] sm:$0xff] }
  0x5a   : > { %829 = vmatpush1.msra.mxu1 %v4483_v61  ;;  %759 = vmatprep.subr.mxu0 %v4488_v62  ;;  %6771 = vst [vmem:[#allocation30_spill] sm:$0xff] %v4525_v3  ;;  %v4532_v62 = vld [vmem:[%s6568_s2 + $0x10] sm:$0xff] }
  0x5b   : > { %635 = vmatmul.mubr.f32.gmra.mxu1 %v376_v57  ;;  %830 = vmatprep.subr.mxu1 %v4495_v63  ;;  %6772 = vst [vmem:[#allocation31_spill] sm:$0xff] %v4532_v62  ;;  %v721_v57 = vld [vmem:[#allocation5 + $0x28] sm:$0xff]  ;;  %v6773_v63 = vmov 0.0  }
  0x5c   : > { %760 = vmatpush1.msra.mxu0 %v4502_v0  ;;  %831 = vmatpush1.msra.mxu1 %v4507_v1 }
  0x5d   : > { %761 = vmatprep.subr.mxu0 %v4514_v39  ;;  %832 = vmatprep.subr.mxu1 %v4519_v48 }
  0x5e   : > { %762 = vmatpush1.msra.mxu0 %v4525_v3  ;;  %795 = vmatprep.mubr.f32.mxu0 %v6773_v63 }
  0x5f   : > { %833 = vmatpush1.msra.mxu1 %v4532_v62  ;;  %866 = vmatprep.mubr.f32.mxu1 %v6773_v63 }
  0x60   : > { %796 = vmatmul.mubr.f32.vlgmr.msra.gmra.mxu0 %v721_v57  ;;  %867 = vmatmul.mubr.f32.vlgmr.msra.gmra.mxu1 %v721_v57  ;;  %v6774_v57 = vld [vmem:[#allocation24_spill] sm:$0xff] }
  0x61   : > { %909 = vmatprep.subr.mxu0 %v4146_v2  ;;  %980 = vmatprep.subr.mxu1 %v4152_v4 }
  0x62   : > { %910 = vmatpush1.msra.mxu0 %v4157_v5  ;;  %981 = vmatpush1.msra.mxu1 %v4162_v6 }
  0x63   : > { %911 = vmatprep.subr.mxu0 %v4169_v7  ;;  %982 = vmatprep.subr.mxu1 %v4174_v8 }
  0x64   : > { %912 = vmatpush1.msra.mxu0 %v4180_v9  ;;  %983 = vmatpush1.msra.mxu1 %v4185_v10 }
  0x65   : > { %913 = vmatprep.subr.mxu0 %v4192_v11  ;;  %984 = vmatprep.subr.mxu1 %v4197_v12 }
  0x66   : > { %914 = vmatpush1.msra.mxu0 %v4204_v13  ;;  %985 = vmatpush1.msra.mxu1 %v4209_v14 }
  0x67   : > { %915 = vmatprep.subr.mxu0 %v4216_v15  ;;  %986 = vmatprep.subr.mxu1 %v4221_v16 }
  0x68   : > { %916 = vmatpush1.msra.mxu0 %v4228_v17  ;;  %987 = vmatpush1.msra.mxu1 %v4233_v18 }
  0x69   : > { %917 = vmatprep.subr.mxu0 %v4240_v19  ;;  %988 = vmatprep.subr.mxu1 %v4245_v20 }
  0x6a   : > { %918 = vmatpush1.msra.mxu0 %v4252_v21  ;;  %989 = vmatpush1.msra.mxu1 %v4257_v22 }
  0x6b   : > { %919 = vmatprep.subr.mxu0 %v4264_v23  ;;  %990 = vmatprep.subr.mxu1 %v4269_v24 }
  0x6c   : > { %920 = vmatpush1.msra.mxu0 %v4276_v25  ;;  %991 = vmatpush1.msra.mxu1 %v4281_v26 }
  0x6d   : > { %921 = vmatprep.subr.mxu0 %v4288_v27  ;;  %992 = vmatprep.subr.mxu1 %v4293_v28 }
  0x6e   : > { %922 = vmatpush1.msra.mxu0 %v4300_v29  ;;  %993 = vmatpush1.msra.mxu1 %v4305_v30 }
  0x6f   : > { %923 = vmatprep.subr.mxu0 %v4312_v31  ;;  %994 = vmatprep.subr.mxu1 %v4317_v32 }
  0x70   : > { %924 = vmatpush1.msra.mxu0 %v4324_v33  ;;  %995 = vmatpush1.msra.mxu1 %v4329_v34 }
  0x71   : > { %925 = vmatprep.subr.mxu0 %v4336_v35  ;;  %996 = vmatprep.subr.mxu1 %v4341_v36 }
  0x72   : > { %926 = vmatpush1.msra.mxu0 %v4348_v37  ;;  %997 = vmatpush1.msra.mxu1 %v4355_v38 }
  0x73   : > { %927 = vmatprep.subr.mxu0 %v4363_v40  ;;  %998 = vmatprep.subr.mxu1 %v4368_v41 }
  0x74   : > { %928 = vmatpush1.msra.mxu0 %v4375_v42  ;;  %999 = vmatpush1.msra.mxu1 %v4381_v43 }
  0x75   : > { %929 = vmatprep.subr.mxu0 %v4386_v44  ;;  %1000 = vmatprep.subr.mxu1 %v4393_v45 }
  0x76   : > { %930 = vmatpush1.msra.mxu0 %v4400_v46  ;;  %1001 = vmatpush1.msra.mxu1 %v4407_v47 }
  0x77   : > { %931 = vmatprep.subr.mxu0 %v4414_v49  ;;  %1002 = vmatprep.subr.mxu1 %v4419_v50 }
  0x78   : > { %932 = vmatpush1.msra.mxu0 %v4426_v51  ;;  %1003 = vmatpush1.msra.mxu1 %v4432_v52  ;;  %v6775_v51 = vld [vmem:[#allocation25_spill] sm:$0xff] }
  0x79   : > { %933 = vmatprep.subr.mxu0 %v4437_v53  ;;  %1004 = vmatprep.subr.mxu1 %v4444_v54 }
  0x7a   : > { %934 = vmatpush1.msra.mxu0 %v4451_v55  ;;  %1005 = vmatpush1.msra.mxu1 %v4458_v56 }
  0x7b   : > { %935 = vmatprep.subr.mxu0 %v4465_v58  ;;  %1006 = vmatprep.subr.mxu1 %v4470_v59 }
  0x7c   : > { %936 = vmatpush1.msra.mxu0 %v4477_v60  ;;  %1007 = vmatpush1.msra.mxu1 %v4483_v61 }
  0x7d   : > { %937 = vmatprep.subr.mxu0 %v6774_v57  ;;  %1008 = vmatprep.subr.mxu1 %v6775_v51  ;;  %v443_v51 = vlaneseq }
  0x7e   : > { %938 = vmatpush1.msra.mxu0 %v4502_v0  ;;  %1009 = vmatpush1.msra.mxu1 %v4507_v1 }
  0x7f   : > { %939 = vmatprep.subr.mxu0 %v4514_v39  ;;  %1010 = vmatprep.subr.mxu1 %v4519_v48  ;;  %v444_v0 = vshrl.u32 %v443_v51, 7  ;;  %v441_v48 = vld [vmem:[%s6569_s3] sm:$0xf] }
  0x80   : > { %940 = vmatpush1.msra.mxu0 %v4525_v3  ;;  %973 = vmatprep.mubr.f32.mxu0 %v6773_v63 }
  0x81   : > { %1011 = vmatpush1.msra.mxu1 %v4532_v62  ;;  %1044 = vmatprep.mubr.f32.mxu1 %v6773_v63  ;;  %v4608_v1 = vsub.s32 0, %v444_v0  ;;  %v4613_v39 = vsub.s32 1, %v444_v0  ;;  %v4616_v63 = vsub.s32 2, %v444_v0  ;;  %v4621_v59 = vsub.s32 3, %v444_v0 }
  0x82   : > { %1088 = vmatprep.subr.mxu0 %v4146_v2  ;;  %1159 = vmatprep.subr.mxu1 %v4152_v4 }
  0x83   : > { %6776 = vst [vmem:[#allocation32_spill] sm:$0xff] %v4608_v1  ;;  %6777 = vst [vmem:[#allocation33_spill] sm:$0xff] %v4613_v39  ;;  %v446_v62 = vrot.slane %v441_v48, %v4608_v1  ;;  %v450_v4 = vrot.slane %v441_v48, %v4613_v39  ;;  %v454_v56 = vrot.slane %v441_v48, %v4616_v63 }
  0x84   : > { %6778 = vst [vmem:[#allocation34_spill] sm:$0xff] %v4616_v63  ;;  %6780 = vst [vmem:[#allocation36_spill] sm:$0xff] %v4621_v59  ;;  %v458_v53 = vrot.slane %v441_v48, %v4621_v59 }
  0xf7   : > { %v529_v57 = vpop.f32.mrf.mxu0 }
  0xf9   : > { %v618_v3 = vpop.f32.mrf.mxu1  ;;  %v531_v61 = vpop.f32.mrf.mxu0 }
  0xfb   : > { %v620_v60 = vpop.f32.mrf.mxu1 }
 0x10b   : > { %v535_v2 = vpop.f32.mrf.mxu0 }
 0x10c   : > { %v4619_v51 = vadd.f32 %v535_v2, %v446_v62 }
 0x10d   : > { %v537_v58 = vpop.f32.mrf.mxu0 }
 0x10e   : > { %6779 = vst [vmem:[#allocation35_spill] sm:$0xff] %v4619_v51  ;;  %v4624_v55 = vadd.f32 %v537_v58, %v450_v4 }
 0x10f   : > { %v624_v54 = vpop.f32.mrf.mxu1 }
 0x110   : > { %6781 = vst [vmem:[#allocation37_spill] sm:$0xff] %v4624_v55  ;;  %v4627_v52 = vadd.f32 %v624_v54, %v454_v56 }
 0x111   : > { %v541_v1 = vpop.f32.mrf.mxu0  ;;  %v626_v50 = vpop.f32.mrf.mxu1 }
 0x112   : > { %6782 = vst [vmem:[#allocation38_spill] sm:$0xff] %v4627_v52  ;;  %v4629_v49 = vadd.f32 %v541_v1, %v446_v62  ;;  %v4631_v47 = vadd.f32 %v626_v50, %v458_v53 }
 0x113   : > { %v543_v2 = vpop.f32.mrf.mxu0 }
 0x114   : > { %6783 = vst [vmem:[#allocation39_spill] sm:$0xff] %v4629_v49  ;;  %6784 = vst [vmem:[#allocation40_spill] sm:$0xff] %v4631_v47  ;;  %v4633_v39 = vadd.f32 %v543_v2, %v450_v4  ;;  %v530_v2 = vadd.f32 %v529_v57, %v446_v62  ;;  %v532_v47 = vadd.f32 %v531_v61, %v450_v4  ;;  %v6795_v57 = vld [vmem:[#allocation10_spill] sm:$0xff] }
 0x115   : > { %v630_v0 = vpop.f32.mrf.mxu1 }
 0x116   : > { %6785 = vst [vmem:[#allocation41_spill] sm:$0xff] %v4633_v39  ;;  %v4635_v51 = vadd.f32 %v630_v0, %v454_v56 }
 0x117   : > { %v547_v63 = vpop.f32.mrf.mxu0  ;;  %v632_v58 = vpop.f32.mrf.mxu1 }
 0x118   : > { %6786 = vst [vmem:[#allocation42_spill] sm:$0xff] %v4635_v51  ;;  %v4637_v55 = vadd.f32 %v547_v63, %v446_v62  ;;  %v4639_v46 = vadd.f32 %v632_v58, %v458_v53 }
 0x119   : > { %v549_v54 = vpop.f32.mrf.mxu0 }
 0x11a   : > { %6787 = vst [vmem:[#allocation43_spill] sm:$0xff] %v4637_v55  ;;  %6788 = vst [vmem:[#allocation44_spill] sm:$0xff] %v4639_v46  ;;  %v4641_v48 = vadd.f32 %v549_v54, %v450_v4  ;;  %v619_v55 = vadd.f32 %v618_v3, %v454_v56  ;;  %v621_v46 = vadd.f32 %v620_v60, %v458_v53 }
 0x11b   : > { %v636_v59 = vpop.f32.mrf.mxu1 }
 0x11c   : > { %6789 = vst [vmem:[#allocation45_spill] sm:$0xff] %v4641_v48  ;;  %v4643_v1 = vadd.f32 %v636_v59, %v454_v56 }
 0x11d   : > { %v638_v50 = vpop.f32.mrf.mxu1 }
 0x11e   : > { %6790 = vst [vmem:[#allocation46_spill] sm:$0xff] %v4643_v1  ;;  %v4645_v49 = vadd.f32 %v638_v50, %v458_v53 }
 0x120   : > { %6791 = vst [vmem:[#allocation47_spill] sm:$0xff] %v4645_v49  ;;  %v797_v39 = vpop.f32.mrf.mxu0  ;;  %v868_v58 = vpop.f32.mrf.mxu1 }
 0x121   : > { %v873_v0 = vadd.f32 %v797_v39, %v530_v2  ;;  %v875_v54 = vadd.f32 %v868_v58, %v619_v55  ;;  %v6799_v2 = vld [vmem:[#allocation14_spill] sm:$0xff]  ;;  %v6802_v58 = vld [vmem:[#allocation17_spill] sm:$0xff] }
 0x122   : > { %v799_v51 = vpop.f32.mrf.mxu0  ;;  %v870_v48 = vpop.f32.mrf.mxu1 }
 0x123   : > { %v3624_v52 = vmul.f32 -1.442695, %v873_v0  ;;  %v874_v45 = vadd.f32 %v799_v51, %v532_v47  ;;  %v3626_v59 = vmul.f32 -1.442695, %v875_v54  ;;  %v876_v44 = vadd.f32 %v870_v48, %v621_v46  ;;  %v6796_v51 = vld [vmem:[#allocation11_spill] sm:$0xff]  ;;  %v6797_v48 = vld [vmem:[#allocation12_spill] sm:$0xff] }
 0x124   : > { %v6800_v0 = vld [vmem:[#allocation15_spill] sm:$0xff]  ;;  %v6803_v54 = vld [vmem:[#allocation18_spill] sm:$0xff] }
 0x125   : > { %3675 = vpow2.f32 %v3624_v52  ;;  %v3625_v63 = vmul.f32 -1.442695, %v874_v45  ;;  %v723_v52 = vld [vmem:[#allocation5 + $0x10] sm:$0xff] }
 0x127   : > { %3677 = vpow2.f32 %v3625_v63  ;;  %v6801_v63 = vld [vmem:[#allocation16_spill] sm:$0xff] }
 0x128   : > { %3679 = vpow2.f32 %v3626_v59  ;;  %v6804_v59 = vld [vmem:[#allocation19_spill] sm:$0xff] }
 0x132   : > { %v3676_v1 = vpop.eup %3675 }
 0x133   : > { %v886_v50 = vadd.f32 1.0, %v3676_v1  ;;  %v6798_v1 = vld [vmem:[#allocation13_spill] sm:$0xff] }
 0x134   : > { %v3678_v49 = vpop.eup %3677 }
 0x135   : > { %3681 = vrcp.f32 %v886_v50  ;;  %v887_v4 = vadd.f32 1.0, %v3678_v49  ;;  %v3680_v61 = vpop.eup %3679  ;;  %v6794_v49 = vld [vmem:[#allocation9_spill] sm:$0xff]  ;;  %v6805_v50 = vld [vmem:[#allocation20_spill] sm:$0xff] }
 0x136   : > { %3683 = vtanh.f32 %v876_v44  ;;  %v888_v39 = vadd.f32 1.0, %v3680_v61  ;;  %v6793_v44 = vld [vmem:[#allocation8_spill] sm:$0xff]  ;;  %v6807_v61 = vld [vmem:[#allocation22_spill] sm:$0xff] }
 0x137   : > { %3685 = vrcp.f32 %v887_v4  ;;  %v6806_v4 = vld [vmem:[#allocation21_spill] sm:$0xff] }
 0x138   : > { %3687 = vrcp.f32 %v888_v39  ;;  %v6812_v39 = vld [vmem:[#allocation27_spill] sm:$0xff] }
 0x142   : > { %v3682_v47 = vpop.eup %3681 }
 0x143   : > { %v3684_v45 = vpop.eup %3683 }
 0x144   : > { %v3686_v62 = vpop.eup %3685  ;;  %v897_v55 = vmul.f32 %v3684_v45, %v3682_v47  ;;  %v6808_v47 = vld [vmem:[#allocation23_spill] sm:$0xff]  ;;  %v6810_v45 = vld [vmem:[#allocation25_spill] sm:$0xff] }
 0x145   : > { %v896_v3 = vmul.f32 %v3686_v62, %v723_v52  ;;  %v3688_v46 = vpop.eup %3687  ;;  %v6809_v52 = vld [vmem:[#allocation24_spill] sm:$0xff]  ;;  %v6811_v62 = vld [vmem:[#allocation26_spill] sm:$0xff] }
 0x147   : > { %v4647_v56 = vadd.f32 %v897_v55, %v896_v3  ;;  %v6813_v3 = vld [vmem:[#allocation28_spill] sm:$0xff]  ;;  %v6814_v55 = vld [vmem:[#allocation29_spill] sm:$0xff] }
 0x149   : > { %3689 = vtanh.f32 %v4647_v56 }
 0x156   : > { %v3690_v53 = vpop.eup %3689 }
 0x157   : > { %v4650_v60 = vmul.f32 %v3690_v53, %v3688_v46  ;;  %v6815_v46 = vld [vmem:[#allocation30_spill] sm:$0xff]  ;;  %v6816_v53 = vmov 0.0  }
 0x159   : > { %6792 = vst [vmem:[#allocation48_spill] sm:$0xff] %v4650_v60  ;;  %974 = vmatmul.mubr.f32.vlgmr.msra.gmra.mxu0 %v4650_v60  ;;  %1045 = vmatmul.mubr.f32.vlgmr.msra.gmra.mxu1 %v4650_v60  ;;  %v6817_v60 = vld [vmem:[#allocation31_spill] sm:$0xff] }
 0x15a   : > { %1089 = vmatpush1.msra.mxu0 %v4157_v5  ;;  %1160 = vmatpush1.msra.mxu1 %v4162_v6 }
 0x15b   : > { %1090 = vmatprep.subr.mxu0 %v4169_v7  ;;  %1161 = vmatprep.subr.mxu1 %v4174_v8 }
 0x15c   : > { %1091 = vmatpush1.msra.mxu0 %v4180_v9  ;;  %1162 = vmatpush1.msra.mxu1 %v4185_v10 }
 0x15d   : > { %1092 = vmatprep.subr.mxu0 %v4192_v11  ;;  %1163 = vmatprep.subr.mxu1 %v4197_v12 }
 0x15e   : > { %1093 = vmatpush1.msra.mxu0 %v4204_v13  ;;  %1164 = vmatpush1.msra.mxu1 %v4209_v14 }
 0x15f   : > { %1094 = vmatprep.subr.mxu0 %v4216_v15  ;;  %1165 = vmatprep.subr.mxu1 %v4221_v16 }
 0x160   : > { %1095 = vmatpush1.msra.mxu0 %v4228_v17  ;;  %1166 = vmatpush1.msra.mxu1 %v4233_v18 }
 0x161   : > { %1096 = vmatprep.subr.mxu0 %v4240_v19  ;;  %1167 = vmatprep.subr.mxu1 %v4245_v20 }
 0x162   : > { %1097 = vmatpush1.msra.mxu0 %v4252_v21  ;;  %1168 = vmatpush1.msra.mxu1 %v4257_v22 }
 0x163   : > { %1098 = vmatprep.subr.mxu0 %v4264_v23  ;;  %1169 = vmatprep.subr.mxu1 %v4269_v24 }
 0x164   : > { %1099 = vmatpush1.msra.mxu0 %v4276_v25  ;;  %1170 = vmatpush1.msra.mxu1 %v4281_v26 }
 0x165   : > { %1100 = vmatprep.subr.mxu0 %v4288_v27  ;;  %1171 = vmatprep.subr.mxu1 %v4293_v28 }
 0x166   : > { %1101 = vmatpush1.msra.mxu0 %v4300_v29  ;;  %1172 = vmatpush1.msra.mxu1 %v4305_v30 }
 0x167   : > { %1102 = vmatprep.subr.mxu0 %v4312_v31  ;;  %1173 = vmatprep.subr.mxu1 %v4317_v32 }
 0x168   : > { %1103 = vmatpush1.msra.mxu0 %v4324_v33  ;;  %1174 = vmatpush1.msra.mxu1 %v4329_v34 }
 0x169   : > { %1104 = vmatprep.subr.mxu0 %v4336_v35  ;;  %1175 = vmatprep.subr.mxu1 %v4341_v36 }
 0x16a   : > { %1105 = vmatpush1.msra.mxu0 %v4348_v37  ;;  %1176 = vmatpush1.msra.mxu1 %v4355_v38 }
 0x16b   : > { %1106 = vmatprep.subr.mxu0 %v4363_v40  ;;  %1177 = vmatprep.subr.mxu1 %v4368_v41 }
 0x16c   : > { %1107 = vmatpush1.msra.mxu0 %v4375_v42  ;;  %1178 = vmatpush1.msra.mxu1 %v4381_v43 }
 0x16d   : > { %1108 = vmatprep.subr.mxu0 %v6793_v44  ;;  %1179 = vmatprep.subr.mxu1 %v6794_v49 }
 0x16e   : > { %1109 = vmatpush1.msra.mxu0 %v6795_v57  ;;  %1180 = vmatpush1.msra.mxu1 %v6796_v51 }
 0x16f   : > { %1110 = vmatprep.subr.mxu0 %v6797_v48  ;;  %1181 = vmatprep.subr.mxu1 %v6798_v1 }
 0x170   : > { %1111 = vmatpush1.msra.mxu0 %v6799_v2  ;;  %1182 = vmatpush1.msra.mxu1 %v6800_v0 }
 0x171   : > { %1112 = vmatprep.subr.mxu0 %v6801_v63  ;;  %1183 = vmatprep.subr.mxu1 %v6802_v58 }
 0x172   : > { %1113 = vmatpush1.msra.mxu0 %v6803_v54  ;;  %1184 = vmatpush1.msra.mxu1 %v6804_v59  ;;  %v6822_v59 = vld [vmem:[#allocation38_spill] sm:$0xff] }
 0x173   : > { %1114 = vmatprep.subr.mxu0 %v6805_v50  ;;  %1185 = vmatprep.subr.mxu1 %v6806_v4 }
 0x174   : > { %1115 = vmatpush1.msra.mxu0 %v6807_v61  ;;  %1186 = vmatpush1.msra.mxu1 %v6808_v47  ;;  %v6818_v47 = vld [vmem:[#allocation6_spill] sm:$0xff] }
 0x175   : > { %1116 = vmatprep.subr.mxu0 %v6809_v52  ;;  %1187 = vmatprep.subr.mxu1 %v6810_v45  ;;  %v6819_v52 = vld [vmem:[#allocation7_spill] sm:$0xff] }
 0x176   : > { %1117 = vmatpush1.msra.mxu0 %v6811_v62  ;;  %1188 = vmatpush1.msra.mxu1 %v6812_v39  ;;  %v6820_v62 = vld [vmem:[#allocation35_spill] sm:$0xff] }
 0x177   : > { %1118 = vmatprep.subr.mxu0 %v6813_v3  ;;  %1189 = vmatprep.subr.mxu1 %v6814_v55  ;;  %v6821_v3 = vld [vmem:[#allocation37_spill] sm:$0xff] }
 0x178   : > { %1119 = vmatpush1.msra.mxu0 %v6815_v46  ;;  %1152 = vmatprep.mubr.f32.mxu0 %v6816_v53 }
 0x179   : > { %1190 = vmatpush1.msra.mxu1 %v6817_v60  ;;  %1223 = vmatprep.mubr.f32.mxu1 %v6816_v53  ;;  %v6823_v53 = vld [vmem:[#allocation40_spill] sm:$0xff] }
 0x17a   : > { %1267 = vmatprep.subr.mxu0 %v6818_v47  ;;  %1338 = vmatprep.subr.mxu1 %v6819_v52 }
 0x219   : > { %v975_v45 = vpop.f32.mrf.mxu0  ;;  %v1046_v46 = vpop.f32.mrf.mxu1 }
 0x21a   : > { %v1051_v61 = vadd.f32 %v975_v45, %v6820_v62  ;;  %v1053_v54 = vadd.f32 %v1046_v46, %v6822_v59 }
 0x21b   : > { %v977_v39 = vpop.f32.mrf.mxu0  ;;  %v1048_v60 = vpop.f32.mrf.mxu1 }
 0x21c   : > { %v3627_v4 = vmul.f32 -1.442695, %v1051_v61  ;;  %v1052_v50 = vadd.f32 %v977_v39, %v6821_v3  ;;  %v3629_v58 = vmul.f32 -1.442695, %v1053_v54  ;;  %v1054_v63 = vadd.f32 %v1048_v60, %v6823_v53 }
 0x21e   : > { %3691 = vpow2.f32 %v3627_v4  ;;  %v3628_v55 = vmul.f32 -1.442695, %v1052_v50 }
 0x220   : > { %3693 = vpow2.f32 %v3628_v55 }
 0x221   : > { %3695 = vpow2.f32 %v3629_v58 }
 0x222   : > { %3697 = vtanh.f32 %v1054_v63 }
 0x22b   : > { %v3692_v47 = vpop.eup %3691 }
 0x22c   : > { %v1064_v0 = vadd.f32 1.0, %v3692_v47  ;;  %v1505_v47 = vld [vmem:[%s6570_s4 + $0x1e0] sm:$0xff] }
 0x22d   : > { %v3694_v52 = vpop.eup %3693 }
 0x22e   : > { %3699 = vrcp.f32 %v1064_v0  ;;  %v1065_v45 = vadd.f32 1.0, %v3694_v52  ;;  %v3696_v61 = vpop.eup %3695  ;;  %v1507_v52 = vld [vmem:[%s6570_s4 + $0x1f0] sm:$0xff] }
 0x22f   : > { %v3698_v62 = vpop.eup %3697  ;;  %v1066_v3 = vadd.f32 1.0, %v3696_v61  ;;  %v1504_v61 = vld [vmem:[%s6570_s4 + $0x1d8] sm:$0xff] }
 0x230   : > { %3701 = vrcp.f32 %v1065_v45  ;;  %v1502_v45 = vld [vmem:[%s6570_s4 + $0x1c8] sm:$0xff] }
 0x231   : > { %3703 = vrcp.f32 %v1066_v3  ;;  %v1497_v3 = vld [vmem:[%s6570_s4 + $0x1a0] sm:$0xff] }
 0x23b   : > { %v3700_v4 = vpop.eup %3699 }
 0x23c   : > { %v1075_v50 = vmul.f32 %v3700_v4, %v3698_v62  ;;  %v1501_v62 = vld [vmem:[%s6570_s4 + $0x1c0] sm:$0xff]  ;;  %v1503_v4 = vld [vmem:[%s6570_s4 + $0x1d0] sm:$0xff] }
 0x23d   : > { %v3702_v39 = vpop.eup %3701 }
 0x23e   : > { %v1074_v59 = vmul.f32 %v3702_v39, %v4647_v56  ;;  %v3704_v60 = vpop.eup %3703  ;;  %v1500_v39 = vld [vmem:[%s6570_s4 + $0x1b8] sm:$0xff] }
 0x240   : > { %v4725_v55 = vadd.f32 %v1075_v50, %v1074_v59  ;;  %v1498_v50 = vld [vmem:[%s6570_s4 + $0x1a8] sm:$0xff]  ;;  %v1499_v59 = vld [vmem:[%s6570_s4 + $0x1b0] sm:$0xff] }
 0x242   : > { %3705 = vtanh.f32 %v4725_v55 }
 0x24f   : > { %v3706_v58 = vpop.eup %3705 }
 0x250   : > { %v4728_v54 = vmul.f32 %v3706_v58, %v3704_v60  ;;  %v1496_v60 = vld [vmem:[%s6570_s4 + $0x198] sm:$0xff]  ;;  %v1493_v58 = vld [vmem:[%s6570_s4 + $0x180] sm:$0xff] }
 0x252   : > { %1153 = vmatmul.mubr.f32.vlgmr.msra.gmra.mxu0 %v4728_v54  ;;  %1224 = vmatmul.mubr.f32.vlgmr.msra.gmra.mxu1 %v4728_v54 }
 0x253   : > { %1268 = vmatpush1.msra.mxu0 %v4157_v5  ;;  %1339 = vmatpush1.msra.mxu1 %v4162_v6  ;;  %v6824_v5 = vld [vmem:[#allocation15_spill] sm:$0xff]  ;;  %v6825_v6 = vld [vmem:[#allocation16_spill] sm:$0xff] }
 0x254   : > { %1269 = vmatprep.subr.mxu0 %v4169_v7  ;;  %1340 = vmatprep.subr.mxu1 %v4174_v8  ;;  %v6826_v7 = vld [vmem:[#allocation17_spill] sm:$0xff]  ;;  %v6827_v8 = vld [vmem:[#allocation18_spill] sm:$0xff] }
 0x255   : > { %1270 = vmatpush1.msra.mxu0 %v4180_v9  ;;  %1341 = vmatpush1.msra.mxu1 %v4185_v10  ;;  %v6828_v9 = vld [vmem:[#allocation19_spill] sm:$0xff]  ;;  %v6829_v10 = vld [vmem:[#allocation20_spill] sm:$0xff] }
 0x256   : > { %1271 = vmatprep.subr.mxu0 %v4192_v11  ;;  %1342 = vmatprep.subr.mxu1 %v4197_v12  ;;  %v6830_v11 = vld [vmem:[#allocation21_spill] sm:$0xff]  ;;  %v6831_v12 = vld [vmem:[#allocation22_spill] sm:$0xff] }
 0x257   : > { %1272 = vmatpush1.msra.mxu0 %v4204_v13  ;;  %1343 = vmatpush1.msra.mxu1 %v4209_v14  ;;  %v6832_v13 = vld [vmem:[#allocation23_spill] sm:$0xff]  ;;  %v6833_v14 = vld [vmem:[#allocation24_spill] sm:$0xff] }
 0x258   : > { %1273 = vmatprep.subr.mxu0 %v4216_v15  ;;  %1344 = vmatprep.subr.mxu1 %v4221_v16  ;;  %v6834_v15 = vld [vmem:[#allocation25_spill] sm:$0xff]  ;;  %v6835_v16 = vld [vmem:[#allocation26_spill] sm:$0xff] }
 0x259   : > { %1274 = vmatpush1.msra.mxu0 %v4228_v17  ;;  %1345 = vmatpush1.msra.mxu1 %v4233_v18  ;;  %v6836_v17 = vld [vmem:[#allocation27_spill] sm:$0xff]  ;;  %v6837_v18 = vld [vmem:[#allocation28_spill] sm:$0xff] }
 0x25a   : > { %1275 = vmatprep.subr.mxu0 %v4240_v19  ;;  %1346 = vmatprep.subr.mxu1 %v4245_v20  ;;  %v6838_v19 = vld [vmem:[#allocation29_spill] sm:$0xff]  ;;  %v6839_v20 = vld [vmem:[#allocation30_spill] sm:$0xff] }
 0x25b   : > { %1276 = vmatpush1.msra.mxu0 %v4252_v21  ;;  %1347 = vmatpush1.msra.mxu1 %v4257_v22  ;;  %v6840_v21 = vld [vmem:[#allocation31_spill] sm:$0xff]  ;;  %v6841_v22 = vmov 0.0  }
 0x25c   : > { %1277 = vmatprep.subr.mxu0 %v4264_v23  ;;  %1348 = vmatprep.subr.mxu1 %v4269_v24  ;;  %v1506_v23 = vld [vmem:[%s6570_s4 + $0x1e8] sm:$0xff]  ;;  %v1508_v24 = vld [vmem:[%s6570_s4 + $0x1f8] sm:$0xff] }
 0x25d   : > { %1278 = vmatpush1.msra.mxu0 %v4276_v25  ;;  %1349 = vmatpush1.msra.mxu1 %v4281_v26  ;;  %v6842_v26 = vld [vmem:[#allocation39_spill] sm:$0xff] }
 0x25e   : > { %1279 = vmatprep.subr.mxu0 %v4288_v27  ;;  %1350 = vmatprep.subr.mxu1 %v4293_v28 }
 0x25f   : > { %1280 = vmatpush1.msra.mxu0 %v4300_v29  ;;  %1351 = vmatpush1.msra.mxu1 %v4305_v30  ;;  %v6843_v30 = vld [vmem:[#allocation41_spill] sm:$0xff] }
 0x260   : > { %1281 = vmatprep.subr.mxu0 %v4312_v31  ;;  %1352 = vmatprep.subr.mxu1 %v4317_v32 }
 0x261   : > { %1282 = vmatpush1.msra.mxu0 %v4324_v33  ;;  %1353 = vmatpush1.msra.mxu1 %v4329_v34  ;;  %v6844_v34 = vld [vmem:[#allocation42_spill] sm:$0xff] }
 0x262   : > { %1283 = vmatprep.subr.mxu0 %v4336_v35  ;;  %1354 = vmatprep.subr.mxu1 %v4341_v36 }
 0x263   : > { %1284 = vmatpush1.msra.mxu0 %v4348_v37  ;;  %1355 = vmatpush1.msra.mxu1 %v4355_v38  ;;  %v6845_v38 = vld [vmem:[#allocation44_spill] sm:$0xff] }
 0x264   : > { %1285 = vmatprep.subr.mxu0 %v4363_v40  ;;  %1356 = vmatprep.subr.mxu1 %v4368_v41 }
 0x265   : > { %1286 = vmatpush1.msra.mxu0 %v4375_v42  ;;  %1357 = vmatpush1.msra.mxu1 %v4381_v43 }
 0x266   : > { %1287 = vmatprep.subr.mxu0 %v6793_v44  ;;  %1358 = vmatprep.subr.mxu1 %v6794_v49 }
 0x267   : > { %1288 = vmatpush1.msra.mxu0 %v6795_v57  ;;  %1359 = vmatpush1.msra.mxu1 %v6796_v51 }
 0x268   : > { %1289 = vmatprep.subr.mxu0 %v6797_v48  ;;  %1360 = vmatprep.subr.mxu1 %v6798_v1 }
 0x269   : > { %1290 = vmatpush1.msra.mxu0 %v6799_v2  ;;  %1361 = vmatpush1.msra.mxu1 %v6824_v5  ;;  %v1495_v5 = vld [vmem:[%s6570_s4 + $0x190] sm:$0xff] }
 0x26a   : > { %1291 = vmatprep.subr.mxu0 %v6825_v6  ;;  %1362 = vmatprep.subr.mxu1 %v6826_v7  ;;  %v1490_v6 = vld [vmem:[%s6570_s4 + $0x168] sm:$0xff]  ;;  %v1492_v7 = vld [vmem:[%s6570_s4 + $0x178] sm:$0xff] }
 0x26b   : > { %1292 = vmatpush1.msra.mxu0 %v6827_v8  ;;  %1363 = vmatpush1.msra.mxu1 %v6828_v9  ;;  %v1489_v8 = vld [vmem:[%s6570_s4 + $0x160] sm:$0xff]  ;;  %v1491_v9 = vld [vmem:[%s6570_s4 + $0x170] sm:$0xff] }
 0x26c   : > { %1293 = vmatprep.subr.mxu0 %v6829_v10  ;;  %1364 = vmatprep.subr.mxu1 %v6830_v11  ;;  %v1486_v10 = vld [vmem:[%s6570_s4 + $0x148] sm:$0xff]  ;;  %v1488_v11 = vld [vmem:[%s6570_s4 + $0x158] sm:$0xff] }
 0x26d   : > { %1294 = vmatpush1.msra.mxu0 %v6831_v12  ;;  %1365 = vmatpush1.msra.mxu1 %v6832_v13  ;;  %v1485_v12 = vld [vmem:[%s6570_s4 + $0x140] sm:$0xff]  ;;  %v1487_v13 = vld [vmem:[%s6570_s4 + $0x150] sm:$0xff] }
 0x26e   : > { %1295 = vmatprep.subr.mxu0 %v6833_v14  ;;  %1366 = vmatprep.subr.mxu1 %v6834_v15  ;;  %v1482_v14 = vld [vmem:[%s6570_s4 + $0x128] sm:$0xff]  ;;  %v1484_v15 = vld [vmem:[%s6570_s4 + $0x138] sm:$0xff] }
 0x26f   : > { %1296 = vmatpush1.msra.mxu0 %v6835_v16  ;;  %1367 = vmatpush1.msra.mxu1 %v6836_v17  ;;  %v1481_v16 = vld [vmem:[%s6570_s4 + $0x120] sm:$0xff]  ;;  %v1483_v17 = vld [vmem:[%s6570_s4 + $0x130] sm:$0xff] }
 0x270   : > { %1297 = vmatprep.subr.mxu0 %v6837_v18  ;;  %1368 = vmatprep.subr.mxu1 %v6838_v19  ;;  %v1478_v18 = vld [vmem:[%s6570_s4 + $0x108] sm:$0xff]  ;;  %v1480_v19 = vld [vmem:[%s6570_s4 + $0x118] sm:$0xff] }
 0x271   : > { %1298 = vmatpush1.msra.mxu0 %v6839_v20  ;;  %1369 = vmatpush1.msra.mxu1 %v6840_v21  ;;  %v1477_v20 = vld [vmem:[%s6570_s4 + $0x100] sm:$0xff]  ;;  %v1479_v21 = vld [vmem:[%s6570_s4 + $0x110] sm:$0xff] }
 0x272   : > { %1331 = vmatprep.mubr.f32.mxu0 %v6841_v22  ;;  %1402 = vmatprep.mubr.f32.mxu1 %v6841_v22 }
 0x273   : > { %1531 = vmatprep.subr.mxu0 %v1506_v23  ;;  %1620 = vmatprep.subr.mxu1 %v1508_v24  ;;  %v1474_v23 = vld [vmem:[%s6570_s4 + $0xe8] sm:$0xff]  ;;  %v1476_v24 = vld [vmem:[%s6570_s4 + $0xf8] sm:$0xff] }
 0x312   : > { %v1154_v25 = vpop.f32.mrf.mxu0  ;;  %v1225_v33 = vpop.f32.mrf.mxu1 }
 0x313   : > { %v1230_v27 = vadd.f32 %v1154_v25, %v6842_v26  ;;  %v1232_v35 = vadd.f32 %v1225_v33, %v6844_v34  ;;  %v1473_v25 = vld [vmem:[%s6570_s4 + $0xe0] sm:$0xff]  ;;  %v1475_v26 = vld [vmem:[%s6570_s4 + $0xf0] sm:$0xff] }
 0x314   : > { %v1156_v28 = vpop.f32.mrf.mxu0  ;;  %v1227_v36 = vpop.f32.mrf.mxu1  ;;  %v1465_v33 = vld [vmem:[%s6570_s4 + $0xa0] sm:$0xff]  ;;  %v1467_v34 = vld [vmem:[%s6570_s4 + $0xb0] sm:$0xff] }
 0x315   : > { %v3630_v29 = vmul.f32 -1.442695, %v1230_v27  ;;  %v1231_v31 = vadd.f32 %v1156_v28, %v6843_v30  ;;  %v3632_v37 = vmul.f32 -1.442695, %v1232_v35  ;;  %v1233_v40 = vadd.f32 %v1227_v36, %v6845_v38  ;;  %v1470_v27 = vld [vmem:[%s6570_s4 + $0xc8] sm:$0xff]  ;;  %v1472_v28 = vld [vmem:[%s6570_s4 + $0xd8] sm:$0xff] }
 0x316   : > { %v1471_v30 = vld [vmem:[%s6570_s4 + $0xd0] sm:$0xff]  ;;  %v1462_v35 = vld [vmem:[%s6570_s4 + $0x88] sm:$0xff]  ;;  %v1464_v36 = vld [vmem:[%s6570_s4 + $0x98] sm:$0xff] }
 0x317   : > { %3707 = vpow2.f32 %v3630_v29  ;;  %v3631_v32 = vmul.f32 -1.442695, %v1231_v31  ;;  %v1469_v29 = vld [vmem:[%s6570_s4 + $0xc0] sm:$0xff]  ;;  %v1466_v31 = vld [vmem:[%s6570_s4 + $0xa8] sm:$0xff]  ;;  %v1463_v38 = vld [vmem:[%s6570_s4 + $0x90] sm:$0xff] }
 0x319   : > { %3709 = vpow2.f32 %v3631_v32  ;;  %v1468_v32 = vld [vmem:[%s6570_s4 + $0xb8] sm:$0xff] }
 0x31a   : > { %3711 = vpow2.f32 %v3632_v37  ;;  %v1461_v37 = vld [vmem:[%s6570_s4 + $0x80] sm:$0xff] }
 0x31b   : > { %3713 = vtanh.f32 %v1233_v40  ;;  %v1458_v40 = vld [vmem:[%s6570_s4 + $0x68] sm:$0xff] }
 0x324   : > { %v3708_v41 = vpop.eup %3707 }
 0x325   : > { %v1243_v42 = vadd.f32 1.0, %v3708_v41  ;;  %v1460_v41 = vld [vmem:[%s6570_s4 + $0x78] sm:$0xff] }
 0x326   : > { %v3710_v43 = vpop.eup %3709 }
 0x327   : > { %3715 = vrcp.f32 %v1243_v42  ;;  %v1244_v56 = vadd.f32 1.0, %v3710_v43  ;;  %v3712_v44 = vpop.eup %3711  ;;  %v1457_v42 = vld [vmem:[%s6570_s4 + $0x60] sm:$0xff]  ;;  %v1459_v43 = vld [vmem:[%s6570_s4 + $0x70] sm:$0xff] }
 0x328   : > { %v3714_v49 = vpop.eup %3713  ;;  %v1245_v1 = vadd.f32 1.0, %v3712_v44  ;;  %v1456_v44 = vld [vmem:[%s6570_s4 + $0x58] sm:$0xff] }
 0x329   : > { %3717 = vrcp.f32 %v1244_v56  ;;  %v1454_v56 = vld [vmem:[%s6570_s4 + $0x48] sm:$0xff] }
 0x32a   : > { %3719 = vrcp.f32 %v1245_v1  ;;  %v1449_v1 = vld [vmem:[%s6570_s4 + $0x20] sm:$0xff] }
 0x334   : > { %v3716_v57 = vpop.eup %3715 }
 0x335   : > { %v1254_v51 = vmul.f32 %v3716_v57, %v3714_v49  ;;  %v1453_v49 = vld [vmem:[%s6570_s4 + $0x40] sm:$0xff]  ;;  %v1455_v57 = vld [vmem:[%s6570_s4 + $0x50] sm:$0xff] }
 0x336   : > { %v3718_v48 = vpop.eup %3717 }
 0x337   : > { %v1253_v2 = vmul.f32 %v3718_v48, %v4725_v55  ;;  %v3720_v63 = vpop.eup %3719  ;;  %v1494_v55 = vld [vmem:[%s6570_s4 + $0x188] sm:$0xff]  ;;  %v1452_v48 = vld [vmem:[%s6570_s4 + $0x38] sm:$0xff] }
 0x339   : > { %v4807_v0 = vadd.f32 %v1254_v51, %v1253_v2  ;;  %v1450_v51 = vld [vmem:[%s6570_s4 + $0x28] sm:$0xff]  ;;  %v1451_v2 = vld [vmem:[%s6570_s4 + $0x30] sm:$0xff] }
 0x33b   : > { %3721 = vtanh.f32 %v4807_v0 }
 0x348   : > { %v3722_v46 = vpop.eup %3721 }
 0x349   : > { %v4810_v53 = vmul.f32 %v3722_v46, %v3720_v63  ;;  %v1446_v63 = vld [vmem:[%s6570_s4 + $0x8] sm:$0xff]  ;;  %v1448_v46 = vld [vmem:[%s6570_s4 + $0x18] sm:$0xff] }
 0x34b   : > { %1332 = vmatmul.mubr.f32.vlgmr.msra.gmra.mxu0 %v4810_v53  ;;  %1403 = vmatmul.mubr.f32.vlgmr.msra.gmra.mxu1 %v4810_v53 }
 0x34c   : > { %1532 = vmatpush1.msra.mxu0 %v1505_v47  ;;  %1621 = vmatpush1.msra.mxu1 %v1507_v52  ;;  %v1445_v47 = vld [vmem:[%s6570_s4] sm:$0xff]  ;;  %v1447_v52 = vld [vmem:[%s6570_s4 + $0x10] sm:$0xff] }
 0x34d   : > { %1533 = vmatprep.subr.mxu0 %v1502_v45  ;;  %1622 = vmatprep.subr.mxu1 %v1504_v61  ;;  %v6846_v45 = vld [vmem:[#allocation48_spill] sm:$0xff]  ;;  %v5017_v61 = vld [vmem:[%s6571_s5 + $0x1e8] sm:$0xff] }
 0x34e   : > { %1534 = vmatpush1.msra.mxu0 %v1501_v62  ;;  %1623 = vmatpush1.msra.mxu1 %v1503_v4  ;;  %6847 = vst [vmem:[#allocation8_spill] sm:$0xff] %v5017_v61  ;;  %v5034_v62 = vld [vmem:[%s6571_s5 + $0x1f0] sm:$0xff]  ;;  %v5041_v4 = vld [vmem:[%s6571_s5 + $0x1c8] sm:$0xff] }
 0x34f   : > { %1535 = vmatprep.subr.mxu0 %v1498_v50  ;;  %1624 = vmatprep.subr.mxu1 %v1500_v39  ;;  %v5046_v50 = vld [vmem:[%s6571_s5 + $0x1d8] sm:$0xff]  ;;  %v5053_v39 = vld [vmem:[%s6571_s5 + $0x1c0] sm:$0xff] }
 0x350   : > { %1536 = vmatpush1.msra.mxu0 %v1497_v3  ;;  %1625 = vmatpush1.msra.mxu1 %v1499_v59  ;;  %v5058_v3 = vld [vmem:[%s6571_s5 + $0x1d0] sm:$0xff]  ;;  %v5065_v59 = vld [vmem:[%s6571_s5 + $0x1a8] sm:$0xff] }
 0x351   : > { %1537 = vmatprep.subr.mxu0 %v1494_v55  ;;  %1626 = vmatprep.subr.mxu1 %v1496_v60  ;;  %v5070_v55 = vld [vmem:[%s6571_s5 + $0x1b8] sm:$0xff]  ;;  %v5077_v60 = vld [vmem:[%s6571_s5 + $0x1a0] sm:$0xff] }
 0x352   : > { %1538 = vmatpush1.msra.mxu0 %v1493_v58  ;;  %1627 = vmatpush1.msra.mxu1 %v1495_v5  ;;  %v5082_v58 = vld [vmem:[%s6571_s5 + $0x1b0] sm:$0xff]  ;;  %v5089_v5 = vld [vmem:[%s6571_s5 + $0x188] sm:$0xff] }
 0x353   : > { %1539 = vmatprep.subr.mxu0 %v1490_v6  ;;  %1628 = vmatprep.subr.mxu1 %v1492_v7  ;;  %v5094_v6 = vld [vmem:[%s6571_s5 + $0x198] sm:$0xff]  ;;  %v5101_v7 = vld [vmem:[%s6571_s5 + $0x180] sm:$0xff] }
 0x354   : > { %1540 = vmatpush1.msra.mxu0 %v1489_v8  ;;  %1629 = vmatpush1.msra.mxu1 %v1491_v9  ;;  %v5106_v8 = vld [vmem:[%s6571_s5 + $0x190] sm:$0xff]  ;;  %v5113_v9 = vld [vmem:[%s6571_s5 + $0x168] sm:$0xff] }
 0x355   : > { %1541 = vmatprep.subr.mxu0 %v1486_v10  ;;  %1630 = vmatprep.subr.mxu1 %v1488_v11  ;;  %v5118_v10 = vld [vmem:[%s6571_s5 + $0x178] sm:$0xff]  ;;  %v5125_v11 = vld [vmem:[%s6571_s5 + $0x160] sm:$0xff] }
 0x356   : > { %1542 = vmatpush1.msra.mxu0 %v1485_v12  ;;  %1631 = vmatpush1.msra.mxu1 %v1487_v13  ;;  %v5130_v12 = vld [vmem:[%s6571_s5 + $0x170] sm:$0xff]  ;;  %v5137_v13 = vld [vmem:[%s6571_s5 + $0x148] sm:$0xff] }
 0x357   : > { %1543 = vmatprep.subr.mxu0 %v1482_v14  ;;  %1632 = vmatprep.subr.mxu1 %v1484_v15  ;;  %v5142_v14 = vld [vmem:[%s6571_s5 + $0x158] sm:$0xff]  ;;  %v5149_v15 = vld [vmem:[%s6571_s5 + $0x140] sm:$0xff] }
 0x358   : > { %1544 = vmatpush1.msra.mxu0 %v1481_v16  ;;  %1633 = vmatpush1.msra.mxu1 %v1483_v17  ;;  %v5154_v16 = vld [vmem:[%s6571_s5 + $0x150] sm:$0xff]  ;;  %v5161_v17 = vld [vmem:[%s6571_s5 + $0x128] sm:$0xff] }
 0x359   : > { %1545 = vmatprep.subr.mxu0 %v1478_v18  ;;  %1634 = vmatprep.subr.mxu1 %v1480_v19  ;;  %v5166_v18 = vld [vmem:[%s6571_s5 + $0x138] sm:$0xff]  ;;  %v5173_v19 = vld [vmem:[%s6571_s5 + $0x120] sm:$0xff] }
 0x35a   : > { %1546 = vmatpush1.msra.mxu0 %v1477_v20  ;;  %1635 = vmatpush1.msra.mxu1 %v1479_v21  ;;  %v5178_v20 = vld [vmem:[%s6571_s5 + $0x130] sm:$0xff]  ;;  %v5183_v21 = vld [vmem:[%s6571_s5 + $0x108] sm:$0xff] }
 0x35b   : > { %1547 = vmatprep.subr.mxu0 %v1474_v23  ;;  %1636 = vmatprep.subr.mxu1 %v1476_v24  ;;  %v5190_v23 = vld [vmem:[%s6571_s5 + $0x118] sm:$0xff]  ;;  %v5195_v24 = vld [vmem:[%s6571_s5 + $0x100] sm:$0xff] }
 0x35c   : > { %1548 = vmatpush1.msra.mxu0 %v1473_v25  ;;  %1637 = vmatpush1.msra.mxu1 %v1475_v26  ;;  %v5200_v25 = vld [vmem:[%s6571_s5 + $0x110] sm:$0xff]  ;;  %v5207_v26 = vld [vmem:[%s6571_s5 + $0xe8] sm:$0xff] }
 0x35d   : > { %1549 = vmatprep.subr.mxu0 %v1470_v27  ;;  %1638 = vmatprep.subr.mxu1 %v1472_v28  ;;  %v5212_v27 = vld [vmem:[%s6571_s5 + $0xf8] sm:$0xff]  ;;  %v5217_v28 = vld [vmem:[%s6571_s5 + $0xe0] sm:$0xff] }
 0x35e   : > { %1550 = vmatpush1.msra.mxu0 %v1469_v29  ;;  %1639 = vmatpush1.msra.mxu1 %v1471_v30  ;;  %v5224_v29 = vld [vmem:[%s6571_s5 + $0xf0] sm:$0xff]  ;;  %v5229_v30 = vld [vmem:[%s6571_s5 + $0xc8] sm:$0xff] }
 0x35f   : > { %1551 = vmatprep.subr.mxu0 %v1466_v31  ;;  %1640 = vmatprep.subr.mxu1 %v1468_v32  ;;  %v5234_v31 = vld [vmem:[%s6571_s5 + $0xd8] sm:$0xff]  ;;  %v5241_v32 = vld [vmem:[%s6571_s5 + $0xc0] sm:$0xff] }
 0x360   : > { %1552 = vmatpush1.msra.mxu0 %v1465_v33  ;;  %1641 = vmatpush1.msra.mxu1 %v1467_v34  ;;  %v5246_v33 = vld [vmem:[%s6571_s5 + $0xd0] sm:$0xff]  ;;  %v5253_v34 = vld [vmem:[%s6571_s5 + $0xa8] sm:$0xff] }
 0x361   : > { %1553 = vmatprep.subr.mxu0 %v1462_v35  ;;  %1642 = vmatprep.subr.mxu1 %v1464_v36  ;;  %v5258_v35 = vld [vmem:[%s6571_s5 + $0xb8] sm:$0xff]  ;;  %v5265_v36 = vld [vmem:[%s6571_s5 + $0xa0] sm:$0xff] }
 0x362   : > { %1554 = vmatpush1.msra.mxu0 %v1461_v37  ;;  %1643 = vmatpush1.msra.mxu1 %v1463_v38  ;;  %v5270_v37 = vld [vmem:[%s6571_s5 + $0xb0] sm:$0xff]  ;;  %v5277_v38 = vld [vmem:[%s6571_s5 + $0x88] sm:$0xff] }
 0x363   : > { %1555 = vmatprep.subr.mxu0 %v1458_v40  ;;  %1644 = vmatprep.subr.mxu1 %v1460_v41  ;;  %6849 = vst [vmem:[#allocation10_spill] sm:$0xff] %v5270_v37  ;;  %6850 = vst [vmem:[#allocation11_spill] sm:$0xff] %v5277_v38  ;;  %v5282_v40 = vld [vmem:[%s6571_s5 + $0x98] sm:$0xff]  ;;  %v5289_v41 = vld [vmem:[%s6571_s5 + $0x80] sm:$0xff] }
 0x364   : > { %1556 = vmatpush1.msra.mxu0 %v1457_v42  ;;  %1645 = vmatpush1.msra.mxu1 %v1459_v43  ;;  %6851 = vst [vmem:[#allocation12_spill] sm:$0xff] %v5282_v40  ;;  %6852 = vst [vmem:[#allocation13_spill] sm:$0xff] %v5289_v41  ;;  %v5294_v42 = vld [vmem:[%s6571_s5 + $0x90] sm:$0xff]  ;;  %v5301_v43 = vld [vmem:[%s6571_s5 + $0x68] sm:$0xff] }
 0x365   : > { %1557 = vmatprep.subr.mxu0 %v1454_v56  ;;  %1646 = vmatprep.subr.mxu1 %v1456_v44  ;;  %6853 = vst [vmem:[#allocation14_spill] sm:$0xff] %v5294_v42  ;;  %6854 = vst [vmem:[#allocation6_spill] sm:$0xff] %v5301_v43  ;;  %v5306_v56 = vld [vmem:[%s6571_s5 + $0x78] sm:$0xff]  ;;  %v5313_v44 = vld [vmem:[%s6571_s5 + $0x60] sm:$0xff] }
 0x366   : > { %1558 = vmatpush1.msra.mxu0 %v1453_v49  ;;  %1647 = vmatpush1.msra.mxu1 %v1455_v57  ;;  %6855 = vst [vmem:[#allocation7_spill] sm:$0xff] %v5306_v56  ;;  %6856 = vst [vmem:[#allocation35_spill] sm:$0xff] %v5313_v44  ;;  %v5318_v49 = vld [vmem:[%s6571_s5 + $0x70] sm:$0xff]  ;;  %v5325_v57 = vld [vmem:[%s6571_s5 + $0x48] sm:$0xff] }
 0x367   : > { %1559 = vmatprep.subr.mxu0 %v1450_v51  ;;  %1648 = vmatprep.subr.mxu1 %v1452_v48  ;;  %6857 = vst [vmem:[#allocation37_spill] sm:$0xff] %v5318_v49  ;;  %6858 = vst [vmem:[#allocation38_spill] sm:$0xff] %v5325_v57  ;;  %v5330_v51 = vld [vmem:[%s6571_s5 + $0x58] sm:$0xff]  ;;  %v5337_v48 = vld [vmem:[%s6571_s5 + $0x40] sm:$0xff] }
 0x368   : > { %1560 = vmatpush1.msra.mxu0 %v1449_v1  ;;  %1649 = vmatpush1.msra.mxu1 %v1451_v2  ;;  %6859 = vst [vmem:[#allocation40_spill] sm:$0xff] %v5330_v51  ;;  %6860 = vst [vmem:[#allocation15_spill] sm:$0xff] %v5337_v48  ;;  %v5342_v1 = vld [vmem:[%s6571_s5 + $0x50] sm:$0xff]  ;;  %v5349_v2 = vld [vmem:[%s6571_s5 + $0x28] sm:$0xff] }
 0x369   : > { %1561 = vmatprep.subr.mxu0 %v1446_v63  ;;  %1650 = vmatprep.subr.mxu1 %v1448_v46  ;;  %6861 = vst [vmem:[#allocation16_spill] sm:$0xff] %v5342_v1  ;;  %6862 = vst [vmem:[#allocation17_spill] sm:$0xff] %v5349_v2  ;;  %v5354_v63 = vld [vmem:[%s6571_s5 + $0x38] sm:$0xff]  ;;  %v5361_v46 = vld [vmem:[%s6571_s5 + $0x20] sm:$0xff] }
 0x36a   : > { %1562 = vmatpush1.msra.mxu0 %v1445_v47  ;;  %1595 = vmatprep.mubr.f32.mxu0 %v6841_v22  ;;  %6863 = vst [vmem:[#allocation18_spill] sm:$0xff] %v5354_v63  ;;  %6864 = vst [vmem:[#allocation19_spill] sm:$0xff] %v5361_v46  ;;  %v5366_v47 = vld [vmem:[%s6571_s5 + $0x30] sm:$0xff] }
 0x36b   : > { %1651 = vmatpush1.msra.mxu1 %v1447_v52  ;;  %1684 = vmatprep.mubr.f32.mxu1 %v6841_v22  ;;  %6865 = vst [vmem:[#allocation20_spill] sm:$0xff] %v5366_v47  ;;  %v5373_v52 = vld [vmem:[%s6571_s5 + $0x8] sm:$0xff] }
 0x36c   : > { %1596 = vmatmul.mubr.f32.vlgmr.msra.gmra.mxu0 %v6846_v45  ;;  %1685 = vmatmul.mubr.f32.vlgmr.msra.gmra.mxu1 %v6846_v45  ;;  %6866 = vst [vmem:[#allocation21_spill] sm:$0xff] %v5373_v52  ;;  %v5378_v45 = vld [vmem:[%s6571_s5 + $0x18] sm:$0xff] }
 0x36d   : > { %1601 = vmatprep.mubr.f32.mxu0 %v6841_v22  ;;  %1690 = vmatprep.mubr.f32.mxu1 %v6841_v22  ;;  %6867 = vst [vmem:[#allocation22_spill] sm:$0xff] %v5378_v45 }
 0x36e   : > { %1797 = vmatprep.subr.mxu0 %v5017_v61 }
 0x370   : > { %1602 = vmatmul.mubr.f32.gmra.mxu0 %v4728_v54  ;;  %1691 = vmatmul.mubr.f32.gmra.mxu1 %v4728_v54  ;;  %v5022_v54 = vld [vmem:[%s6571_s5 + $0x1f8] sm:$0xff] }
 0x371   : > { %1607 = vmatprep.mubr.f32.mxu0 %v6841_v22  ;;  %1696 = vmatprep.mubr.f32.mxu1 %v6841_v22  ;;  %6848 = vst [vmem:[#allocation9_spill] sm:$0xff] %v5022_v54 }
 0x372   : > { %1868 = vmatprep.subr.mxu1 %v5022_v54 }
 0x373   : > { %1869 = vmatpush1.msra.mxu1 %v5034_v62 }
 0x374   : > { %1608 = vmatmul.mubr.f32.gmra.mxu0 %v4810_v53  ;;  %1697 = vmatmul.mubr.f32.gmra.mxu1 %v4810_v53  ;;  %v5029_v53 = vld [vmem:[%s6571_s5 + $0x1e0] sm:$0xff] }
 0x375   : > { %1613 = vmatprep.mubr.f32.mxu0 %v6841_v22  ;;  %1702 = vmatprep.mubr.f32.mxu1 %v6841_v22 }
 0x376   : > { %1798 = vmatpush1.msra.mxu0 %v5029_v53  ;;  %1870 = vmatprep.subr.mxu1 %v5046_v50 }
 0x377   : > { %1799 = vmatprep.subr.mxu0 %v5041_v4  ;;  %1871 = vmatpush1.msra.mxu1 %v5058_v3 }
 0x378   : > { %1800 = vmatpush1.msra.mxu0 %v5053_v39  ;;  %1872 = vmatprep.subr.mxu1 %v5070_v55 }
 0x379   : > { %1801 = vmatprep.subr.mxu0 %v5065_v59  ;;  %1873 = vmatpush1.msra.mxu1 %v5082_v58 }
 0x37a   : > { %1802 = vmatpush1.msra.mxu0 %v5077_v60  ;;  %1874 = vmatprep.subr.mxu1 %v5094_v6 }
 0x37b   : > { %1803 = vmatprep.subr.mxu0 %v5089_v5  ;;  %1875 = vmatpush1.msra.mxu1 %v5106_v8 }
 0x37c   : > { %1804 = vmatpush1.msra.mxu0 %v5101_v7  ;;  %1876 = vmatprep.subr.mxu1 %v5118_v10 }
 0x37d   : > { %1805 = vmatprep.subr.mxu0 %v5113_v9  ;;  %1877 = vmatpush1.msra.mxu1 %v5130_v12 }
 0x37e   : > { %1806 = vmatpush1.msra.mxu0 %v5125_v11  ;;  %1878 = vmatprep.subr.mxu1 %v5142_v14 }
 0x37f   : > { %1807 = vmatprep.subr.mxu0 %v5137_v13  ;;  %1879 = vmatpush1.msra.mxu1 %v5154_v16 }
 0x380   : > { %1808 = vmatpush1.msra.mxu0 %v5149_v15  ;;  %1880 = vmatprep.subr.mxu1 %v5166_v18 }
 0x381   : > { %1809 = vmatprep.subr.mxu0 %v5161_v17  ;;  %1881 = vmatpush1.msra.mxu1 %v5178_v20 }
 0x382   : > { %1810 = vmatpush1.msra.mxu0 %v5173_v19  ;;  %1882 = vmatprep.subr.mxu1 %v5190_v23 }
 0x383   : > { %1811 = vmatprep.subr.mxu0 %v5183_v21  ;;  %1883 = vmatpush1.msra.mxu1 %v5200_v25 }
 0x384   : > { %1812 = vmatpush1.msra.mxu0 %v5195_v24  ;;  %1884 = vmatprep.subr.mxu1 %v5212_v27 }
 0x385   : > { %1813 = vmatprep.subr.mxu0 %v5207_v26  ;;  %1885 = vmatpush1.msra.mxu1 %v5224_v29 }
 0x386   : > { %1814 = vmatpush1.msra.mxu0 %v5217_v28  ;;  %1886 = vmatprep.subr.mxu1 %v5234_v31 }
 0x387   : > { %1815 = vmatprep.subr.mxu0 %v5229_v30  ;;  %1887 = vmatpush1.msra.mxu1 %v5246_v33 }
 0x388   : > { %1816 = vmatpush1.msra.mxu0 %v5241_v32  ;;  %1888 = vmatprep.subr.mxu1 %v5258_v35 }
 0x389   : > { %1817 = vmatprep.subr.mxu0 %v5253_v34  ;;  %1889 = vmatpush1.msra.mxu1 %v5270_v37 }
 0x38a   : > { %1818 = vmatpush1.msra.mxu0 %v5265_v36  ;;  %1890 = vmatprep.subr.mxu1 %v5282_v40 }
 0x38b   : > { %1819 = vmatprep.subr.mxu0 %v5277_v38  ;;  %1891 = vmatpush1.msra.mxu1 %v5294_v42 }
 0x38c   : > { %1820 = vmatpush1.msra.mxu0 %v5289_v41  ;;  %1892 = vmatprep.subr.mxu1 %v5306_v56 }
 0x38d   : > { %1821 = vmatprep.subr.mxu0 %v5301_v43  ;;  %1893 = vmatpush1.msra.mxu1 %v5318_v49 }
 0x38e   : > { %1822 = vmatpush1.msra.mxu0 %v5313_v44  ;;  %1894 = vmatprep.subr.mxu1 %v5330_v51 }
 0x38f   : > { %1823 = vmatprep.subr.mxu0 %v5325_v57  ;;  %1895 = vmatpush1.msra.mxu1 %v5342_v1  ;;  %v5390_v1 = vld [vmem:[%s6571_s5 + $0x10] sm:$0xff] }
 0x390   : > { %1824 = vmatpush1.msra.mxu0 %v5337_v48  ;;  %1896 = vmatprep.subr.mxu1 %v5354_v63  ;;  %v5385_v48 = vld [vmem:[%s6571_s5] sm:$0xff]  ;;  %6869 = vst [vmem:[#allocation24_spill] sm:$0xff] %v5390_v1 }
 0x391   : > { %1825 = vmatprep.subr.mxu0 %v5349_v2  ;;  %6868 = vst [vmem:[#allocation23_spill] sm:$0xff] %v5385_v48  ;;  %1897 = vmatpush1.msra.mxu1 %v5366_v47  ;;  %v6870_v2 = vld [vmem:[#allocation43_spill] sm:$0xff] }
 0x392   : > { %1826 = vmatpush1.msra.mxu0 %v5361_v46  ;;  %1898 = vmatprep.subr.mxu1 %v5378_v45  ;;  %v6871_v46 = vld [vmem:[#allocation45_spill] sm:$0xff]  ;;  %v6872_v45 = vld [vmem:[#allocation46_spill] sm:$0xff] }
 0x393   : > { %1827 = vmatprep.subr.mxu0 %v5373_v52  ;;  %1899 = vmatpush1.msra.mxu1 %v5390_v1  ;;  %v6873_v1 = vld [vmem:[#allocation47_spill] sm:$0xff] }
 0x394   : > { %1828 = vmatpush1.msra.mxu0 %v5385_v48  ;;  %2043 = vmatprep.subr.mxu1 %v5022_v54 }
 0x395   : > { %1972 = vmatprep.subr.mxu0 %v5017_v61 }
 0x40b   : > { %v1333_v63 = vpop.f32.mrf.mxu0  ;;  %v1404_v52 = vpop.f32.mrf.mxu1 }
 0x40c   : > { %v1409_v51 = vadd.f32 %v1333_v63, %v6870_v2  ;;  %v1411_v56 = vadd.f32 %v1404_v52, %v6872_v45  ;;  %v6879_v45 = vld [vmem:[#allocation37_spill] sm:$0xff] }
 0x40d   : > { %v1335_v57 = vpop.f32.mrf.mxu0  ;;  %v1406_v48 = vpop.f32.mrf.mxu1 }
 0x40e   : > { %v3633_v49 = vmul.f32 -1.442695, %v1409_v51  ;;  %v1410_v44 = vadd.f32 %v1335_v57, %v6871_v46  ;;  %v3635_v43 = vmul.f32 -1.442695, %v1411_v56  ;;  %v1412_v42 = vadd.f32 %v1406_v48, %v6873_v1  ;;  %v6877_v48 = vld [vmem:[#allocation7_spill] sm:$0xff] }
 0x40f   : > { %v6878_v1 = vld [vmem:[#allocation35_spill] sm:$0xff] }
 0x410   : > { %3723 = vpow2.f32 %v3633_v49  ;;  %v3634_v47 = vmul.f32 -1.442695, %v1410_v44 }
 0x412   : > { %3725 = vpow2.f32 %v3634_v47 }
 0x413   : > { %3727 = vpow2.f32 %v3635_v43 }
 0x414   : > { %3729 = vtanh.f32 %v1412_v42  ;;  %v6876_v42 = vld [vmem:[#allocation6_spill] sm:$0xff] }
 0x41d   : > { %v3724_v61 = vpop.eup %3723 }
 0x41e   : > { %v1422_v41 = vadd.f32 1.0, %v3724_v61 }
 0x41f   : > { %v3726_v54 = vpop.eup %3725 }
 0x420   : > { %3731 = vrcp.f32 %v1422_v41  ;;  %v1423_v2 = vadd.f32 1.0, %v3726_v54  ;;  %v3728_v51 = vpop.eup %3727  ;;  %v1790_v54 = vld [vmem:[#allocation5 + $0x8] sm:$0xff]  ;;  %v6875_v41 = vld [vmem:[#allocation14_spill] sm:$0xff] }
 0x421   : > { %v3730_v57 = vpop.eup %3729  ;;  %v1424_v46 = vadd.f32 1.0, %v3728_v51  ;;  %v6881_v51 = vld [vmem:[#allocation40_spill] sm:$0xff] }
 0x422   : > { %3733 = vrcp.f32 %v1423_v2  ;;  %v6880_v2 = vld [vmem:[#allocation38_spill] sm:$0xff] }
 0x423   : > { %3735 = vrcp.f32 %v1424_v46  ;;  %v6886_v46 = vld [vmem:[#allocation19_spill] sm:$0xff] }
 0x42d   : > { %v3732_v49 = vpop.eup %3731 }
 0x42e   : > { %v1433_v44 = vmul.f32 %v3732_v49, %v3730_v57  ;;  %v6882_v57 = vld [vmem:[#allocation15_spill] sm:$0xff]  ;;  %v6883_v49 = vld [vmem:[#allocation16_spill] sm:$0xff] }
 0x42f   : > { %v3734_v63 = vpop.eup %3733 }
 0x430   : > { %v1432_v47 = vmul.f32 %v3734_v63, %v4807_v0  ;;  %v3736_v56 = vpop.eup %3735  ;;  %v6874_v0 = vld [vmem:[#allocation13_spill] sm:$0xff]  ;;  %v6885_v63 = vld [vmem:[#allocation18_spill] sm:$0xff] }
 0x432   : > { %v1434_v52 = vadd.f32 %v1433_v44, %v1432_v47  ;;  %v6884_v44 = vld [vmem:[#allocation17_spill] sm:$0xff]  ;;  %v6887_v47 = vld [vmem:[#allocation20_spill] sm:$0xff] }
 0x434   : > { %1440 = vst [vmem:[#allocation5 + $0x10] sm:$0xff] %v1434_v52  ;;  %3737 = vtanh.f32 %v1434_v52  ;;  %v6888_v52 = vld [vmem:[#allocation21_spill] sm:$0xff] }
 0x441   : > { %v3738_v61 = vpop.eup %3737 }
 0x442   : > { %v1436_v43 = vmul.f32 %v3738_v61, %v3736_v56  ;;  %v6889_v56 = vld [vmem:[#allocation22_spill] sm:$0xff]  ;;  %v6890_v61 = vld [vmem:[#allocation23_spill] sm:$0xff] }
 0x444   : > { %1439 = vst [vmem:[#allocation5 + $0x28] sm:$0xff] %v1436_v43  ;;  %1614 = vmatmul.mubr.f32.gmra.mxu0 %v1436_v43  ;;  %1703 = vmatmul.mubr.f32.gmra.mxu1 %v1436_v43  ;;  %v6891_v43 = vld [vmem:[#allocation24_spill] sm:$0xff] }
 0x445   : > { %1861 = vmatprep.mubr.f32.mxu0 %v6841_v22  ;;  %1932 = vmatprep.mubr.f32.mxu1 %v6841_v22 }
 0x448   : > { %1862 = vmatmul.mubr.f32.vlgmr.msra.gmra.mxu0 %v1790_v54  ;;  %1933 = vmatmul.mubr.f32.vlgmr.msra.gmra.mxu1 %v1790_v54  ;;  %v6892_v54 = vld [vmem:[#allocation8_spill] sm:$0xff] }
 0x449   : > { %1973 = vmatpush1.msra.mxu0 %v5029_v53  ;;  %2044 = vmatpush1.msra.mxu1 %v5034_v62 }
 0x44a   : > { %1974 = vmatprep.subr.mxu0 %v5041_v4  ;;  %2045 = vmatprep.subr.mxu1 %v5046_v50 }
 0x44b   : > { %1975 = vmatpush1.msra.mxu0 %v5053_v39  ;;  %2046 = vmatpush1.msra.mxu1 %v5058_v3 }
 0x44c   : > { %1976 = vmatprep.subr.mxu0 %v5065_v59  ;;  %2047 = vmatprep.subr.mxu1 %v5070_v55 }
 0x44d   : > { %1977 = vmatpush1.msra.mxu0 %v5077_v60  ;;  %2048 = vmatpush1.msra.mxu1 %v5082_v58 }
 0x44e   : > { %1978 = vmatprep.subr.mxu0 %v5089_v5  ;;  %2049 = vmatprep.subr.mxu1 %v5094_v6 }
 0x44f   : > { %1979 = vmatpush1.msra.mxu0 %v5101_v7  ;;  %2050 = vmatpush1.msra.mxu1 %v5106_v8 }
 0x450   : > { %1980 = vmatprep.subr.mxu0 %v5113_v9  ;;  %2051 = vmatprep.subr.mxu1 %v5118_v10 }
 0x451   : > { %1981 = vmatpush1.msra.mxu0 %v5125_v11  ;;  %2052 = vmatpush1.msra.mxu1 %v5130_v12 }
 0x452   : > { %1982 = vmatprep.subr.mxu0 %v5137_v13  ;;  %2053 = vmatprep.subr.mxu1 %v5142_v14 }
 0x453   : > { %1983 = vmatpush1.msra.mxu0 %v5149_v15  ;;  %2054 = vmatpush1.msra.mxu1 %v5154_v16 }
 0x454   : > { %1984 = vmatprep.subr.mxu0 %v5161_v17  ;;  %2055 = vmatprep.subr.mxu1 %v5166_v18 }
 0x455   : > { %1985 = vmatpush1.msra.mxu0 %v5173_v19  ;;  %2056 = vmatpush1.msra.mxu1 %v5178_v20 }
 0x456   : > { %1986 = vmatprep.subr.mxu0 %v5183_v21  ;;  %2057 = vmatprep.subr.mxu1 %v5190_v23 }
 0x457   : > { %1987 = vmatpush1.msra.mxu0 %v5195_v24  ;;  %2058 = vmatpush1.msra.mxu1 %v5200_v25 }
 0x458   : > { %1988 = vmatprep.subr.mxu0 %v5207_v26  ;;  %2059 = vmatprep.subr.mxu1 %v5212_v27 }
 0x459   : > { %1989 = vmatpush1.msra.mxu0 %v5217_v28  ;;  %2060 = vmatpush1.msra.mxu1 %v5224_v29 }
 0x45a   : > { %1990 = vmatprep.subr.mxu0 %v5229_v30  ;;  %2061 = vmatprep.subr.mxu1 %v5234_v31 }
 0x45b   : > { %1991 = vmatpush1.msra.mxu0 %v5241_v32  ;;  %2062 = vmatpush1.msra.mxu1 %v5246_v33 }
 0x45c   : > { %1992 = vmatprep.subr.mxu0 %v5253_v34  ;;  %2063 = vmatprep.subr.mxu1 %v5258_v35 }
 0x45d   : > { %1993 = vmatpush1.msra.mxu0 %v5265_v36  ;;  %2064 = vmatpush1.msra.mxu1 %v5270_v37 }
 0x45e   : > { %1994 = vmatprep.subr.mxu0 %v5277_v38  ;;  %2065 = vmatprep.subr.mxu1 %v5282_v40 }
 0x45f   : > { %1995 = vmatpush1.msra.mxu0 %v6874_v0  ;;  %2066 = vmatpush1.msra.mxu1 %v6875_v41 }
 0x460   : > { %1996 = vmatprep.subr.mxu0 %v6876_v42  ;;  %2067 = vmatprep.subr.mxu1 %v6877_v48 }
 0x461   : > { %1997 = vmatpush1.msra.mxu0 %v6878_v1  ;;  %2068 = vmatpush1.msra.mxu1 %v6879_v45 }
 0x462   : > { %1998 = vmatprep.subr.mxu0 %v6880_v2  ;;  %2069 = vmatprep.subr.mxu1 %v6881_v51 }
 0x463   : > { %1999 = vmatpush1.msra.mxu0 %v6882_v57  ;;  %2070 = vmatpush1.msra.mxu1 %v6883_v49  ;;  %v1686_v49 = vpop.f32.mrf.mxu1 }
 0x464   : > { %2000 = vmatprep.subr.mxu0 %v6884_v44  ;;  %2071 = vmatprep.subr.mxu1 %v6885_v63  ;;  %v6893_v44 = vld [vmem:[#allocation9_spill] sm:$0xff]  ;;  %v1597_v63 = vpop.f32.mrf.mxu0 }
 0x465   : > { %2001 = vmatpush1.msra.mxu0 %v6886_v46  ;;  %2072 = vmatpush1.msra.mxu1 %v6887_v47 }
 0x466   : > { %2002 = vmatprep.subr.mxu0 %v6888_v52  ;;  %2073 = vmatprep.subr.mxu1 %v6889_v56  ;;  %v1599_v46 = vpop.f32.mrf.mxu0  ;;  %v1688_v52 = vpop.f32.mrf.mxu1 }
 0x467   : > { %2003 = vmatpush1.msra.mxu0 %v6890_v61  ;;  %2036 = vmatprep.mubr.f32.mxu0 %v6841_v22 }
 0x468   : > { %2074 = vmatpush1.msra.mxu1 %v6891_v43  ;;  %2107 = vmatprep.mubr.f32.mxu1 %v6841_v22  ;;  %v5473_v47 = vpop.f32.mrf.mxu0  ;;  %v5477_v56 = vpop.f32.mrf.mxu1 }
 0x469   : > { %2148 = vmatprep.subr.mxu0 %v6892_v54  ;;  %2219 = vmatprep.subr.mxu1 %v6893_v44  ;;  %6894 = vst [vmem:[#allocation25_spill] sm:$0xff] %v5473_v47  ;;  %6896 = vst [vmem:[#allocation27_spill] sm:$0xff] %v5477_v56  ;;  %v1509_v54 = vld [vmem:[%s6572_s6] sm:$0xf] }
 0x46a   : > { %v5475_v57 = vpop.f32.mrf.mxu0  ;;  %v5481_v51 = vpop.f32.mrf.mxu1  ;;  %v6900_v44 = vld [vmem:[#allocation32_spill] sm:$0xff] }
 0x46b   : > { %6895 = vst [vmem:[#allocation26_spill] sm:$0xff] %v5475_v57  ;;  %6898 = vst [vmem:[#allocation29_spill] sm:$0xff] %v5481_v51  ;;  %v5489_v22 = vrot.slane %v1509_v54, %v6900_v44  ;;  %v6904_v57 = vld [vmem:[#allocation33_spill] sm:$0xff] }
 0x46c   : > { %v5479_v61 = vpop.f32.mrf.mxu0  ;;  %v5491_v2 = vpop.f32.mrf.mxu1  ;;  %v5496_v45 = vrot.slane %v1509_v54, %v6904_v57 }
 0x46d   : > { %6897 = vst [vmem:[#allocation28_spill] sm:$0xff] %v5479_v61  ;;  %6901 = vst [vmem:[#allocation31_spill] sm:$0xff] %v5489_v22  ;;  %v1598_v61 = vadd.f32 %v1597_v63, %v5489_v22 }
 0x46e   : > { %v5486_v43 = vpop.f32.mrf.mxu0  ;;  %6902 = vst [vmem:[#allocation39_spill] sm:$0xff] %v5491_v2  ;;  %v5501_v51 = vpop.f32.mrf.mxu1  ;;  %v1600_v48 = vadd.f32 %v1599_v46, %v5496_v45 }
 0x46f   : > { %6899 = vst [vmem:[#allocation30_spill] sm:$0xff] %v5486_v43  ;;  %6906 = vst [vmem:[#allocation44_spill] sm:$0xff] %v5501_v51  ;;  %v6911_v51 = vld [vmem:[#allocation36_spill] sm:$0xff] }
 0x470   : > { %v5513_v22 = vrot.slane %v1509_v54, %v6911_v51 }
 0x504   : > { %v5493_v47 = vpop.f32.mrf.mxu0  ;;  %v5504_v43 = vpop.f32.mrf.mxu1 }
 0x505   : > { %6903 = vst [vmem:[#allocation41_spill] sm:$0xff] %v5493_v47  ;;  %6907 = vst [vmem:[#allocation48_spill] sm:$0xff] %v5504_v43  ;;  %v6909_v47 = vld [vmem:[#allocation34_spill] sm:$0xff] }
 0x506   : > { %v5498_v56 = vpop.f32.mrf.mxu0  ;;  %v5506_v0 = vpop.f32.mrf.mxu1  ;;  %v5509_v40 = vrot.slane %v1509_v54, %v6909_v47 }
 0x507   : > { %6905 = vst [vmem:[#allocation42_spill] sm:$0xff] %v5498_v56  ;;  %6908 = vst [vmem:[#allocation43_spill] sm:$0xff] %v5506_v0 }
 0x508   : > { %v1863_v1 = vpop.f32.mrf.mxu0  ;;  %6910 = vst [vmem:[#allocation45_spill] sm:$0xff] %v5509_v40  ;;  %v1934_v63 = vpop.f32.mrf.mxu1  ;;  %v1687_v56 = vadd.f32 %v1686_v49, %v5509_v40  ;;  %v1792_v49 = vld [vmem:[#allocation5] sm:$0xff] }
 0x509   : > { %v1939_v44 = vadd.f32 %v1863_v1, %v1598_v61  ;;  %v1689_v1 = vadd.f32 %v1688_v52, %v5513_v22 }
 0x50a   : > { %v1865_v42 = vpop.f32.mrf.mxu0  ;;  %v1941_v46 = vadd.f32 %v1934_v63, %v1687_v56  ;;  %v1936_v43 = vpop.f32.mrf.mxu1 }
 0x50b   : > { %v3636_v41 = vmul.f32 -1.442695, %v1939_v44  ;;  %v1940_v2 = vadd.f32 %v1865_v42, %v1600_v48  ;;  %v1942_v48 = vadd.f32 %v1936_v43, %v1689_v1  ;;  %v6916_v1 = vld [vmem:[#allocation6_spill] sm:$0xff] }
 0x50c   : > { %v3638_v44 = vmul.f32 -1.442695, %v1941_v46 }
 0x50d   : > { %3739 = vpow2.f32 %v3636_v41  ;;  %v3637_v57 = vmul.f32 -1.442695, %v1940_v2 }
 0x50f   : > { %3741 = vpow2.f32 %v3637_v57 }
 0x510   : > { %3743 = vpow2.f32 %v3638_v44  ;;  %v6917_v44 = vld [vmem:[#allocation7_spill] sm:$0xff] }
 0x51a   : > { %v3740_v42 = vpop.eup %3739 }
 0x51b   : > { %v1952_v61 = vadd.f32 1.0, %v3740_v42  ;;  %v6918_v42 = vld [vmem:[#allocation35_spill] sm:$0xff] }
 0x51c   : > { %v3742_v41 = vpop.eup %3741 }
 0x51d   : > { %3745 = vrcp.f32 %v1952_v61  ;;  %v1953_v2 = vadd.f32 1.0, %v3742_v41  ;;  %v3744_v57 = vpop.eup %3743  ;;  %v6920_v61 = vld [vmem:[#allocation38_spill] sm:$0xff]  ;;  %v6921_v41 = vld [vmem:[#allocation40_spill] sm:$0xff] }
 0x51e   : > { %3747 = vtanh.f32 %v1942_v48  ;;  %v1954_v51 = vadd.f32 1.0, %v3744_v57  ;;  %v6919_v48 = vld [vmem:[#allocation37_spill] sm:$0xff]  ;;  %v6923_v57 = vld [vmem:[#allocation16_spill] sm:$0xff] }
 0x51f   : > { %3749 = vrcp.f32 %v1953_v2  ;;  %v6922_v2 = vld [vmem:[#allocation15_spill] sm:$0xff] }
 0x520   : > { %3751 = vrcp.f32 %v1954_v51  ;;  %v6914_v51 = vld [vmem:[#allocation13_spill] sm:$0xff] }
 0x52a   : > { %v3746_v47 = vpop.eup %3745 }
 0x52b   : > { %v3748_v0 = vpop.eup %3747 }
 0x52c   : > { %v3750_v54 = vpop.eup %3749  ;;  %v1963_v63 = vmul.f32 %v3748_v0, %v3746_v47  ;;  %v6913_v0 = vld [vmem:[#allocation12_spill] sm:$0xff]  ;;  %v6915_v47 = vld [vmem:[#allocation14_spill] sm:$0xff] }
 0x52d   : > { %v1962_v56 = vmul.f32 %v3750_v54, %v1792_v49  ;;  %v3752_v52 = vpop.eup %3751  ;;  %v6924_v49 = vld [vmem:[#allocation17_spill] sm:$0xff]  ;;  %v6925_v54 = vld [vmem:[#allocation18_spill] sm:$0xff] }
 0x52f   : > { %v5516_v40 = vadd.f32 %v1963_v63, %v1962_v56  ;;  %v6926_v56 = vld [vmem:[#allocation19_spill] sm:$0xff]  ;;  %v6927_v63 = vld [vmem:[#allocation20_spill] sm:$0xff] }
 0x531   : > { %3753 = vtanh.f32 %v5516_v40 }
 0x53e   : > { %v3754_v43 = vpop.eup %3753 }
 0x53f   : > { %v5519_v46 = vmul.f32 %v3754_v43, %v3752_v52  ;;  %v6928_v52 = vld [vmem:[#allocation21_spill] sm:$0xff]  ;;  %v6929_v43 = vld [vmem:[#allocation22_spill] sm:$0xff] }
 0x541   : > { %6912 = vst [vmem:[#allocation46_spill] sm:$0xff] %v5519_v46  ;;  %2037 = vmatmul.mubr.f32.vlgmr.msra.gmra.mxu0 %v5519_v46  ;;  %2108 = vmatmul.mubr.f32.vlgmr.msra.gmra.mxu1 %v5519_v46  ;;  %v6930_v46 = vld [vmem:[#allocation23_spill] sm:$0xff] }
 0x542   : > { %2149 = vmatpush1.msra.mxu0 %v5029_v53  ;;  %2220 = vmatpush1.msra.mxu1 %v5034_v62 }
 0x543   : > { %2150 = vmatprep.subr.mxu0 %v5041_v4  ;;  %2221 = vmatprep.subr.mxu1 %v5046_v50 }
 0x544   : > { %2151 = vmatpush1.msra.mxu0 %v5053_v39  ;;  %2222 = vmatpush1.msra.mxu1 %v5058_v3 }
 0x545   : > { %2152 = vmatprep.subr.mxu0 %v5065_v59  ;;  %2223 = vmatprep.subr.mxu1 %v5070_v55 }
 0x546   : > { %2153 = vmatpush1.msra.mxu0 %v5077_v60  ;;  %2224 = vmatpush1.msra.mxu1 %v5082_v58 }
 0x547   : > { %2154 = vmatprep.subr.mxu0 %v5089_v5  ;;  %2225 = vmatprep.subr.mxu1 %v5094_v6 }
 0x548   : > { %2155 = vmatpush1.msra.mxu0 %v5101_v7  ;;  %2226 = vmatpush1.msra.mxu1 %v5106_v8 }
 0x549   : > { %2156 = vmatprep.subr.mxu0 %v5113_v9  ;;  %2227 = vmatprep.subr.mxu1 %v5118_v10 }
 0x54a   : > { %2157 = vmatpush1.msra.mxu0 %v5125_v11  ;;  %2228 = vmatpush1.msra.mxu1 %v5130_v12 }
 0x54b   : > { %2158 = vmatprep.subr.mxu0 %v5137_v13  ;;  %2229 = vmatprep.subr.mxu1 %v5142_v14 }
 0x54c   : > { %2159 = vmatpush1.msra.mxu0 %v5149_v15  ;;  %2230 = vmatpush1.msra.mxu1 %v5154_v16 }
 0x54d   : > { %2160 = vmatprep.subr.mxu0 %v5161_v17  ;;  %2231 = vmatprep.subr.mxu1 %v5166_v18 }
 0x54e   : > { %2161 = vmatpush1.msra.mxu0 %v5173_v19  ;;  %2232 = vmatpush1.msra.mxu1 %v5178_v20 }
 0x54f   : > { %2162 = vmatprep.subr.mxu0 %v5183_v21  ;;  %2233 = vmatprep.subr.mxu1 %v5190_v23 }
 0x550   : > { %2163 = vmatpush1.msra.mxu0 %v5195_v24  ;;  %2234 = vmatpush1.msra.mxu1 %v5200_v25 }
 0x551   : > { %2164 = vmatprep.subr.mxu0 %v5207_v26  ;;  %2235 = vmatprep.subr.mxu1 %v5212_v27 }
 0x552   : > { %2165 = vmatpush1.msra.mxu0 %v5217_v28  ;;  %2236 = vmatpush1.msra.mxu1 %v5224_v29 }
 0x553   : > { %2166 = vmatprep.subr.mxu0 %v5229_v30  ;;  %2237 = vmatprep.subr.mxu1 %v5234_v31 }
 0x554   : > { %2167 = vmatpush1.msra.mxu0 %v5241_v32  ;;  %2238 = vmatpush1.msra.mxu1 %v5246_v33 }
 0x555   : > { %2168 = vmatprep.subr.mxu0 %v5253_v34  ;;  %2239 = vmatprep.subr.mxu1 %v5258_v35 }
 0x556   : > { %2169 = vmatpush1.msra.mxu0 %v5265_v36  ;;  %2240 = vmatpush1.msra.mxu1 %v5270_v37 }
 0x557   : > { %2170 = vmatprep.subr.mxu0 %v5277_v38  ;;  %2241 = vmatprep.subr.mxu1 %v6913_v0  ;;  %v6940_v0 = vld [vmem:[#allocation29_spill] sm:$0xff] }
 0x558   : > { %2171 = vmatpush1.msra.mxu0 %v6914_v51  ;;  %2242 = vmatpush1.msra.mxu1 %v6915_v47  ;;  %v6939_v47 = vld [vmem:[#allocation27_spill] sm:$0xff] }
 0x559   : > { %2172 = vmatprep.subr.mxu0 %v6916_v1  ;;  %2243 = vmatprep.subr.mxu1 %v6917_v44 }
 0x55a   : > { %2173 = vmatpush1.msra.mxu0 %v6918_v42  ;;  %2244 = vmatpush1.msra.mxu1 %v6919_v48 }
 0x55b   : > { %2174 = vmatprep.subr.mxu0 %v6920_v61  ;;  %2245 = vmatprep.subr.mxu1 %v6921_v41  ;;  %v6931_v61 = vmov 0.0   ;;  %v6932_v41 = vld [vmem:[#allocation24_spill] sm:$0xff] }
 0x55c   : > { %2175 = vmatpush1.msra.mxu0 %v6922_v2  ;;  %2246 = vmatpush1.msra.mxu1 %v6923_v57  ;;  %v6933_v57 = vld [vmem:[#allocation8_spill] sm:$0xff] }
 0x55d   : > { %2176 = vmatprep.subr.mxu0 %v6924_v49  ;;  %2247 = vmatprep.subr.mxu1 %v6925_v54  ;;  %v6934_v49 = vld [vmem:[#allocation9_spill] sm:$0xff]  ;;  %v6935_v54 = vld [vmem:[#allocation31_spill] sm:$0xff] }
 0x55e   : > { %2177 = vmatpush1.msra.mxu0 %v6926_v56  ;;  %2248 = vmatpush1.msra.mxu1 %v6927_v63  ;;  %v6936_v56 = vld [vmem:[#allocation25_spill] sm:$0xff] }
 0x55f   : > { %2178 = vmatprep.subr.mxu0 %v6928_v52  ;;  %2249 = vmatprep.subr.mxu1 %v6929_v43  ;;  %v1604_v2 = vadd.f32 %v6936_v56, %v6935_v54  ;;  %v6937_v52 = vld [vmem:[#allocation26_spill] sm:$0xff]  ;;  %v1695_v56 = vadd.f32 %v6940_v0, %v5513_v22 }
 0x560   : > { %2179 = vmatpush1.msra.mxu0 %v6930_v46  ;;  %2212 = vmatprep.mubr.f32.mxu0 %v6931_v61  ;;  %v1606_v48 = vadd.f32 %v6937_v52, %v5496_v45 }
 0x561   : > { %2250 = vmatpush1.msra.mxu1 %v6932_v41  ;;  %2283 = vmatprep.mubr.f32.mxu1 %v6931_v61  ;;  %v6938_v61 = vld [vmem:[#allocation45_spill] sm:$0xff] }
 0x562   : > { %2324 = vmatprep.subr.mxu0 %v6933_v57  ;;  %2395 = vmatprep.subr.mxu1 %v6934_v49  ;;  %v1693_v57 = vadd.f32 %v6939_v47, %v6938_v61 }
 0x601   : > { %v2038_v63 = vpop.f32.mrf.mxu0  ;;  %v2109_v41 = vpop.f32.mrf.mxu1 }
 0x602   : > { %v2114_v43 = vadd.f32 %v2038_v63, %v1604_v2  ;;  %v2116_v51 = vadd.f32 %v2109_v41, %v1693_v57 }
 0x603   : > { %v2040_v42 = vpop.f32.mrf.mxu0  ;;  %v2111_v49 = vpop.f32.mrf.mxu1 }
 0x604   : > { %v3639_v46 = vmul.f32 -1.442695, %v2114_v43  ;;  %v2115_v44 = vadd.f32 %v2040_v42, %v1606_v48  ;;  %v3641_v54 = vmul.f32 -1.442695, %v2116_v51  ;;  %v2117_v38 = vadd.f32 %v2111_v49, %v1695_v56 }
 0x606   : > { %3755 = vpow2.f32 %v3639_v46  ;;  %v3640_v1 = vmul.f32 -1.442695, %v2115_v44 }
 0x608   : > { %3757 = vpow2.f32 %v3640_v1 }
 0x609   : > { %3759 = vpow2.f32 %v3641_v54 }
 0x60a   : > { %3761 = vtanh.f32 %v2117_v38 }
 0x613   : > { %v3756_v37 = vpop.eup %3755 }
 0x614   : > { %v2127_v52 = vadd.f32 1.0, %v3756_v37 }
 0x615   : > { %v3758_v2 = vpop.eup %3757 }
 0x616   : > { %3763 = vrcp.f32 %v2127_v52  ;;  %v2128_v46 = vadd.f32 1.0, %v3758_v2  ;;  %v3760_v1 = vpop.eup %3759 }
 0x617   : > { %v3762_v44 = vpop.eup %3761  ;;  %v2129_v41 = vadd.f32 1.0, %v3760_v1 }
 0x618   : > { %3765 = vrcp.f32 %v2128_v46 }
 0x619   : > { %3767 = vrcp.f32 %v2129_v41 }
 0x623   : > { %v3764_v42 = vpop.eup %3763 }
 0x624   : > { %v2138_v48 = vmul.f32 %v3764_v42, %v3762_v44 }
 0x625   : > { %v3766_v47 = vpop.eup %3765 }
 0x626   : > { %v2137_v63 = vmul.f32 %v3766_v47, %v5516_v40  ;;  %v3768_v37 = vpop.eup %3767 }
 0x628   : > { %v5598_v43 = vadd.f32 %v2138_v48, %v2137_v63 }
 0x62a   : > { %3769 = vtanh.f32 %v5598_v43 }
 0x637   : > { %v3770_v0 = vpop.eup %3769 }
 0x638   : > { %v5601_v51 = vmul.f32 %v3770_v0, %v3768_v37 }
 0x63a   : > { %2213 = vmatmul.mubr.f32.vlgmr.msra.gmra.mxu0 %v5601_v51  ;;  %2284 = vmatmul.mubr.f32.vlgmr.msra.gmra.mxu1 %v5601_v51 }
 0x63b   : > { %2325 = vmatpush1.msra.mxu0 %v5029_v53  ;;  %2396 = vmatpush1.msra.mxu1 %v5034_v62  ;;  %v6941_v53 = vld [vmem:[#allocation10_spill] sm:$0xff]  ;;  %v6942_v62 = vld [vmem:[#allocation11_spill] sm:$0xff] }
 0x63c   : > { %2326 = vmatprep.subr.mxu0 %v5041_v4  ;;  %2397 = vmatprep.subr.mxu1 %v5046_v50  ;;  %v6943_v4 = vld [vmem:[#allocation12_spill] sm:$0xff]  ;;  %v6944_v50 = vld [vmem:[#allocation13_spill] sm:$0xff] }
 0x63d   : > { %2327 = vmatpush1.msra.mxu0 %v5053_v39  ;;  %2398 = vmatpush1.msra.mxu1 %v5058_v3  ;;  %v6945_v39 = vld [vmem:[#allocation14_spill] sm:$0xff] }
 0x63e   : > { %2328 = vmatprep.subr.mxu0 %v5065_v59  ;;  %2399 = vmatprep.subr.mxu1 %v5070_v55  ;;  %v6946_v3 = vld [vmem:[#allocation6_spill] sm:$0xff]  ;;  %v6947_v59 = vld [vmem:[#allocation7_spill] sm:$0xff] }
 0x63f   : > { %2329 = vmatpush1.msra.mxu0 %v5077_v60  ;;  %2400 = vmatpush1.msra.mxu1 %v5082_v58  ;;  %v6948_v55 = vld [vmem:[#allocation35_spill] sm:$0xff]  ;;  %v6949_v60 = vld [vmem:[#allocation37_spill] sm:$0xff]  ;;  %v6950_v58 = vld [vmem:[#allocation38_spill] sm:$0xff] }
 0x640   : > { %2330 = vmatprep.subr.mxu0 %v5089_v5  ;;  %2401 = vmatprep.subr.mxu1 %v5094_v6  ;;  %v6951_v5 = vld [vmem:[#allocation40_spill] sm:$0xff]  ;;  %v6952_v6 = vld [vmem:[#allocation15_spill] sm:$0xff] }
 0x641   : > { %2331 = vmatpush1.msra.mxu0 %v5101_v7  ;;  %2402 = vmatpush1.msra.mxu1 %v5106_v8  ;;  %v6953_v7 = vld [vmem:[#allocation16_spill] sm:$0xff]  ;;  %v6954_v8 = vld [vmem:[#allocation17_spill] sm:$0xff] }
 0x642   : > { %2332 = vmatprep.subr.mxu0 %v5113_v9  ;;  %2403 = vmatprep.subr.mxu1 %v5118_v10  ;;  %v6955_v9 = vld [vmem:[#allocation18_spill] sm:$0xff]  ;;  %v6956_v10 = vld [vmem:[#allocation19_spill] sm:$0xff] }
 0x643   : > { %2333 = vmatpush1.msra.mxu0 %v5125_v11  ;;  %2404 = vmatpush1.msra.mxu1 %v5130_v12  ;;  %v6957_v11 = vld [vmem:[#allocation20_spill] sm:$0xff]  ;;  %v6958_v12 = vld [vmem:[#allocation21_spill] sm:$0xff] }
 0x644   : > { %2334 = vmatprep.subr.mxu0 %v5137_v13  ;;  %2405 = vmatprep.subr.mxu1 %v5142_v14  ;;  %v6959_v13 = vld [vmem:[#allocation22_spill] sm:$0xff]  ;;  %v6960_v14 = vld [vmem:[#allocation23_spill] sm:$0xff] }
 0x645   : > { %2335 = vmatpush1.msra.mxu0 %v5149_v15  ;;  %2406 = vmatpush1.msra.mxu1 %v5154_v16  ;;  %v6961_v15 = vld [vmem:[#allocation24_spill] sm:$0xff]  ;;  %v6962_v16 = vmov 0.0  }
 0x646   : > { %2336 = vmatprep.subr.mxu0 %v5161_v17  ;;  %2407 = vmatprep.subr.mxu1 %v5166_v18  ;;  %v2563_v17 = vld [vmem:[%s6573_s7 + $0x1e8] sm:$0xff]  ;;  %v2565_v18 = vld [vmem:[%s6573_s7 + $0x1f8] sm:$0xff] }
 0x647   : > { %2337 = vmatpush1.msra.mxu0 %v5173_v19  ;;  %2408 = vmatpush1.msra.mxu1 %v5178_v20  ;;  %v6963_v19 = vld [vmem:[#allocation31_spill] sm:$0xff]  ;;  %v6964_v20 = vld [vmem:[#allocation28_spill] sm:$0xff] }
 0x648   : > { %2338 = vmatprep.subr.mxu0 %v5183_v21  ;;  %2409 = vmatprep.subr.mxu1 %v5190_v23  ;;  %v1610_v21 = vadd.f32 %v6964_v20, %v6963_v19  ;;  %v2538_v20 = vld [vmem:[%s6573_s7 + $0x120] sm:$0xff] }
 0x649   : > { %2339 = vmatpush1.msra.mxu0 %v5195_v24  ;;  %2410 = vmatpush1.msra.mxu1 %v5200_v25  ;;  %v6965_v24 = vld [vmem:[#allocation30_spill] sm:$0xff] }
 0x64a   : > { %2340 = vmatprep.subr.mxu0 %v5207_v26  ;;  %2411 = vmatprep.subr.mxu1 %v5212_v27  ;;  %v1612_v25 = vadd.f32 %v6965_v24, %v5496_v45  ;;  %v2537_v24 = vld [vmem:[%s6573_s7 + $0x118] sm:$0xff] }
 0x64b   : > { %2341 = vmatpush1.msra.mxu0 %v5217_v28  ;;  %2412 = vmatpush1.msra.mxu1 %v5224_v29 }
 0x64c   : > { %2342 = vmatprep.subr.mxu0 %v5229_v30  ;;  %2413 = vmatprep.subr.mxu1 %v5234_v31 }
 0x64d   : > { %2343 = vmatpush1.msra.mxu0 %v5241_v32  ;;  %2414 = vmatpush1.msra.mxu1 %v5246_v33  ;;  %v6966_v32 = vld [vmem:[#allocation39_spill] sm:$0xff] }
 0x64e   : > { %2344 = vmatprep.subr.mxu0 %v5253_v34  ;;  %2415 = vmatprep.subr.mxu1 %v5258_v35  ;;  %v1699_v33 = vadd.f32 %v6966_v32, %v6938_v61  ;;  %v2529_v32 = vld [vmem:[%s6573_s7 + $0xd8] sm:$0xff] }
 0x64f   : > { %2345 = vmatpush1.msra.mxu0 %v5265_v36  ;;  %2416 = vmatpush1.msra.mxu1 %v6941_v53  ;;  %v6967_v36 = vld [vmem:[#allocation44_spill] sm:$0xff] }
 0x650   : > { %2346 = vmatprep.subr.mxu0 %v6942_v62  ;;  %2417 = vmatprep.subr.mxu1 %v6943_v4  ;;  %v1701_v38 = vadd.f32 %v6967_v36, %v5513_v22  ;;  %v2562_v53 = vld [vmem:[%s6573_s7 + $0x1e0] sm:$0xff]  ;;  %v2564_v62 = vld [vmem:[%s6573_s7 + $0x1f0] sm:$0xff]  ;;  %v2561_v4 = vld [vmem:[%s6573_s7 + $0x1d8] sm:$0xff] }
 0x651   : > { %2347 = vmatpush1.msra.mxu0 %v6944_v50  ;;  %2418 = vmatpush1.msra.mxu1 %v6945_v39  ;;  %v2558_v50 = vld [vmem:[%s6573_s7 + $0x1c0] sm:$0xff]  ;;  %v2560_v39 = vld [vmem:[%s6573_s7 + $0x1d0] sm:$0xff]  ;;  %v2525_v36 = vld [vmem:[%s6573_s7 + $0xb8] sm:$0xff] }
 0x652   : > { %2348 = vmatprep.subr.mxu0 %v6946_v3  ;;  %2419 = vmatprep.subr.mxu1 %v6947_v59  ;;  %v2555_v3 = vld [vmem:[%s6573_s7 + $0x1a8] sm:$0xff]  ;;  %v2557_v59 = vld [vmem:[%s6573_s7 + $0x1b8] sm:$0xff] }
 0x653   : > { %2349 = vmatpush1.msra.mxu0 %v6948_v55  ;;  %2420 = vmatpush1.msra.mxu1 %v6949_v60  ;;  %v2554_v55 = vld [vmem:[%s6573_s7 + $0x1a0] sm:$0xff]  ;;  %v2556_v60 = vld [vmem:[%s6573_s7 + $0x1b0] sm:$0xff] }
 0x654   : > { %2350 = vmatprep.subr.mxu0 %v6950_v58  ;;  %2421 = vmatprep.subr.mxu1 %v6951_v5  ;;  %v2551_v58 = vld [vmem:[%s6573_s7 + $0x188] sm:$0xff]  ;;  %v2553_v5 = vld [vmem:[%s6573_s7 + $0x198] sm:$0xff] }
 0x655   : > { %2351 = vmatpush1.msra.mxu0 %v6952_v6  ;;  %2422 = vmatpush1.msra.mxu1 %v6953_v7  ;;  %v2550_v6 = vld [vmem:[%s6573_s7 + $0x180] sm:$0xff]  ;;  %v2552_v7 = vld [vmem:[%s6573_s7 + $0x190] sm:$0xff] }
 0x656   : > { %2352 = vmatprep.subr.mxu0 %v6954_v8  ;;  %2423 = vmatprep.subr.mxu1 %v6955_v9  ;;  %v2547_v8 = vld [vmem:[%s6573_s7 + $0x168] sm:$0xff]  ;;  %v2549_v9 = vld [vmem:[%s6573_s7 + $0x178] sm:$0xff] }
 0x657   : > { %2353 = vmatpush1.msra.mxu0 %v6956_v10  ;;  %2424 = vmatpush1.msra.mxu1 %v6957_v11  ;;  %v2546_v10 = vld [vmem:[%s6573_s7 + $0x160] sm:$0xff]  ;;  %v2548_v11 = vld [vmem:[%s6573_s7 + $0x170] sm:$0xff] }
 0x658   : > { %2354 = vmatprep.subr.mxu0 %v6958_v12  ;;  %2425 = vmatprep.subr.mxu1 %v6959_v13  ;;  %v2543_v12 = vld [vmem:[%s6573_s7 + $0x148] sm:$0xff]  ;;  %v2545_v13 = vld [vmem:[%s6573_s7 + $0x158] sm:$0xff] }
 0x659   : > { %2355 = vmatpush1.msra.mxu0 %v6960_v14  ;;  %2426 = vmatpush1.msra.mxu1 %v6961_v15  ;;  %v2542_v14 = vld [vmem:[%s6573_s7 + $0x140] sm:$0xff]  ;;  %v2544_v15 = vld [vmem:[%s6573_s7 + $0x150] sm:$0xff] }
 0x65a   : > { %2388 = vmatprep.mubr.f32.mxu0 %v6962_v16  ;;  %2459 = vmatprep.mubr.f32.mxu1 %v6962_v16 }
 0x65b   : > { %2588 = vmatprep.subr.mxu0 %v2563_v17  ;;  %2677 = vmatprep.subr.mxu1 %v2565_v18  ;;  %v2539_v17 = vld [vmem:[%s6573_s7 + $0x128] sm:$0xff]  ;;  %v2541_v18 = vld [vmem:[%s6573_s7 + $0x138] sm:$0xff] }
 0x6fa   : > { %v2214_v23 = vpop.f32.mrf.mxu0  ;;  %v2285_v31 = vpop.f32.mrf.mxu1 }
 0x6fb   : > { %v2290_v26 = vadd.f32 %v2214_v23, %v1610_v21  ;;  %v2292_v34 = vadd.f32 %v2285_v31, %v1699_v33  ;;  %v2540_v21 = vld [vmem:[%s6573_s7 + $0x130] sm:$0xff]  ;;  %v2535_v23 = vld [vmem:[%s6573_s7 + $0x108] sm:$0xff]  ;;  %v2526_v33 = vld [vmem:[%s6573_s7 + $0xc0] sm:$0xff] }
 0x6fc   : > { %v2216_v27 = vpop.f32.mrf.mxu0  ;;  %v2287_v35 = vpop.f32.mrf.mxu1  ;;  %v2527_v31 = vld [vmem:[%s6573_s7 + $0xc8] sm:$0xff] }
 0x6fd   : > { %v3642_v28 = vmul.f32 -1.442695, %v2290_v26  ;;  %v2291_v29 = vadd.f32 %v2216_v27, %v1612_v25  ;;  %v3644_v40 = vmul.f32 -1.442695, %v2292_v34  ;;  %v2293_v57 = vadd.f32 %v2287_v35, %v1701_v38  ;;  %v2534_v25 = vld [vmem:[%s6573_s7 + $0x100] sm:$0xff]  ;;  %v2536_v26 = vld [vmem:[%s6573_s7 + $0x110] sm:$0xff] }
 0x6fe   : > { %v2531_v27 = vld [vmem:[%s6573_s7 + $0xe8] sm:$0xff]  ;;  %v2528_v34 = vld [vmem:[%s6573_s7 + $0xd0] sm:$0xff]  ;;  %v2522_v38 = vld [vmem:[%s6573_s7 + $0xa0] sm:$0xff] }
 0x6ff   : > { %3771 = vpow2.f32 %v3642_v28  ;;  %v3643_v30 = vmul.f32 -1.442695, %v2291_v29  ;;  %v2533_v28 = vld [vmem:[%s6573_s7 + $0xf8] sm:$0xff]  ;;  %v2530_v29 = vld [vmem:[%s6573_s7 + $0xe0] sm:$0xff]  ;;  %v2523_v35 = vld [vmem:[%s6573_s7 + $0xa8] sm:$0xff] }
 0x701   : > { %3773 = vpow2.f32 %v3643_v30  ;;  %v2532_v30 = vld [vmem:[%s6573_s7 + $0xf0] sm:$0xff] }
 0x702   : > { %3775 = vpow2.f32 %v3644_v40  ;;  %v2524_v40 = vld [vmem:[%s6573_s7 + $0xb0] sm:$0xff] }
 0x70c   : > { %v3772_v54 = vpop.eup %3771 }
 0x70d   : > { %v2303_v49 = vadd.f32 1.0, %v3772_v54  ;;  %v2519_v54 = vld [vmem:[%s6573_s7 + $0x88] sm:$0xff] }
 0x70e   : > { %v3774_v56 = vpop.eup %3773 }
 0x70f   : > { %3777 = vrcp.f32 %v2303_v49  ;;  %v2304_v52 = vadd.f32 1.0, %v3774_v56  ;;  %v3776_v2 = vpop.eup %3775  ;;  %v2518_v49 = vld [vmem:[%s6573_s7 + $0x80] sm:$0xff]  ;;  %v2520_v56 = vld [vmem:[%s6573_s7 + $0x90] sm:$0xff] }
 0x710   : > { %3779 = vtanh.f32 %v2293_v57  ;;  %v2305_v42 = vadd.f32 1.0, %v3776_v2  ;;  %v2521_v57 = vld [vmem:[%s6573_s7 + $0x98] sm:$0xff] }
 0x711   : > { %3781 = vrcp.f32 %v2304_v52  ;;  %v2515_v52 = vld [vmem:[%s6573_s7 + $0x68] sm:$0xff]  ;;  %v2517_v2 = vld [vmem:[%s6573_s7 + $0x78] sm:$0xff] }
 0x712   : > { %3783 = vrcp.f32 %v2305_v42  ;;  %v2513_v42 = vld [vmem:[%s6573_s7 + $0x58] sm:$0xff] }
 0x71c   : > { %v3778_v46 = vpop.eup %3777 }
 0x71d   : > { %v3780_v1 = vpop.eup %3779 }
 0x71e   : > { %v3782_v44 = vpop.eup %3781  ;;  %v2314_v47 = vmul.f32 %v3780_v1, %v3778_v46  ;;  %v2514_v46 = vld [vmem:[%s6573_s7 + $0x60] sm:$0xff]  ;;  %v2516_v1 = vld [vmem:[%s6573_s7 + $0x70] sm:$0xff] }
 0x71f   : > { %v2313_v48 = vmul.f32 %v3782_v44, %v5598_v43  ;;  %v3784_v63 = vpop.eup %3783  ;;  %v2559_v43 = vld [vmem:[%s6573_s7 + $0x1c8] sm:$0xff] }
 0x720   : > { %v2511_v44 = vld [vmem:[%s6573_s7 + $0x48] sm:$0xff] }
 0x721   : > { %v5684_v41 = vadd.f32 %v2314_v47, %v2313_v48  ;;  %v2510_v48 = vld [vmem:[%s6573_s7 + $0x40] sm:$0xff]  ;;  %v2512_v47 = vld [vmem:[%s6573_s7 + $0x50] sm:$0xff] }
 0x723   : > { %3785 = vtanh.f32 %v5684_v41 }
 0x730   : > { %v3786_v37 = vpop.eup %3785 }
 0x731   : > { %v5687_v0 = vmul.f32 %v3786_v37, %v3784_v63  ;;  %v2507_v63 = vld [vmem:[%s6573_s7 + $0x28] sm:$0xff]  ;;  %v2509_v37 = vld [vmem:[%s6573_s7 + $0x38] sm:$0xff] }
 0x733   : > { %2389 = vmatmul.mubr.f32.vlgmr.msra.gmra.mxu0 %v5687_v0  ;;  %2460 = vmatmul.mubr.f32.vlgmr.msra.gmra.mxu1 %v5687_v0 }
 0x734   : > { %2589 = vmatpush1.msra.mxu0 %v2562_v53  ;;  %2678 = vmatpush1.msra.mxu1 %v2564_v62  ;;  %v2506_v53 = vld [vmem:[%s6573_s7 + $0x20] sm:$0xff]  ;;  %v2508_v62 = vld [vmem:[%s6573_s7 + $0x30] sm:$0xff] }
 0x735   : > { %2590 = vmatprep.subr.mxu0 %v2559_v43  ;;  %2679 = vmatprep.subr.mxu1 %v2561_v4  ;;  %v2503_v43 = vld [vmem:[%s6573_s7 + $0x8] sm:$0xff]  ;;  %v2505_v4 = vld [vmem:[%s6573_s7 + $0x18] sm:$0xff] }
 0x736   : > { %2591 = vmatpush1.msra.mxu0 %v2558_v50  ;;  %2680 = vmatpush1.msra.mxu1 %v2560_v39  ;;  %v2502_v50 = vld [vmem:[%s6573_s7] sm:$0xff]  ;;  %v2504_v39 = vld [vmem:[%s6573_s7 + $0x10] sm:$0xff] }
 0x737   : > { %2592 = vmatprep.subr.mxu0 %v2555_v3  ;;  %2681 = vmatprep.subr.mxu1 %v2557_v59  ;;  %v6968_v3 = vld [vmem:[#allocation46_spill] sm:$0xff]  ;;  %v5894_v59 = vld [vmem:[%s6574_s8 + $0x1e8] sm:$0xff] }
 0x738   : > { %2593 = vmatpush1.msra.mxu0 %v2554_v55  ;;  %2682 = vmatpush1.msra.mxu1 %v2556_v60  ;;  %6969 = vst [vmem:[#allocation47_spill] sm:$0xff] %v5894_v59  ;;  %v5911_v55 = vld [vmem:[%s6574_s8 + $0x1f0] sm:$0xff]  ;;  %v5918_v60 = vld [vmem:[%s6574_s8 + $0x1c8] sm:$0xff] }
 0x739   : > { %2594 = vmatprep.subr.mxu0 %v2551_v58  ;;  %2683 = vmatprep.subr.mxu1 %v2553_v5  ;;  %v5923_v58 = vld [vmem:[%s6574_s8 + $0x1d8] sm:$0xff]  ;;  %v5930_v5 = vld [vmem:[%s6574_s8 + $0x1c0] sm:$0xff] }
 0x73a   : > { %2595 = vmatpush1.msra.mxu0 %v2550_v6  ;;  %2684 = vmatpush1.msra.mxu1 %v2552_v7  ;;  %v5935_v6 = vld [vmem:[%s6574_s8 + $0x1d0] sm:$0xff]  ;;  %v5942_v7 = vld [vmem:[%s6574_s8 + $0x1a8] sm:$0xff] }
 0x73b   : > { %2596 = vmatprep.subr.mxu0 %v2547_v8  ;;  %2685 = vmatprep.subr.mxu1 %v2549_v9  ;;  %v5947_v8 = vld [vmem:[%s6574_s8 + $0x1b8] sm:$0xff]  ;;  %v5954_v9 = vld [vmem:[%s6574_s8 + $0x1a0] sm:$0xff] }
 0x73c   : > { %2597 = vmatpush1.msra.mxu0 %v2546_v10  ;;  %2686 = vmatpush1.msra.mxu1 %v2548_v11  ;;  %v5959_v10 = vld [vmem:[%s6574_s8 + $0x1b0] sm:$0xff]  ;;  %v5966_v11 = vld [vmem:[%s6574_s8 + $0x188] sm:$0xff] }
 0x73d   : > { %2598 = vmatprep.subr.mxu0 %v2543_v12  ;;  %2687 = vmatprep.subr.mxu1 %v2545_v13  ;;  %v5971_v12 = vld [vmem:[%s6574_s8 + $0x198] sm:$0xff]  ;;  %v5978_v13 = vld [vmem:[%s6574_s8 + $0x180] sm:$0xff] }
 0x73e   : > { %2599 = vmatpush1.msra.mxu0 %v2542_v14  ;;  %2688 = vmatpush1.msra.mxu1 %v2544_v15  ;;  %v5983_v14 = vld [vmem:[%s6574_s8 + $0x190] sm:$0xff]  ;;  %v5990_v15 = vld [vmem:[%s6574_s8 + $0x168] sm:$0xff] }
 0x73f   : > { %2600 = vmatprep.subr.mxu0 %v2539_v17  ;;  %2689 = vmatprep.subr.mxu1 %v2541_v18  ;;  %v5995_v17 = vld [vmem:[%s6574_s8 + $0x178] sm:$0xff]  ;;  %v6002_v18 = vld [vmem:[%s6574_s8 + $0x160] sm:$0xff] }
 0x740   : > { %2601 = vmatpush1.msra.mxu0 %v2538_v20  ;;  %2690 = vmatpush1.msra.mxu1 %v2540_v21  ;;  %v6007_v20 = vld [vmem:[%s6574_s8 + $0x170] sm:$0xff]  ;;  %v6014_v21 = vld [vmem:[%s6574_s8 + $0x148] sm:$0xff] }
 0x741   : > { %2602 = vmatprep.subr.mxu0 %v2535_v23  ;;  %2691 = vmatprep.subr.mxu1 %v2537_v24  ;;  %v6019_v23 = vld [vmem:[%s6574_s8 + $0x158] sm:$0xff]  ;;  %v6026_v24 = vld [vmem:[%s6574_s8 + $0x140] sm:$0xff] }
 0x742   : > { %2603 = vmatpush1.msra.mxu0 %v2534_v25  ;;  %2692 = vmatpush1.msra.mxu1 %v2536_v26  ;;  %v6031_v25 = vld [vmem:[%s6574_s8 + $0x150] sm:$0xff]  ;;  %v6038_v26 = vld [vmem:[%s6574_s8 + $0x128] sm:$0xff] }
 0x743   : > { %2604 = vmatprep.subr.mxu0 %v2531_v27  ;;  %2693 = vmatprep.subr.mxu1 %v2533_v28  ;;  %v6043_v27 = vld [vmem:[%s6574_s8 + $0x138] sm:$0xff]  ;;  %v6050_v28 = vld [vmem:[%s6574_s8 + $0x120] sm:$0xff] }
 0x744   : > { %2605 = vmatpush1.msra.mxu0 %v2530_v29  ;;  %2694 = vmatpush1.msra.mxu1 %v2532_v30  ;;  %v6055_v29 = vld [vmem:[%s6574_s8 + $0x130] sm:$0xff]  ;;  %v6060_v30 = vld [vmem:[%s6574_s8 + $0x108] sm:$0xff] }
 0x745   : > { %2606 = vmatprep.subr.mxu0 %v2527_v31  ;;  %2695 = vmatprep.subr.mxu1 %v2529_v32  ;;  %v6067_v31 = vld [vmem:[%s6574_s8 + $0x118] sm:$0xff]  ;;  %v6072_v32 = vld [vmem:[%s6574_s8 + $0x100] sm:$0xff] }
 0x746   : > { %2607 = vmatpush1.msra.mxu0 %v2526_v33  ;;  %2696 = vmatpush1.msra.mxu1 %v2528_v34  ;;  %v6077_v33 = vld [vmem:[%s6574_s8 + $0x110] sm:$0xff]  ;;  %v6084_v34 = vld [vmem:[%s6574_s8 + $0xe8] sm:$0xff] }
 0x747   : > { %2608 = vmatprep.subr.mxu0 %v2523_v35  ;;  %2697 = vmatprep.subr.mxu1 %v2525_v36  ;;  %v6089_v35 = vld [vmem:[%s6574_s8 + $0xf8] sm:$0xff]  ;;  %v6094_v36 = vld [vmem:[%s6574_s8 + $0xe0] sm:$0xff] }
 0x748   : > { %2609 = vmatpush1.msra.mxu0 %v2522_v38  ;;  %2698 = vmatpush1.msra.mxu1 %v2524_v40  ;;  %v6101_v38 = vld [vmem:[%s6574_s8 + $0xf0] sm:$0xff]  ;;  %v6106_v40 = vld [vmem:[%s6574_s8 + $0xc8] sm:$0xff] }
 0x749   : > { %2610 = vmatprep.subr.mxu0 %v2519_v54  ;;  %2699 = vmatprep.subr.mxu1 %v2521_v57  ;;  %v6111_v54 = vld [vmem:[%s6574_s8 + $0xd8] sm:$0xff]  ;;  %v6118_v57 = vld [vmem:[%s6574_s8 + $0xc0] sm:$0xff] }
 0x74a   : > { %2611 = vmatpush1.msra.mxu0 %v2518_v49  ;;  %2700 = vmatpush1.msra.mxu1 %v2520_v56  ;;  %v6123_v49 = vld [vmem:[%s6574_s8 + $0xd0] sm:$0xff]  ;;  %v6130_v56 = vld [vmem:[%s6574_s8 + $0xa8] sm:$0xff] }
 0x74b   : > { %2612 = vmatprep.subr.mxu0 %v2515_v52  ;;  %2701 = vmatprep.subr.mxu1 %v2517_v2  ;;  %v6135_v52 = vld [vmem:[%s6574_s8 + $0xb8] sm:$0xff]  ;;  %v6142_v2 = vld [vmem:[%s6574_s8 + $0xa0] sm:$0xff] }
 0x74c   : > { %2613 = vmatpush1.msra.mxu0 %v2514_v46  ;;  %2702 = vmatpush1.msra.mxu1 %v2516_v1  ;;  %6971 = vst [vmem:[#allocation9_spill] sm:$0xff] %v6142_v2  ;;  %v6147_v46 = vld [vmem:[%s6574_s8 + $0xb0] sm:$0xff]  ;;  %v6154_v1 = vld [vmem:[%s6574_s8 + $0x88] sm:$0xff] }
 0x74d   : > { %2614 = vmatprep.subr.mxu0 %v2511_v44  ;;  %2703 = vmatprep.subr.mxu1 %v2513_v42  ;;  %6972 = vst [vmem:[#allocation25_spill] sm:$0xff] %v6147_v46  ;;  %6973 = vst [vmem:[#allocation26_spill] sm:$0xff] %v6154_v1  ;;  %v6159_v44 = vld [vmem:[%s6574_s8 + $0x98] sm:$0xff]  ;;  %v6166_v42 = vld [vmem:[%s6574_s8 + $0x80] sm:$0xff] }
 0x74e   : > { %2615 = vmatpush1.msra.mxu0 %v2510_v48  ;;  %2704 = vmatpush1.msra.mxu1 %v2512_v47  ;;  %6974 = vst [vmem:[#allocation45_spill] sm:$0xff] %v6159_v44  ;;  %6975 = vst [vmem:[#allocation27_spill] sm:$0xff] %v6166_v42  ;;  %v6171_v48 = vld [vmem:[%s6574_s8 + $0x90] sm:$0xff]  ;;  %v6178_v47 = vld [vmem:[%s6574_s8 + $0x68] sm:$0xff] }
 0x74f   : > { %2616 = vmatprep.subr.mxu0 %v2507_v63  ;;  %2705 = vmatprep.subr.mxu1 %v2509_v37  ;;  %6976 = vst [vmem:[#allocation29_spill] sm:$0xff] %v6171_v48  ;;  %6977 = vst [vmem:[#allocation10_spill] sm:$0xff] %v6178_v47  ;;  %v6183_v63 = vld [vmem:[%s6574_s8 + $0x78] sm:$0xff]  ;;  %v6190_v37 = vld [vmem:[%s6574_s8 + $0x60] sm:$0xff] }
 0x750   : > { %2617 = vmatpush1.msra.mxu0 %v2506_v53  ;;  %2706 = vmatpush1.msra.mxu1 %v2508_v62  ;;  %6978 = vst [vmem:[#allocation11_spill] sm:$0xff] %v6183_v63  ;;  %6979 = vst [vmem:[#allocation12_spill] sm:$0xff] %v6190_v37  ;;  %v6195_v53 = vld [vmem:[%s6574_s8 + $0x70] sm:$0xff]  ;;  %v6202_v62 = vld [vmem:[%s6574_s8 + $0x48] sm:$0xff] }
 0x751   : > { %2618 = vmatprep.subr.mxu0 %v2503_v43  ;;  %2707 = vmatprep.subr.mxu1 %v2505_v4  ;;  %6980 = vst [vmem:[#allocation13_spill] sm:$0xff] %v6195_v53  ;;  %6981 = vst [vmem:[#allocation14_spill] sm:$0xff] %v6202_v62  ;;  %v6207_v43 = vld [vmem:[%s6574_s8 + $0x58] sm:$0xff]  ;;  %v6214_v4 = vld [vmem:[%s6574_s8 + $0x40] sm:$0xff] }
 0x752   : > { %2619 = vmatpush1.msra.mxu0 %v2502_v50  ;;  %2652 = vmatprep.mubr.f32.mxu0 %v6962_v16  ;;  %6982 = vst [vmem:[#allocation6_spill] sm:$0xff] %v6207_v43  ;;  %6983 = vst [vmem:[#allocation7_spill] sm:$0xff] %v6214_v4  ;;  %v6219_v50 = vld [vmem:[%s6574_s8 + $0x50] sm:$0xff] }
 0x753   : > { %2708 = vmatpush1.msra.mxu1 %v2504_v39  ;;  %2741 = vmatprep.mubr.f32.mxu1 %v6962_v16  ;;  %6984 = vst [vmem:[#allocation35_spill] sm:$0xff] %v6219_v50  ;;  %v6226_v39 = vld [vmem:[%s6574_s8 + $0x28] sm:$0xff] }
 0x754   : > { %2653 = vmatmul.mubr.f32.vlgmr.msra.gmra.mxu0 %v6968_v3  ;;  %2742 = vmatmul.mubr.f32.vlgmr.msra.gmra.mxu1 %v6968_v3  ;;  %6985 = vst [vmem:[#allocation37_spill] sm:$0xff] %v6226_v39  ;;  %v6231_v3 = vld [vmem:[%s6574_s8 + $0x38] sm:$0xff] }
 0x755   : > { %2658 = vmatprep.mubr.f32.mxu0 %v6962_v16  ;;  %2747 = vmatprep.mubr.f32.mxu1 %v6962_v16  ;;  %6986 = vst [vmem:[#allocation38_spill] sm:$0xff] %v6231_v3 }
 0x756   : > { %2854 = vmatprep.subr.mxu0 %v5894_v59 }
 0x758   : > { %2659 = vmatmul.mubr.f32.gmra.mxu0 %v5601_v51  ;;  %2748 = vmatmul.mubr.f32.gmra.mxu1 %v5601_v51  ;;  %v5899_v51 = vld [vmem:[%s6574_s8 + $0x1f8] sm:$0xff] }
 0x759   : > { %2664 = vmatprep.mubr.f32.mxu0 %v6962_v16  ;;  %2753 = vmatprep.mubr.f32.mxu1 %v6962_v16  ;;  %6970 = vst [vmem:[#allocation8_spill] sm:$0xff] %v5899_v51 }
 0x75a   : > { %2925 = vmatprep.subr.mxu1 %v5899_v51 }
 0x75b   : > { %2926 = vmatpush1.msra.mxu1 %v5911_v55 }
 0x75c   : > { %2665 = vmatmul.mubr.f32.gmra.mxu0 %v5687_v0  ;;  %2754 = vmatmul.mubr.f32.gmra.mxu1 %v5687_v0  ;;  %v5906_v0 = vld [vmem:[%s6574_s8 + $0x1e0] sm:$0xff] }
 0x75d   : > { %2670 = vmatprep.mubr.f32.mxu0 %v6962_v16  ;;  %2759 = vmatprep.mubr.f32.mxu1 %v6962_v16 }
 0x75e   : > { %2855 = vmatpush1.msra.mxu0 %v5906_v0  ;;  %2927 = vmatprep.subr.mxu1 %v5923_v58 }
 0x75f   : > { %2856 = vmatprep.subr.mxu0 %v5918_v60  ;;  %2928 = vmatpush1.msra.mxu1 %v5935_v6 }
 0x760   : > { %2857 = vmatpush1.msra.mxu0 %v5930_v5  ;;  %2929 = vmatprep.subr.mxu1 %v5947_v8 }
 0x761   : > { %2858 = vmatprep.subr.mxu0 %v5942_v7  ;;  %2930 = vmatpush1.msra.mxu1 %v5959_v10 }
 0x762   : > { %2859 = vmatpush1.msra.mxu0 %v5954_v9  ;;  %2931 = vmatprep.subr.mxu1 %v5971_v12 }
 0x763   : > { %2860 = vmatprep.subr.mxu0 %v5966_v11  ;;  %2932 = vmatpush1.msra.mxu1 %v5983_v14 }
 0x764   : > { %2861 = vmatpush1.msra.mxu0 %v5978_v13  ;;  %2933 = vmatprep.subr.mxu1 %v5995_v17 }
 0x765   : > { %2862 = vmatprep.subr.mxu0 %v5990_v15  ;;  %2934 = vmatpush1.msra.mxu1 %v6007_v20 }
 0x766   : > { %2863 = vmatpush1.msra.mxu0 %v6002_v18  ;;  %2935 = vmatprep.subr.mxu1 %v6019_v23 }
 0x767   : > { %2864 = vmatprep.subr.mxu0 %v6014_v21  ;;  %2936 = vmatpush1.msra.mxu1 %v6031_v25 }
 0x768   : > { %2865 = vmatpush1.msra.mxu0 %v6026_v24  ;;  %2937 = vmatprep.subr.mxu1 %v6043_v27 }
 0x769   : > { %2866 = vmatprep.subr.mxu0 %v6038_v26  ;;  %2938 = vmatpush1.msra.mxu1 %v6055_v29 }
 0x76a   : > { %2867 = vmatpush1.msra.mxu0 %v6050_v28  ;;  %2939 = vmatprep.subr.mxu1 %v6067_v31 }
 0x76b   : > { %2868 = vmatprep.subr.mxu0 %v6060_v30  ;;  %2940 = vmatpush1.msra.mxu1 %v6077_v33 }
 0x76c   : > { %2869 = vmatpush1.msra.mxu0 %v6072_v32  ;;  %2941 = vmatprep.subr.mxu1 %v6089_v35 }
 0x76d   : > { %2870 = vmatprep.subr.mxu0 %v6084_v34  ;;  %2942 = vmatpush1.msra.mxu1 %v6101_v38 }
 0x76e   : > { %2871 = vmatpush1.msra.mxu0 %v6094_v36  ;;  %2943 = vmatprep.subr.mxu1 %v6111_v54 }
 0x76f   : > { %2872 = vmatprep.subr.mxu0 %v6106_v40  ;;  %2944 = vmatpush1.msra.mxu1 %v6123_v49 }
 0x770   : > { %2873 = vmatpush1.msra.mxu0 %v6118_v57  ;;  %2945 = vmatprep.subr.mxu1 %v6135_v52 }
 0x771   : > { %2874 = vmatprep.subr.mxu0 %v6130_v56  ;;  %2946 = vmatpush1.msra.mxu1 %v6147_v46 }
 0x772   : > { %2875 = vmatpush1.msra.mxu0 %v6142_v2  ;;  %2947 = vmatprep.subr.mxu1 %v6159_v44 }
 0x773   : > { %2876 = vmatprep.subr.mxu0 %v6154_v1  ;;  %2948 = vmatpush1.msra.mxu1 %v6171_v48  ;;  %v6996_v1 = vld [vmem:[#allocation43_spill] sm:$0xff] }
 0x774   : > { %2877 = vmatpush1.msra.mxu0 %v6166_v42  ;;  %2949 = vmatprep.subr.mxu1 %v6183_v63 }
 0x775   : > { %2878 = vmatprep.subr.mxu0 %v6178_v47  ;;  %2950 = vmatpush1.msra.mxu1 %v6195_v53  ;;  %v6243_v53 = vld [vmem:[%s6574_s8 + $0x30] sm:$0xff] }
 0x776   : > { %2879 = vmatpush1.msra.mxu0 %v6190_v37  ;;  %2951 = vmatprep.subr.mxu1 %v6207_v43  ;;  %v6238_v37 = vld [vmem:[%s6574_s8 + $0x20] sm:$0xff]  ;;  %6988 = vst [vmem:[#allocation15_spill] sm:$0xff] %v6243_v53  ;;  %v6255_v43 = vld [vmem:[%s6574_s8 + $0x18] sm:$0xff] }
 0x777   : > { %2880 = vmatprep.subr.mxu0 %v6202_v62  ;;  %6987 = vst [vmem:[#allocation40_spill] sm:$0xff] %v6238_v37  ;;  %2952 = vmatpush1.msra.mxu1 %v6219_v50  ;;  %v6250_v62 = vld [vmem:[%s6574_s8 + $0x8] sm:$0xff]  ;;  %6990 = vst [vmem:[#allocation17_spill] sm:$0xff] %v6255_v43  ;;  %v6267_v50 = vld [vmem:[%s6574_s8 + $0x10] sm:$0xff] }
 0x778   : > { %2881 = vmatpush1.msra.mxu0 %v6214_v4  ;;  %6989 = vst [vmem:[#allocation16_spill] sm:$0xff] %v6250_v62  ;;  %2953 = vmatprep.subr.mxu1 %v6231_v3  ;;  %v6262_v4 = vld [vmem:[%s6574_s8] sm:$0xff]  ;;  %6992 = vst [vmem:[#allocation19_spill] sm:$0xff] %v6267_v50  ;;  %v6993_v3 = vld [vmem:[#allocation41_spill] sm:$0xff] }
 0x779   : > { %2882 = vmatprep.subr.mxu0 %v6226_v39  ;;  %6991 = vst [vmem:[#allocation18_spill] sm:$0xff] %v6262_v4  ;;  %2954 = vmatpush1.msra.mxu1 %v6243_v53  ;;  %v1616_v39 = vadd.f32 %v6993_v3, %v6963_v19  ;;  %v1707_v19 = vadd.f32 %v6996_v1, %v5513_v22  ;;  %v6998_v1 = vld [vmem:[#allocation25_spill] sm:$0xff] }
 0x77a   : > { %2883 = vmatpush1.msra.mxu0 %v6238_v37  ;;  %2955 = vmatprep.subr.mxu1 %v6255_v43  ;;  %v6994_v37 = vld [vmem:[#allocation42_spill] sm:$0xff] }
 0x77b   : > { %2884 = vmatprep.subr.mxu0 %v6250_v62  ;;  %2956 = vmatpush1.msra.mxu1 %v6267_v50  ;;  %v1618_v47 = vadd.f32 %v6994_v37, %v5496_v45  ;;  %v6995_v50 = vld [vmem:[#allocation48_spill] sm:$0xff] }
 0x77c   : > { %2885 = vmatpush1.msra.mxu0 %v6262_v4  ;;  %3100 = vmatprep.subr.mxu1 %v5899_v51 }
 0x77d   : > { %3029 = vmatprep.subr.mxu0 %v5894_v59  ;;  %v1705_v59 = vadd.f32 %v6995_v50, %v6938_v61  ;;  %v7001_v50 = vld [vmem:[#allocation27_spill] sm:$0xff] }
 0x7f3   : > { %v2390_v63 = vpop.f32.mrf.mxu0  ;;  %v2461_v4 = vpop.f32.mrf.mxu1 }
 0x7f4   : > { %v2466_v53 = vadd.f32 %v2390_v63, %v1616_v39  ;;  %v2468_v44 = vadd.f32 %v2461_v4, %v1705_v59  ;;  %v7000_v4 = vld [vmem:[#allocation45_spill] sm:$0xff] }
 0x7f5   : > { %v2392_v48 = vpop.f32.mrf.mxu0  ;;  %v2463_v51 = vpop.f32.mrf.mxu1  ;;  %v7002_v39 = vld [vmem:[#allocation29_spill] sm:$0xff] }
 0x7f6   : > { %v3645_v62 = vmul.f32 -1.442695, %v2466_v53  ;;  %v2467_v42 = vadd.f32 %v2392_v48, %v1618_v47  ;;  %v3647_v3 = vmul.f32 -1.442695, %v2468_v44  ;;  %v2469_v46 = vadd.f32 %v2463_v51, %v1707_v19  ;;  %v6999_v44 = vld [vmem:[#allocation26_spill] sm:$0xff] }
 0x7f7   : > { %v7003_v19 = vld [vmem:[#allocation10_spill] sm:$0xff] }
 0x7f8   : > { %3787 = vpow2.f32 %v3645_v62  ;;  %v3646_v43 = vmul.f32 -1.442695, %v2467_v42 }
 0x7fa   : > { %3789 = vpow2.f32 %v3646_v43 }
 0x7fb   : > { %3791 = vpow2.f32 %v3647_v3  ;;  %v7004_v3 = vld [vmem:[#allocation11_spill] sm:$0xff] }
 0x7fc   : > { %3793 = vtanh.f32 %v2469_v46  ;;  %v2847_v46 = vld [vmem:[#allocation5 + $0x18] sm:$0xff] }
 0x805   : > { %v3788_v2 = vpop.eup %3787 }
 0x806   : > { %v2479_v45 = vadd.f32 1.0, %v3788_v2 }
 0x807   : > { %v3790_v63 = vpop.eup %3789 }
 0x808   : > { %3795 = vrcp.f32 %v2479_v45  ;;  %v2480_v48 = vadd.f32 1.0, %v3790_v63  ;;  %v3792_v42 = vpop.eup %3791  ;;  %v7005_v45 = vld [vmem:[#allocation12_spill] sm:$0xff]  ;;  %v7006_v63 = vld [vmem:[#allocation13_spill] sm:$0xff] }
 0x809   : > { %v3794_v47 = vpop.eup %3793  ;;  %v2481_v59 = vadd.f32 1.0, %v3792_v42  ;;  %v7008_v42 = vld [vmem:[#allocation6_spill] sm:$0xff] }
 0x80a   : > { %3797 = vrcp.f32 %v2480_v48  ;;  %v7007_v48 = vld [vmem:[#allocation14_spill] sm:$0xff] }
 0x80b   : > { %3799 = vrcp.f32 %v2481_v59  ;;  %v7013_v59 = vld [vmem:[#allocation40_spill] sm:$0xff] }
 0x815   : > { %v3796_v37 = vpop.eup %3795 }
 0x816   : > { %v2490_v53 = vmul.f32 %v3796_v37, %v3794_v47  ;;  %v7009_v47 = vld [vmem:[#allocation7_spill] sm:$0xff] }
 0x817   : > { %v3798_v61 = vpop.eup %3797  ;;  %v7010_v37 = vld [vmem:[#allocation35_spill] sm:$0xff] }
 0x818   : > { %v2489_v62 = vmul.f32 %v3798_v61, %v5684_v41  ;;  %v3800_v22 = vpop.eup %3799  ;;  %v6997_v41 = vld [vmem:[#allocation9_spill] sm:$0xff]  ;;  %v7012_v61 = vld [vmem:[#allocation38_spill] sm:$0xff] }
 0x81a   : > { %v2491_v43 = vadd.f32 %v2490_v53, %v2489_v62  ;;  %v7011_v53 = vld [vmem:[#allocation37_spill] sm:$0xff]  ;;  %v7014_v62 = vld [vmem:[#allocation15_spill] sm:$0xff] }
 0x81c   : > { %2497 = vst [vmem:[#allocation5] sm:$0xff] %v2491_v43  ;;  %3801 = vtanh.f32 %v2491_v43  ;;  %v7015_v43 = vld [vmem:[#allocation16_spill] sm:$0xff] }
 0x829   : > { %v3802_v51 = vpop.eup %3801 }
 0x82a   : > { %v2493_v2 = vmul.f32 %v3802_v51, %v3800_v22  ;;  %v7016_v22 = vld [vmem:[#allocation17_spill] sm:$0xff]  ;;  %v7017_v51 = vld [vmem:[#allocation18_spill] sm:$0xff] }
 0x82c   : > { %2496 = vst [vmem:[#allocation5 + $0x8] sm:$0xff] %v2493_v2  ;;  %2671 = vmatmul.mubr.f32.gmra.mxu0 %v2493_v2  ;;  %2760 = vmatmul.mubr.f32.gmra.mxu1 %v2493_v2  ;;  %v7018_v2 = vld [vmem:[#allocation19_spill] sm:$0xff] }
 0x82d   : > { %2918 = vmatprep.mubr.f32.mxu0 %v6962_v16  ;;  %2989 = vmatprep.mubr.f32.mxu1 %v6962_v16 }
 0x830   : > { %2919 = vmatmul.mubr.f32.vlgmr.msra.gmra.mxu0 %v2847_v46  ;;  %2990 = vmatmul.mubr.f32.vlgmr.msra.gmra.mxu1 %v2847_v46  ;;  %v7019_v46 = vld [vmem:[#allocation47_spill] sm:$0xff] }
 0x831   : > { %3030 = vmatpush1.msra.mxu0 %v5906_v0  ;;  %3101 = vmatpush1.msra.mxu1 %v5911_v55 }
 0x832   : > { %3031 = vmatprep.subr.mxu0 %v5918_v60  ;;  %3102 = vmatprep.subr.mxu1 %v5923_v58 }
 0x833   : > { %3032 = vmatpush1.msra.mxu0 %v5930_v5  ;;  %3103 = vmatpush1.msra.mxu1 %v5935_v6 }
 0x834   : > { %3033 = vmatprep.subr.mxu0 %v5942_v7  ;;  %3104 = vmatprep.subr.mxu1 %v5947_v8 }
 0x835   : > { %3034 = vmatpush1.msra.mxu0 %v5954_v9  ;;  %3105 = vmatpush1.msra.mxu1 %v5959_v10 }
 0x836   : > { %3035 = vmatprep.subr.mxu0 %v5966_v11  ;;  %3106 = vmatprep.subr.mxu1 %v5971_v12 }
 0x837   : > { %3036 = vmatpush1.msra.mxu0 %v5978_v13  ;;  %3107 = vmatpush1.msra.mxu1 %v5983_v14 }
 0x838   : > { %3037 = vmatprep.subr.mxu0 %v5990_v15  ;;  %3108 = vmatprep.subr.mxu1 %v5995_v17 }
 0x839   : > { %3038 = vmatpush1.msra.mxu0 %v6002_v18  ;;  %3109 = vmatpush1.msra.mxu1 %v6007_v20 }
 0x83a   : > { %3039 = vmatprep.subr.mxu0 %v6014_v21  ;;  %3110 = vmatprep.subr.mxu1 %v6019_v23 }
 0x83b   : > { %3040 = vmatpush1.msra.mxu0 %v6026_v24  ;;  %3111 = vmatpush1.msra.mxu1 %v6031_v25 }
 0x83c   : > { %3041 = vmatprep.subr.mxu0 %v6038_v26  ;;  %3112 = vmatprep.subr.mxu1 %v6043_v27 }
 0x83d   : > { %3042 = vmatpush1.msra.mxu0 %v6050_v28  ;;  %3113 = vmatpush1.msra.mxu1 %v6055_v29 }
 0x83e   : > { %3043 = vmatprep.subr.mxu0 %v6060_v30  ;;  %3114 = vmatprep.subr.mxu1 %v6067_v31 }
 0x83f   : > { %3044 = vmatpush1.msra.mxu0 %v6072_v32  ;;  %3115 = vmatpush1.msra.mxu1 %v6077_v33 }
 0x840   : > { %3045 = vmatprep.subr.mxu0 %v6084_v34  ;;  %3116 = vmatprep.subr.mxu1 %v6089_v35 }
 0x841   : > { %3046 = vmatpush1.msra.mxu0 %v6094_v36  ;;  %3117 = vmatpush1.msra.mxu1 %v6101_v38 }
 0x842   : > { %3047 = vmatprep.subr.mxu0 %v6106_v40  ;;  %3118 = vmatprep.subr.mxu1 %v6111_v54 }
 0x843   : > { %3048 = vmatpush1.msra.mxu0 %v6118_v57  ;;  %3119 = vmatpush1.msra.mxu1 %v6123_v49 }
 0x844   : > { %3049 = vmatprep.subr.mxu0 %v6130_v56  ;;  %3120 = vmatprep.subr.mxu1 %v6135_v52 }
 0x845   : > { %3050 = vmatpush1.msra.mxu0 %v6997_v41  ;;  %3121 = vmatpush1.msra.mxu1 %v6998_v1 }
 0x846   : > { %3051 = vmatprep.subr.mxu0 %v6999_v44  ;;  %3122 = vmatprep.subr.mxu1 %v7000_v4 }
 0x847   : > { %3052 = vmatpush1.msra.mxu0 %v7001_v50  ;;  %3123 = vmatpush1.msra.mxu1 %v7002_v39 }
 0x848   : > { %3053 = vmatprep.subr.mxu0 %v7003_v19  ;;  %3124 = vmatprep.subr.mxu1 %v7004_v3 }
 0x849   : > { %3054 = vmatpush1.msra.mxu0 %v7005_v45  ;;  %3125 = vmatpush1.msra.mxu1 %v7006_v63 }
 0x84a   : > { %3055 = vmatprep.subr.mxu0 %v7007_v48  ;;  %3126 = vmatprep.subr.mxu1 %v7008_v42 }
 0x84b   : > { %3056 = vmatpush1.msra.mxu0 %v7009_v47  ;;  %3127 = vmatpush1.msra.mxu1 %v7010_v37  ;;  %v2743_v37 = vpop.f32.mrf.mxu1 }
 0x84c   : > { %3057 = vmatprep.subr.mxu0 %v7011_v53  ;;  %3128 = vmatprep.subr.mxu1 %v7012_v61  ;;  %v7020_v53 = vld [vmem:[#allocation8_spill] sm:$0xff]  ;;  %v2654_v61 = vpop.f32.mrf.mxu0 }
 0x84d   : > { %3058 = vmatpush1.msra.mxu0 %v7013_v59  ;;  %3129 = vmatpush1.msra.mxu1 %v7014_v62 }
 0x84e   : > { %3059 = vmatprep.subr.mxu0 %v7015_v43  ;;  %3130 = vmatprep.subr.mxu1 %v7016_v22  ;;  %v2656_v59 = vpop.f32.mrf.mxu0  ;;  %v2745_v43 = vpop.f32.mrf.mxu1 }
 0x84f   : > { %3060 = vmatpush1.msra.mxu0 %v7017_v51  ;;  %3093 = vmatprep.mubr.f32.mxu0 %v6962_v16 }
 0x850   : > { %3131 = vmatpush1.msra.mxu1 %v7018_v2  ;;  %3164 = vmatprep.mubr.f32.mxu1 %v6962_v16  ;;  %v6354_v62 = vpop.f32.mrf.mxu0  ;;  %v6358_v22 = vpop.f32.mrf.mxu1 }
 0x851   : > { %3205 = vmatprep.subr.mxu0 %v7019_v46  ;;  %3276 = vmatprep.subr.mxu1 %v7020_v53  ;;  %7021 = vst [vmem:[#allocation20_spill] sm:$0xff] %v6354_v62  ;;  %7023 = vst [vmem:[#allocation22_spill] sm:$0xff] %v6358_v22  ;;  %v2566_v46 = vld [vmem:[%s6575_s9] sm:$0xf] }
 0x852   : > { %v6356_v47 = vpop.f32.mrf.mxu0  ;;  %v6362_v42 = vpop.f32.mrf.mxu1  ;;  %v7027_v53 = vld [vmem:[#allocation32_spill] sm:$0xff] }
 0x853   : > { %7022 = vst [vmem:[#allocation21_spill] sm:$0xff] %v6356_v47  ;;  %7025 = vst [vmem:[#allocation24_spill] sm:$0xff] %v6362_v42  ;;  %v6370_v16 = vrot.slane %v2566_v46, %v7027_v53  ;;  %v7031_v47 = vld [vmem:[#allocation33_spill] sm:$0xff] }
 0x854   : > { %v6360_v51 = vpop.f32.mrf.mxu0  ;;  %v6372_v48 = vpop.f32.mrf.mxu1  ;;  %v6377_v63 = vrot.slane %v2566_v46, %v7031_v47 }
 0x855   : > { %7024 = vst [vmem:[#allocation23_spill] sm:$0xff] %v6360_v51  ;;  %7028 = vst [vmem:[#allocation28_spill] sm:$0xff] %v6370_v16  ;;  %v2655_v51 = vadd.f32 %v2654_v61, %v6370_v16 }
 0x856   : > { %v6367_v2 = vpop.f32.mrf.mxu0  ;;  %7029 = vst [vmem:[#allocation30_spill] sm:$0xff] %v6372_v48  ;;  %v6382_v42 = vpop.f32.mrf.mxu1  ;;  %v2657_v3 = vadd.f32 %v2656_v59, %v6377_v63 }
 0x857   : > { %7026 = vst [vmem:[#allocation31_spill] sm:$0xff] %v6367_v2  ;;  %7033 = vst [vmem:[#allocation46_spill] sm:$0xff] %v6382_v42  ;;  %v7037_v42 = vld [vmem:[#allocation36_spill] sm:$0xff] }
 0x858   : > { %v6394_v16 = vrot.slane %v2566_v46, %v7037_v42 }
 0x8ec   : > { %v6374_v62 = vpop.f32.mrf.mxu0  ;;  %v6385_v2 = vpop.f32.mrf.mxu1 }
 0x8ed   : > { %7030 = vst [vmem:[#allocation39_spill] sm:$0xff] %v6374_v62  ;;  %7034 = vst [vmem:[#allocation41_spill] sm:$0xff] %v6385_v2  ;;  %v7036_v62 = vld [vmem:[#allocation34_spill] sm:$0xff] }
 0x8ee   : > { %v6379_v22 = vpop.f32.mrf.mxu0  ;;  %v6387_v50 = vpop.f32.mrf.mxu1  ;;  %v6390_v4 = vrot.slane %v2566_v46, %v7036_v62 }
 0x8ef   : > { %7032 = vst [vmem:[#allocation44_spill] sm:$0xff] %v6379_v22  ;;  %7035 = vst [vmem:[#allocation42_spill] sm:$0xff] %v6387_v50 }
 0x8f0   : > { %v2920_v45 = vpop.f32.mrf.mxu0  ;;  %v2991_v61 = vpop.f32.mrf.mxu1  ;;  %v2744_v22 = vadd.f32 %v2743_v37, %v6390_v4 }
 0x8f1   : > { %v2996_v53 = vadd.f32 %v2920_v45, %v2655_v51  ;;  %v2746_v45 = vadd.f32 %v2745_v43, %v6394_v16 }
 0x8f2   : > { %v2922_v19 = vpop.f32.mrf.mxu0  ;;  %v2998_v59 = vadd.f32 %v2991_v61, %v2744_v22  ;;  %v2993_v2 = vpop.f32.mrf.mxu1 }
 0x8f3   : > { %v3648_v39 = vmul.f32 -1.442695, %v2996_v53  ;;  %v2997_v48 = vadd.f32 %v2922_v19, %v2657_v3  ;;  %v2999_v3 = vadd.f32 %v2993_v2, %v2746_v45 }
 0x8f4   : > { %v3650_v51 = vmul.f32 -1.442695, %v2998_v59 }
 0x8f5   : > { %3803 = vpow2.f32 %v3648_v39  ;;  %v3649_v47 = vmul.f32 -1.442695, %v2997_v48 }
 0x8f7   : > { %3805 = vpow2.f32 %v3649_v47  ;;  %v2849_v47 = vld [vmem:[#allocation5 + $0x20] sm:$0xff] }
 0x8f8   : > { %3807 = vpow2.f32 %v3650_v51  ;;  %v7039_v51 = vld [vmem:[#allocation27_spill] sm:$0xff] }
 0x902   : > { %v3804_v19 = vpop.eup %3803 }
 0x903   : > { %v3009_v53 = vadd.f32 1.0, %v3804_v19  ;;  %v7040_v19 = vld [vmem:[#allocation29_spill] sm:$0xff] }
 0x904   : > { %v3806_v39 = vpop.eup %3805 }
 0x905   : > { %3809 = vrcp.f32 %v3009_v53  ;;  %v3010_v48 = vadd.f32 1.0, %v3806_v39  ;;  %v3808_v62 = vpop.eup %3807  ;;  %v7042_v53 = vld [vmem:[#allocation11_spill] sm:$0xff]  ;;  %v7043_v39 = vld [vmem:[#allocation12_spill] sm:$0xff] }
 0x906   : > { %3811 = vtanh.f32 %v2999_v3  ;;  %v3011_v22 = vadd.f32 1.0, %v3808_v62  ;;  %v7041_v3 = vld [vmem:[#allocation10_spill] sm:$0xff] }
 0x907   : > { %3813 = vrcp.f32 %v3010_v48  ;;  %v7044_v48 = vld [vmem:[#allocation13_spill] sm:$0xff]  ;;  %v7045_v62 = vld [vmem:[#allocation14_spill] sm:$0xff] }
 0x908   : > { %3815 = vrcp.f32 %v3011_v22  ;;  %v7050_v22 = vld [vmem:[#allocation38_spill] sm:$0xff] }
 0x912   : > { %v3810_v37 = vpop.eup %3809 }
 0x913   : > { %v3812_v42 = vpop.eup %3811 }
 0x914   : > { %v3814_v46 = vpop.eup %3813  ;;  %v3020_v50 = vmul.f32 %v3812_v42, %v3810_v37  ;;  %v7046_v37 = vld [vmem:[#allocation6_spill] sm:$0xff]  ;;  %v7048_v42 = vld [vmem:[#allocation35_spill] sm:$0xff] }
 0x915   : > { %v3019_v61 = vmul.f32 %v3814_v46, %v2849_v47  ;;  %v3816_v2 = vpop.eup %3815  ;;  %v7047_v47 = vld [vmem:[#allocation7_spill] sm:$0xff]  ;;  %v7049_v46 = vld [vmem:[#allocation37_spill] sm:$0xff] }
 0x917   : > { %v6397_v43 = vadd.f32 %v3020_v50, %v3019_v61  ;;  %v7038_v50 = vld [vmem:[#allocation45_spill] sm:$0xff]  ;;  %v7051_v61 = vld [vmem:[#allocation40_spill] sm:$0xff] }
 0x919   : > { %3817 = vtanh.f32 %v6397_v43 }
 0x926   : > { %v3818_v59 = vpop.eup %3817 }
 0x927   : > { %v3023_v45 = vmul.f32 %v3818_v59, %v3816_v2  ;;  %v7052_v2 = vld [vmem:[#allocation15_spill] sm:$0xff]  ;;  %v7053_v59 = vld [vmem:[#allocation16_spill] sm:$0xff] }
 0x929   : > { %3024 = vst [vmem:[%s3948_s22] sm:$0xff] %v3023_v45  ;;  %3094 = vmatmul.mubr.f32.vlgmr.msra.gmra.mxu0 %v3023_v45  ;;  %3165 = vmatmul.mubr.f32.vlgmr.msra.gmra.mxu1 %v3023_v45  ;;  %v7054_v45 = vld [vmem:[#allocation17_spill] sm:$0xff] }
 0x92a   : > { %3206 = vmatpush1.msra.mxu0 %v5906_v0  ;;  %3277 = vmatpush1.msra.mxu1 %v5911_v55 }
 0x92b   : > { %3207 = vmatprep.subr.mxu0 %v5918_v60  ;;  %3278 = vmatprep.subr.mxu1 %v5923_v58 }
 0x92c   : > { %3208 = vmatpush1.msra.mxu0 %v5930_v5  ;;  %3279 = vmatpush1.msra.mxu1 %v5935_v6 }
 0x92d   : > { %3209 = vmatprep.subr.mxu0 %v5942_v7  ;;  %3280 = vmatprep.subr.mxu1 %v5947_v8 }
 0x92e   : > { %3210 = vmatpush1.msra.mxu0 %v5954_v9  ;;  %3281 = vmatpush1.msra.mxu1 %v5959_v10 }
 0x92f   : > { %3211 = vmatprep.subr.mxu0 %v5966_v11  ;;  %3282 = vmatprep.subr.mxu1 %v5971_v12 }
 0x930   : > { %3212 = vmatpush1.msra.mxu0 %v5978_v13  ;;  %3283 = vmatpush1.msra.mxu1 %v5983_v14 }
 0x931   : > { %3213 = vmatprep.subr.mxu0 %v5990_v15  ;;  %3284 = vmatprep.subr.mxu1 %v5995_v17 }
 0x932   : > { %3214 = vmatpush1.msra.mxu0 %v6002_v18  ;;  %3285 = vmatpush1.msra.mxu1 %v6007_v20 }
 0x933   : > { %3215 = vmatprep.subr.mxu0 %v6014_v21  ;;  %3286 = vmatprep.subr.mxu1 %v6019_v23 }
 0x934   : > { %3216 = vmatpush1.msra.mxu0 %v6026_v24  ;;  %3287 = vmatpush1.msra.mxu1 %v6031_v25 }
 0x935   : > { %3217 = vmatprep.subr.mxu0 %v6038_v26  ;;  %3288 = vmatprep.subr.mxu1 %v6043_v27 }
 0x936   : > { %3218 = vmatpush1.msra.mxu0 %v6050_v28  ;;  %3289 = vmatpush1.msra.mxu1 %v6055_v29 }
 0x937   : > { %3219 = vmatprep.subr.mxu0 %v6060_v30  ;;  %3290 = vmatprep.subr.mxu1 %v6067_v31 }
 0x938   : > { %3220 = vmatpush1.msra.mxu0 %v6072_v32  ;;  %3291 = vmatpush1.msra.mxu1 %v6077_v33 }
 0x939   : > { %3221 = vmatprep.subr.mxu0 %v6084_v34  ;;  %3292 = vmatprep.subr.mxu1 %v6089_v35 }
 0x93a   : > { %3222 = vmatpush1.msra.mxu0 %v6094_v36  ;;  %3293 = vmatpush1.msra.mxu1 %v6101_v38 }
 0x93b   : > { %3223 = vmatprep.subr.mxu0 %v6106_v40  ;;  %3294 = vmatprep.subr.mxu1 %v6111_v54 }
 0x93c   : > { %3224 = vmatpush1.msra.mxu0 %v6118_v57  ;;  %3295 = vmatpush1.msra.mxu1 %v6123_v49 }
 0x93d   : > { %3225 = vmatprep.subr.mxu0 %v6130_v56  ;;  %3296 = vmatprep.subr.mxu1 %v6135_v52 }
 0x93e   : > { %3226 = vmatpush1.msra.mxu0 %v6997_v41  ;;  %3297 = vmatpush1.msra.mxu1 %v6998_v1 }
 0x93f   : > { %3227 = vmatprep.subr.mxu0 %v6999_v44  ;;  %3298 = vmatprep.subr.mxu1 %v7038_v50  ;;  %v7064_v50 = vld [vmem:[#allocation24_spill] sm:$0xff] }
 0x940   : > { %3228 = vmatpush1.msra.mxu0 %v7039_v51  ;;  %3299 = vmatpush1.msra.mxu1 %v7040_v19 }
 0x941   : > { %3229 = vmatprep.subr.mxu0 %v7041_v3  ;;  %3300 = vmatprep.subr.mxu1 %v7042_v53 }
 0x942   : > { %3230 = vmatpush1.msra.mxu0 %v7043_v39  ;;  %3301 = vmatpush1.msra.mxu1 %v7044_v48  ;;  %v7055_v48 = vld [vmem:[#allocation18_spill] sm:$0xff] }
 0x943   : > { %3231 = vmatprep.subr.mxu0 %v7045_v62  ;;  %3302 = vmatprep.subr.mxu1 %v7046_v37  ;;  %v7056_v62 = vmov 0.0   ;;  %v7057_v37 = vld [vmem:[#allocation19_spill] sm:$0xff] }
 0x944   : > { %3232 = vmatpush1.msra.mxu0 %v7047_v47  ;;  %3303 = vmatpush1.msra.mxu1 %v7048_v42  ;;  %v7058_v42 = vld [vmem:[#allocation47_spill] sm:$0xff] }
 0x945   : > { %3233 = vmatprep.subr.mxu0 %v7049_v46  ;;  %3304 = vmatprep.subr.mxu1 %v7050_v22  ;;  %v7059_v46 = vld [vmem:[#allocation8_spill] sm:$0xff] }
 0x946   : > { %3234 = vmatpush1.msra.mxu0 %v7051_v61  ;;  %3305 = vmatpush1.msra.mxu1 %v7052_v2  ;;  %v7060_v22 = vld [vmem:[#allocation28_spill] sm:$0xff] }
 0x947   : > { %3235 = vmatprep.subr.mxu0 %v7053_v59  ;;  %3306 = vmatprep.subr.mxu1 %v7054_v45  ;;  %v7061_v61 = vld [vmem:[#allocation20_spill] sm:$0xff]  ;;  %v7062_v59 = vld [vmem:[#allocation21_spill] sm:$0xff] }
 0x948   : > { %3236 = vmatpush1.msra.mxu0 %v7055_v48  ;;  %3269 = vmatprep.mubr.f32.mxu0 %v7056_v62  ;;  %v2661_v47 = vadd.f32 %v7061_v61, %v7060_v22  ;;  %v2663_v39 = vadd.f32 %v7062_v59, %v6377_v63  ;;  %v2752_v61 = vadd.f32 %v7064_v50, %v6394_v16 }
 0x949   : > { %3307 = vmatpush1.msra.mxu1 %v7057_v37  ;;  %3340 = vmatprep.mubr.f32.mxu1 %v7056_v62  ;;  %v7063_v62 = vld [vmem:[#allocation22_spill] sm:$0xff] }
 0x94a   : > { %3381 = vmatprep.subr.mxu0 %v7058_v42  ;;  %3452 = vmatprep.subr.mxu1 %v7059_v46  ;;  %v2750_v42 = vadd.f32 %v7063_v62, %v6390_v4 }
 0x9e9   : > { %v3095_v2 = vpop.f32.mrf.mxu0  ;;  %v3166_v37 = vpop.f32.mrf.mxu1 }
 0x9ea   : > { %v3171_v45 = vadd.f32 %v3095_v2, %v2661_v47  ;;  %v3173_v51 = vadd.f32 %v3166_v37, %v2750_v42 }
 0x9eb   : > { %v3097_v53 = vpop.f32.mrf.mxu0  ;;  %v3168_v46 = vpop.f32.mrf.mxu1 }
 0x9ec   : > { %v3651_v48 = vmul.f32 -1.442695, %v3171_v45  ;;  %v3172_v3 = vadd.f32 %v3097_v53, %v2663_v39  ;;  %v3653_v22 = vmul.f32 -1.442695, %v3173_v51  ;;  %v3174_v44 = vadd.f32 %v3168_v46, %v2752_v61 }
 0x9ee   : > { %3819 = vpow2.f32 %v3651_v48  ;;  %v3652_v19 = vmul.f32 -1.442695, %v3172_v3 }
 0x9f0   : > { %3821 = vpow2.f32 %v3652_v19 }
 0x9f1   : > { %3823 = vpow2.f32 %v3653_v22 }
 0x9f2   : > { %3825 = vtanh.f32 %v3174_v44 }
 0x9fb   : > { %v3820_v1 = vpop.eup %3819 }
 0x9fc   : > { %v3184_v59 = vadd.f32 1.0, %v3820_v1 }
 0x9fd   : > { %v3822_v47 = vpop.eup %3821 }
 0x9fe   : > { %3827 = vrcp.f32 %v3184_v59  ;;  %v3185_v3 = vadd.f32 1.0, %v3822_v47  ;;  %v3824_v19 = vpop.eup %3823 }
 0x9ff   : > { %v3826_v53 = vpop.eup %3825  ;;  %v3186_v37 = vadd.f32 1.0, %v3824_v19 }
 0xa00   : > { %3829 = vrcp.f32 %v3185_v3 }
 0xa01   : > { %3831 = vrcp.f32 %v3186_v37 }
 0xa0b   : > { %v3828_v39 = vpop.eup %3827 }
 0xa0c   : > { %v3195_v48 = vmul.f32 %v3828_v39, %v3826_v53 }
 0xa0d   : > { %v3830_v62 = vpop.eup %3829 }
 0xa0e   : > { %v3194_v2 = vmul.f32 %v3830_v62, %v6397_v43  ;;  %v3832_v1 = vpop.eup %3831 }
 0xa10   : > { %v6476_v50 = vadd.f32 %v3195_v48, %v3194_v2 }
 0xa12   : > { %3833 = vtanh.f32 %v6476_v50 }
 0xa1f   : > { %v3834_v51 = vpop.eup %3833 }
 0xa20   : > { %v3198_v44 = vmul.f32 %v3834_v51, %v3832_v1  ;;  %v7092_v1 = vld [vmem:[#allocation39_spill] sm:$0xff] }
 0xa22   : > { %3654 = vst [vmem:[%s3948_s22 + $0x8] sm:$0xff] %v3198_v44  ;;  %3270 = vmatmul.mubr.f32.vlgmr.msra.gmra.mxu0 %v3198_v44  ;;  %3341 = vmatmul.mubr.f32.vlgmr.msra.gmra.mxu1 %v3198_v44 }
 0xa23   : > { %3382 = vmatpush1.msra.mxu0 %v5906_v0  ;;  %3453 = vmatpush1.msra.mxu1 %v5911_v55  ;;  %v7065_v0 = vld [vmem:[#allocation25_spill] sm:$0xff]  ;;  %v7066_v55 = vld [vmem:[#allocation26_spill] sm:$0xff] }
 0xa24   : > { %3383 = vmatprep.subr.mxu0 %v5918_v60  ;;  %3454 = vmatprep.subr.mxu1 %v5923_v58  ;;  %v7067_v60 = vld [vmem:[#allocation45_spill] sm:$0xff]  ;;  %v7068_v58 = vld [vmem:[#allocation27_spill] sm:$0xff] }
 0xa25   : > { %3384 = vmatpush1.msra.mxu0 %v5930_v5  ;;  %3455 = vmatpush1.msra.mxu1 %v5935_v6  ;;  %v7069_v5 = vld [vmem:[#allocation29_spill] sm:$0xff]  ;;  %v7070_v6 = vld [vmem:[#allocation10_spill] sm:$0xff] }
 0xa26   : > { %3385 = vmatprep.subr.mxu0 %v5942_v7  ;;  %3456 = vmatprep.subr.mxu1 %v5947_v8  ;;  %v7071_v7 = vld [vmem:[#allocation11_spill] sm:$0xff]  ;;  %v7072_v8 = vld [vmem:[#allocation12_spill] sm:$0xff] }
 0xa27   : > { %3386 = vmatpush1.msra.mxu0 %v5954_v9  ;;  %3457 = vmatpush1.msra.mxu1 %v5959_v10  ;;  %v7073_v9 = vld [vmem:[#allocation13_spill] sm:$0xff]  ;;  %v7074_v10 = vld [vmem:[#allocation14_spill] sm:$0xff] }
 0xa28   : > { %3387 = vmatprep.subr.mxu0 %v5966_v11  ;;  %3458 = vmatprep.subr.mxu1 %v5971_v12  ;;  %v7075_v11 = vld [vmem:[#allocation6_spill] sm:$0xff]  ;;  %v7076_v12 = vld [vmem:[#allocation7_spill] sm:$0xff] }
 0xa29   : > { %3388 = vmatpush1.msra.mxu0 %v5978_v13  ;;  %3459 = vmatpush1.msra.mxu1 %v5983_v14  ;;  %v7077_v13 = vld [vmem:[#allocation35_spill] sm:$0xff]  ;;  %v7078_v14 = vld [vmem:[#allocation37_spill] sm:$0xff] }
 0xa2a   : > { %3389 = vmatprep.subr.mxu0 %v5990_v15  ;;  %3460 = vmatprep.subr.mxu1 %v5995_v17  ;;  %v7079_v15 = vld [vmem:[#allocation38_spill] sm:$0xff]  ;;  %v7080_v17 = vld [vmem:[#allocation40_spill] sm:$0xff] }
 0xa2b   : > { %3390 = vmatpush1.msra.mxu0 %v6002_v18  ;;  %3461 = vmatpush1.msra.mxu1 %v6007_v20  ;;  %v7081_v18 = vld [vmem:[#allocation15_spill] sm:$0xff]  ;;  %v7082_v20 = vld [vmem:[#allocation16_spill] sm:$0xff] }
 0xa2c   : > { %3391 = vmatprep.subr.mxu0 %v6014_v21  ;;  %3462 = vmatprep.subr.mxu1 %v6019_v23  ;;  %v7083_v21 = vld [vmem:[#allocation17_spill] sm:$0xff]  ;;  %v7084_v23 = vld [vmem:[#allocation18_spill] sm:$0xff] }
 0xa2d   : > { %3392 = vmatpush1.msra.mxu0 %v6026_v24  ;;  %3463 = vmatpush1.msra.mxu1 %v6031_v25  ;;  %v7085_v24 = vmov 0.0   ;;  %v7086_v25 = vld [vmem:[#allocation19_spill] sm:$0xff] }
 0xa2e   : > { %3393 = vmatprep.subr.mxu0 %v6038_v26  ;;  %3464 = vmatprep.subr.mxu1 %v6043_v27  ;;  %v7087_v26 = vld [vmem:[#allocation28_spill] sm:$0xff]  ;;  %v7088_v27 = vld [vmem:[#allocation23_spill] sm:$0xff] }
 0xa2f   : > { %3394 = vmatpush1.msra.mxu0 %v6050_v28  ;;  %3465 = vmatpush1.msra.mxu1 %v6055_v29  ;;  %v2667_v28 = vadd.f32 %v7088_v27, %v7087_v26  ;;  %v2673_v51 = vadd.f32 %v7092_v1, %v7087_v26 }
 0xa30   : > { %3395 = vmatprep.subr.mxu0 %v6060_v30  ;;  %3466 = vmatprep.subr.mxu1 %v6067_v31  ;;  %v7089_v30 = vld [vmem:[#allocation31_spill] sm:$0xff] }
 0xa31   : > { %3396 = vmatpush1.msra.mxu0 %v6072_v32  ;;  %3467 = vmatpush1.msra.mxu1 %v6077_v33  ;;  %v2669_v31 = vadd.f32 %v7089_v30, %v6377_v63 }
 0xa32   : > { %3397 = vmatprep.subr.mxu0 %v6084_v34  ;;  %3468 = vmatprep.subr.mxu1 %v6089_v35 }
 0xa33   : > { %3398 = vmatpush1.msra.mxu0 %v6094_v36  ;;  %3469 = vmatpush1.msra.mxu1 %v6101_v38 }
 0xa34   : > { %3399 = vmatprep.subr.mxu0 %v6106_v40  ;;  %3470 = vmatprep.subr.mxu1 %v6111_v54  ;;  %v7090_v40 = vld [vmem:[#allocation30_spill] sm:$0xff] }
 0xa35   : > { %3400 = vmatpush1.msra.mxu0 %v6118_v57  ;;  %3471 = vmatpush1.msra.mxu1 %v6123_v49  ;;  %v2756_v54 = vadd.f32 %v7090_v40, %v6390_v4 }
 0xa36   : > { %3401 = vmatprep.subr.mxu0 %v6130_v56  ;;  %3472 = vmatprep.subr.mxu1 %v6135_v52  ;;  %v7091_v56 = vld [vmem:[#allocation46_spill] sm:$0xff] }
 0xa37   : > { %3402 = vmatpush1.msra.mxu0 %v6997_v41  ;;  %3473 = vmatpush1.msra.mxu1 %v7065_v0  ;;  %v2758_v52 = vadd.f32 %v7091_v56, %v6394_v16  ;;  %v7093_v0 = vld [vmem:[#allocation44_spill] sm:$0xff] }
 0xa38   : > { %3403 = vmatprep.subr.mxu0 %v7066_v55  ;;  %3474 = vmatprep.subr.mxu1 %v7067_v60  ;;  %v2675_v55 = vadd.f32 %v7093_v0, %v6377_v63 }
 0xa39   : > { %3404 = vmatpush1.msra.mxu0 %v7068_v58  ;;  %3475 = vmatpush1.msra.mxu1 %v7069_v5 }
 0xa3a   : > { %3405 = vmatprep.subr.mxu0 %v7070_v6  ;;  %3476 = vmatprep.subr.mxu1 %v7071_v7 }
 0xa3b   : > { %3406 = vmatpush1.msra.mxu0 %v7072_v8  ;;  %3477 = vmatpush1.msra.mxu1 %v7073_v9  ;;  %v7094_v8 = vld [vmem:[#allocation41_spill] sm:$0xff] }
 0xa3c   : > { %3407 = vmatprep.subr.mxu0 %v7074_v10  ;;  %3478 = vmatprep.subr.mxu1 %v7075_v11  ;;  %v2762_v9 = vadd.f32 %v7094_v8, %v6390_v4 }
 0xa3d   : > { %3408 = vmatpush1.msra.mxu0 %v7076_v12  ;;  %3479 = vmatpush1.msra.mxu1 %v7077_v13  ;;  %v7095_v12 = vld [vmem:[#allocation42_spill] sm:$0xff] }
 0xa3e   : > { %3409 = vmatprep.subr.mxu0 %v7078_v14  ;;  %3480 = vmatprep.subr.mxu1 %v7079_v15  ;;  %v2764_v13 = vadd.f32 %v7095_v12, %v6394_v16 }
 0xa3f   : > { %3410 = vmatpush1.msra.mxu0 %v7080_v17  ;;  %3481 = vmatpush1.msra.mxu1 %v7081_v18 }
 0xa40   : > { %3411 = vmatprep.subr.mxu0 %v7082_v20  ;;  %3482 = vmatprep.subr.mxu1 %v7083_v21 }
 0xa41   : > { %3412 = vmatpush1.msra.mxu0 %v7084_v23  ;;  %3445 = vmatprep.mubr.f32.mxu0 %v7085_v24 }
 0xa42   : > { %3483 = vmatpush1.msra.mxu1 %v7086_v25  ;;  %3516 = vmatprep.mubr.f32.mxu1 %v7085_v24 }
 0xae2   : > { %v3271_v29 = vpop.f32.mrf.mxu0  ;;  %v3342_v38 = vpop.f32.mrf.mxu1 }
 0xae3   : > { %v3347_v32 = vadd.f32 %v3271_v29, %v2667_v28  ;;  %v3349_v57 = vadd.f32 %v3342_v38, %v2756_v54 }
 0xae4   : > { %v3273_v33 = vpop.f32.mrf.mxu0  ;;  %v3344_v49 = vpop.f32.mrf.mxu1 }
 0xae5   : > { %v3655_v34 = vmul.f32 -1.442695, %v3347_v32  ;;  %v3348_v35 = vadd.f32 %v3273_v33, %v2669_v31  ;;  %v3657_v41 = vmul.f32 -1.442695, %v3349_v57  ;;  %v3350_v22 = vadd.f32 %v3344_v49, %v2758_v52 }
 0xae7   : > { %3835 = vpow2.f32 %v3655_v34  ;;  %v3656_v36 = vmul.f32 -1.442695, %v3348_v35 }
 0xae9   : > { %3837 = vpow2.f32 %v3656_v36 }
 0xaea   : > { %3839 = vpow2.f32 %v3657_v41 }
 0xaf4   : > { %v3836_v43 = vpop.eup %3835 }
 0xaf5   : > { %v3360_v45 = vadd.f32 1.0, %v3836_v43 }
 0xaf6   : > { %v3838_v42 = vpop.eup %3837 }
 0xaf7   : > { %3841 = vrcp.f32 %v3360_v45  ;;  %v3361_v46 = vadd.f32 1.0, %v3838_v42  ;;  %v3840_v61 = vpop.eup %3839 }
 0xaf8   : > { %3843 = vtanh.f32 %v3350_v22  ;;  %v3362_v19 = vadd.f32 1.0, %v3840_v61 }
 0xaf9   : > { %3845 = vrcp.f32 %v3361_v46 }
 0xafa   : > { %3847 = vrcp.f32 %v3362_v19 }
 0xb04   : > { %v3842_v59 = vpop.eup %3841 }
 0xb05   : > { %v3844_v47 = vpop.eup %3843 }
 0xb06   : > { %v3846_v3 = vpop.eup %3845  ;;  %v3371_v39 = vmul.f32 %v3844_v47, %v3842_v59 }
 0xb07   : > { %v3370_v53 = vmul.f32 %v3846_v3, %v6476_v50  ;;  %v3848_v62 = vpop.eup %3847 }
 0xb09   : > { %v3372_v48 = vadd.f32 %v3371_v39, %v3370_v53 }
 0xb0b   : > { %3849 = vtanh.f32 %v3372_v48 }
 0xb18   : > { %v3850_v37 = vpop.eup %3849 }
 0xb19   : > { %v3374_v2 = vmul.f32 %v3850_v37, %v3848_v62 }
 0xb1b   : > { %3658 = vst [vmem:[%s3948_s22 + $0x10] sm:$0xff] %v3374_v2  ;;  %3446 = vmatmul.mubr.f32.vlgmr.msra.gmra.mxu0 %v3374_v2  ;;  %3517 = vmatmul.mubr.f32.vlgmr.msra.gmra.mxu1 %v3374_v2 }
 0xbdb   : > { %v3447_v44 = vpop.f32.mrf.mxu0  ;;  %v3518_v7 = vpop.f32.mrf.mxu1 }
 0xbdc   : > { %v3523_v60 = vadd.f32 %v3447_v44, %v2673_v51  ;;  %v3525_v10 = vadd.f32 %v3518_v7, %v2762_v9 }
 0xbdd   : > { %v3449_v58 = vpop.f32.mrf.mxu0  ;;  %v3520_v11 = vpop.f32.mrf.mxu1 }
 0xbde   : > { %v3659_v50 = vmul.f32 -1.442695, %v3523_v60  ;;  %v3524_v5 = vadd.f32 %v3449_v58, %v2675_v55  ;;  %v3661_v14 = vmul.f32 -1.442695, %v3525_v10  ;;  %v3526_v15 = vadd.f32 %v3520_v11, %v2764_v13 }
 0xbe0   : > { %3851 = vpow2.f32 %v3659_v50  ;;  %v3660_v6 = vmul.f32 -1.442695, %v3524_v5 }
 0xbe2   : > { %3853 = vpow2.f32 %v3660_v6 }
 0xbe3   : > { %3855 = vpow2.f32 %v3661_v14 }
 0xbe4   : > { %3857 = vtanh.f32 %v3526_v15 }
 0xbed   : > { %v3852_v17 = vpop.eup %3851 }
 0xbee   : > { %v3536_v63 = vadd.f32 1.0, %v3852_v17 }
 0xbef   : > { %v3854_v18 = vpop.eup %3853 }
 0xbf0   : > { %3859 = vrcp.f32 %v3536_v63  ;;  %v3537_v20 = vadd.f32 1.0, %v3854_v18  ;;  %v3856_v21 = vpop.eup %3855 }
 0xbf1   : > { %v3858_v23 = vpop.eup %3857  ;;  %v3538_v26 = vadd.f32 1.0, %v3856_v21 }
 0xbf2   : > { %3861 = vrcp.f32 %v3537_v20 }
 0xbf3   : > { %3863 = vrcp.f32 %v3538_v26 }
 0xbfd   : > { %v3860_v24 = vpop.eup %3859 }
 0xbfe   : > { %v3547_v4 = vmul.f32 %v3860_v24, %v3858_v23 }
 0xbff   : > { %v3862_v25 = vpop.eup %3861 }
 0xc00   : > { %v3546_v27 = vmul.f32 %v3862_v25, %v3372_v48  ;;  %v3864_v16 = vpop.eup %3863 }
 0xc02   : > { %v3548_v28 = vadd.f32 %v3547_v4, %v3546_v27 }
 0xc04   : > { %3865 = vtanh.f32 %v3548_v28  ;;  %3554 = vst [vmem:[#allocation5 + $0x20] sm:$0xff] %v3548_v28 }
 0xc11   : > { %v3866_v29 = vpop.eup %3865 }
 0xc12   : > { %v3550_v30 = vmul.f32 %v3866_v29, %v3864_v16 }
 0xc14   : > { %3662 = vst [vmem:[%s3948_s22 + $0x18] sm:$0xff] %v3550_v30  ;;  %3553 = vst [vmem:[#allocation5 + $0x18] sm:$0xff] %v3550_v30 }
 0xc15 PF: > { %s20_s13 = sadd.s32 1, %s3873_s13  }
 0xc16   : > { %p17_p5 = scmp.ge.s32.totalorder %s20_s13, 4  }
 0xc18   :  { %19 = sbr.rel (!%p17_p5) target bundleno = 1 (0x1), region = 112 }

</bundles_post_ra>
